<compile_context>
chip_gen: v5e
topology: v5e:2x2
jax: 0.10.0
libtpu: 0.0.40
codegen_flags: <defaults>
</compile_context>

<pallas_src>
import math

import jax
import jax.numpy as jnp
from jax.experimental import pallas as pl
from jax.experimental.pallas import tpu as pltpu


def _round_up(n, m):
    return ((n + m - 1) // m) * m


def _cdiv(a, b):
    return -(-a // b)


def convkb_kernel(x_ref, cwb_ref, cbb_ref, fw_ref, fb_ref, out_ref):
    # x_ref  : (TB, S*D)   VMEM, storage dtype (bf16 default)  -- batch tile, flattened
    # cwb_ref: (O*S, D)    VMEM, math dtype  -- conv weight, row o*S+s = cw[o,s] bcast over D
    # cbb_ref: (O, D)      VMEM, math dtype  -- conv bias, row o = cb[o] bcast over D
    # fw_ref : (O, D)      VMEM, f32         -- fc weight reshaped: fw[o, d] == fc_W[0, o*D+d]
    # fb_ref : (1,)        SMEM, f32         -- fc bias (scalar)
    # out_ref: (1, 1, TB)  VMEM, f32         -- lane-dense row of logits for this tile
    O, D = fw_ref.shape
    S = cwb_ref.shape[0] // O

    # Static, lane-aligned per-position ref views in the storage dtype: plain vlds,
    # no f32 upcast temporaries written back to VMEM.
    xs = [x_ref[:, s * D:(s + 1) * D] for s in range(S)]

    acc = None
    for o in range(O):
        # Conv FMA chain in the math dtype of cwb (bf16 on v6e/v7x; f32 rows on v5e
        # fold the bf16->f32 upcast into the first multiply).
        c = xs[0] * cwb_ref[o * S:o * S + 1, :]
        for s in range(1, S):
            c = c + xs[s] * cwb_ref[o * S + s:o * S + s + 1, :]
        h = jnp.maximum(c + cbb_ref[o:o + 1, :], 0.0)            # + bias, ReLU
        # TODO(synk): dropout treated as identity (eval-mode / drop_prob=0; training
        # parity would need pltpu.prng_seed + prng_random_bits masking).
        term = h.astype(jnp.float32) * fw_ref[o:o + 1, :]        # fc contribution, f32
        acc = term if acc is None else acc + term                # single (TB, D) f32 acc

    # fc_layer tail: one lane reduction over D (XLU -- free under a VALU-bound regime)
    # plus the bias; store lane-dense.
    logits = jnp.sum(acc, axis=1) + fb_ref[0]                    # (TB,)
    out_ref[0, 0, :] = logits.astype(out_ref.dtype)


def convkb_forward(x, conv_w, conv_b, fc_w, fc_b, *, block_b=2048,
                   storage_dtype=jnp.bfloat16, conv_math_dtype=jnp.bfloat16,
                   vmem_limit_bytes=None):
    """ConvKB forward.

    x: (B, S, D); conv_w: (O, S); conv_b: (O,); fc_w: (1, O*D); fc_b: (1,).
    Returns (B, 1) float32 logits.

    storage_dtype: dtype x is stored/DMAed in (bf16 halves HBM + vld bytes).
    conv_math_dtype: dtype of the conv FMA chain + ReLU (bf16 for v6e/v7x,
      float32 for v5e which has no bf16 VALU).  fc accumulation is always f32.
    """
    B, S, D = x.shape
    O = conv_w.shape[0]
    assert fc_w.shape == (1, O * D), fc_w.shape

    # Tile selection: bb multiple of 256 (sublane/lane aligned x tile, lane-dense
    # output row) and an EVEN number of grid steps (>= 2) so both v7x TensorCores
    # get work and the last step never runs alone.
    bb_cap = max(256, _round_up(block_b, 256))
    num_tiles = max(2, 2 * _cdiv(B, 2 * bb_cap))
    bb = _round_up(_cdiv(B, num_tiles), 256)
    Bp = num_tiles * bb

    x2 = x.reshape(B, S * D).astype(storage_dtype)
    if Bp != B:
        # Zero tail rows produce garbage logits that are sliced off below; the padded
        # output must never be consumed pre-slice.
        x2 = jnp.pad(x2, ((0, Bp - B), (0, 0)))

    # Conv weight / bias pre-broadcast across D into tiny lane-dense slabs in the
    # math dtype: per-channel rows are single-vld sublane broadcasts in the kernel.
    cwb = jnp.broadcast_to(conv_w.astype(conv_math_dtype).reshape(O * S, 1), (O * S, D))
    cbb = jnp.broadcast_to(conv_b.astype(conv_math_dtype).reshape(O, 1), (O, D))
    fw2 = fc_w.reshape(O, D).astype(jnp.float32)     # torch flatten order: o*D + d
    fb1 = fc_b.astype(jnp.float32)

    out = pl.pallas_call(
        convkb_kernel,
        out_shape=jax.ShapeDtypeStruct((num_tiles, 1, bb), jnp.float32),
        grid=(num_tiles,),
        in_specs=[
            pl.BlockSpec((bb, S * D), lambda i: (i, 0)),            # x tile
            pl.BlockSpec((O * S, D), lambda i: (0, 0)),             # conv weight slab
            pl.BlockSpec((O, D), lambda i: (0, 0)),                 # conv bias slab
            pl.BlockSpec((O, D), lambda i: (0, 0)),                 # fc weight slab
            pl.BlockSpec(memory_space=pltpu.MemorySpace.SMEM),      # fc bias scalar
        ],
        out_specs=pl.BlockSpec((1, 1, bb), lambda i: (i, 0, 0)),
        compiler_params=pltpu.CompilerParams(
            dimension_semantics=("parallel",),       # batch tiles split over both TCs (v7x)
            vmem_limit_bytes=vmem_limit_bytes),      # only needed if block_b pushed past ~4K
    )(x2, cwb, cbb, fw2, fb1)

    return out.reshape(Bp, 1)[:B]


if __name__ == "__main__":
    # ConvKB(input_dim=D, input_seq_len=S, in_channels=1, out_channels=O,
    #        drop_prob=0.0, alpha_leaky=0.2) at small shapes.
    B, S, D, O = 200, 3, 128, 8   # B deliberately NOT a tile multiple -> exercises pad/slice path
    gain = 1.414

    key = jax.random.PRNGKey(0)
    k_x, k_cw, k_cb, k_fw, k_fb = jax.random.split(key, 5)

    x = jax.random.normal(k_x, (B, S, D), dtype=jnp.float32)

    # xavier_uniform_(conv weight (O,1,1,S), gain=1.414): fan_in=S, fan_out=O*S
    cw_bound = gain * math.sqrt(6.0 / (S + O * S))
    conv_w = jax.random.uniform(k_cw, (O, S), jnp.float32, -cw_bound, cw_bound)
    # torch default conv bias init: U(-1/sqrt(fan_in), 1/sqrt(fan_in)), fan_in=S
    cb_bound = 1.0 / math.sqrt(S)
    conv_b = jax.random.uniform(k_cb, (O,), jnp.float32, -cb_bound, cb_bound)
    # xavier_uniform_(fc weight (1, O*D), gain=1.414): fan_in=O*D, fan_out=1
    fw_bound = gain * math.sqrt(6.0 / (O * D + 1))
    fc_w = jax.random.uniform(k_fw, (1, O * D), jnp.float32, -fw_bound, fw_bound)
    fb_bound = 1.0 / math.sqrt(O * D)
    fc_b = jax.random.uniform(k_fb, (1,), jnp.float32, -fb_bound, fb_bound)

    def reference(xf):
        # Plain-JAX mirror of the PyTorch forward.
        conv = jnp.einsum("os,bsd->bod", conv_w, xf) + conv_b[None, :, None]  # (B, O, D)
        h = jnp.maximum(conv, 0.0).reshape(xf.shape[0], O * D)                # squeeze+view
        return h @ fc_w.T + fc_b[None, :]                                     # (B, 1)

    ref_f32 = reference(x)
    x_bf_in = x.astype(jnp.bfloat16).astype(jnp.float32)
    ref_bf_in = reference(x_bf_in)

    # (1) Exact-semantics check: f32 storage + f32 math vs the plain-JAX f32 reference.
    out_f32 = jax.block_until_ready(convkb_forward(
        x, conv_w, conv_b, fc_w, fc_b, block_b=256,
        storage_dtype=jnp.float32, conv_math_dtype=jnp.float32))
    assert out_f32.shape == (B, 1), out_f32.shape
    assert jnp.allclose(out_f32, ref_f32, atol=1e-4, rtol=1e-4), "f32 mismatch vs reference"

    # (2) v5e-style path: bf16 storage, f32 conv math (upcast folded into first mul).
    out_mix = jax.block_until_ready(convkb_forward(
        x, conv_w, conv_b, fc_w, fc_b, block_b=256,
        storage_dtype=jnp.bfloat16, conv_math_dtype=jnp.float32))
    assert out_mix.shape == (B, 1), out_mix.shape
    assert jnp.allclose(out_mix, ref_bf_in, atol=1e-4, rtol=1e-4), "bf16-storage/f32-math mismatch"

    # (3) Default fast path (v6e/v7x): bf16 storage + bf16 conv math, f32 fc accumulate.
    out_bf = jax.block_until_ready(convkb_forward(
        x, conv_w, conv_b, fc_w, fc_b, block_b=256))
    assert out_bf.shape == (B, 1), out_bf.shape
    # bf16 input rounding + bf16 conv math only; generous bounds.
    assert jnp.allclose(out_bf, ref_bf_in, atol=1e-1, rtol=1e-1), "bf16-math drift vs bf16-input ref"
    assert jnp.allclose(out_bf, ref_f32, atol=2e-1, rtol=2e-1), "bf16-path drift vs f32 reference"

    print("KERNEL_OK")
</pallas_src>

<mosaic_0001>
module attributes {stable_mosaic.version = 11 : i64} {
  func.func @convkb_kernel(%arg0: i32, %arg1: memref<256x384xf32, #tpu.memory_space<vmem>>, %arg2: memref<24x128xf32, #tpu.memory_space<vmem>>, %arg3: memref<8x128xf32, #tpu.memory_space<vmem>>, %arg4: memref<8x128xf32, #tpu.memory_space<vmem>>, %arg5: memref<1xf32, #tpu.memory_space<smem>>, %arg6: memref<1x1x256xf32, #tpu.memory_space<vmem>>) attributes {dimension_semantics = [#tpu.dimension_semantics<parallel>], iteration_bounds = array<i64: 2>, scalar_prefetch = 0 : i64, scratch_operands = 0 : i64, tpu.core_type = #tpu.core_type<tc>, window_params = [{transform_indices = @transform_0, window_bounds = array<i64: 256, 384>}, {pipeline_mode = #tpu.pipeline_mode<synchronous>, transform_indices = @transform_1, window_bounds = array<i64: 24, 128>}, {pipeline_mode = #tpu.pipeline_mode<synchronous>, transform_indices = @transform_2, window_bounds = array<i64: 8, 128>}, {pipeline_mode = #tpu.pipeline_mode<synchronous>, transform_indices = @transform_3, window_bounds = array<i64: 8, 128>}, {transform_indices = @transform_4, window_bounds = array<i64: 1>}, {transform_indices = @transform_5, window_bounds = array<i64: 1, 1, 256>}]} {
    %c0 = arith.constant 0 : index
    %c0_0 = arith.constant 0 : index
    %0 = vector.load %arg1[%c0, %c0_0] : memref<256x384xf32, #tpu.memory_space<vmem>>, vector<256x128xf32>
    %c0_1 = arith.constant 0 : index
    %c128 = arith.constant 128 : index
    %1 = vector.load %arg1[%c0_1, %c128] : memref<256x384xf32, #tpu.memory_space<vmem>>, vector<256x128xf32>
    %c0_2 = arith.constant 0 : index
    %c256 = arith.constant 256 : index
    %2 = vector.load %arg1[%c0_2, %c256] : memref<256x384xf32, #tpu.memory_space<vmem>>, vector<256x128xf32>
    %c0_3 = arith.constant 0 : index
    %c0_4 = arith.constant 0 : index
    %3 = vector.load %arg2[%c0_3, %c0_4] : memref<24x128xf32, #tpu.memory_space<vmem>>, vector<1x128xf32>
    %4 = vector.broadcast %3 : vector<1x128xf32> to vector<256x128xf32>
    %5 = arith.mulf %0, %4 : vector<256x128xf32>
    %c1 = arith.constant 1 : index
    %c0_5 = arith.constant 0 : index
    %6 = vector.load %arg2[%c1, %c0_5] : memref<24x128xf32, #tpu.memory_space<vmem>>, vector<1x128xf32>
    %7 = vector.broadcast %6 : vector<1x128xf32> to vector<256x128xf32>
    %8 = arith.mulf %1, %7 : vector<256x128xf32>
    %9 = arith.addf %5, %8 : vector<256x128xf32>
    %c2 = arith.constant 2 : index
    %c0_6 = arith.constant 0 : index
    %10 = vector.load %arg2[%c2, %c0_6] : memref<24x128xf32, #tpu.memory_space<vmem>>, vector<1x128xf32>
    %11 = vector.broadcast %10 : vector<1x128xf32> to vector<256x128xf32>
    %12 = arith.mulf %2, %11 : vector<256x128xf32>
    %13 = arith.addf %9, %12 : vector<256x128xf32>
    %c0_7 = arith.constant 0 : index
    %c0_8 = arith.constant 0 : index
    %14 = vector.load %arg3[%c0_7, %c0_8] : memref<8x128xf32, #tpu.memory_space<vmem>>, vector<1x128xf32>
    %15 = vector.broadcast %14 : vector<1x128xf32> to vector<256x128xf32>
    %16 = arith.addf %13, %15 : vector<256x128xf32>
    %cst = arith.constant 0.000000e+00 : f32
    %17 = vector.broadcast %cst : f32 to vector<256x128xf32>
    %18 = arith.maximumf %16, %17 : vector<256x128xf32>
    %c0_9 = arith.constant 0 : index
    %c0_10 = arith.constant 0 : index
    %19 = vector.load %arg4[%c0_9, %c0_10] : memref<8x128xf32, #tpu.memory_space<vmem>>, vector<1x128xf32>
    %20 = vector.broadcast %19 : vector<1x128xf32> to vector<256x128xf32>
    %21 = arith.mulf %18, %20 : vector<256x128xf32>
    %c3 = arith.constant 3 : index
    %c0_11 = arith.constant 0 : index
    %22 = vector.load %arg2[%c3, %c0_11] : memref<24x128xf32, #tpu.memory_space<vmem>>, vector<1x128xf32>
    %23 = vector.broadcast %22 : vector<1x128xf32> to vector<256x128xf32>
    %24 = arith.mulf %0, %23 : vector<256x128xf32>
    %c4 = arith.constant 4 : index
    %c0_12 = arith.constant 0 : index
    %25 = vector.load %arg2[%c4, %c0_12] : memref<24x128xf32, #tpu.memory_space<vmem>>, vector<1x128xf32>
    %26 = vector.broadcast %25 : vector<1x128xf32> to vector<256x128xf32>
    %27 = arith.mulf %1, %26 : vector<256x128xf32>
    %28 = arith.addf %24, %27 : vector<256x128xf32>
    %c5 = arith.constant 5 : index
    %c0_13 = arith.constant 0 : index
    %29 = vector.load %arg2[%c5, %c0_13] : memref<24x128xf32, #tpu.memory_space<vmem>>, vector<1x128xf32>
    %30 = vector.broadcast %29 : vector<1x128xf32> to vector<256x128xf32>
    %31 = arith.mulf %2, %30 : vector<256x128xf32>
    %32 = arith.addf %28, %31 : vector<256x128xf32>
    %c1_14 = arith.constant 1 : index
    %c0_15 = arith.constant 0 : index
    %33 = vector.load %arg3[%c1_14, %c0_15] : memref<8x128xf32, #tpu.memory_space<vmem>>, vector<1x128xf32>
    %34 = vector.broadcast %33 : vector<1x128xf32> to vector<256x128xf32>
    %35 = arith.addf %32, %34 : vector<256x128xf32>
    %cst_16 = arith.constant 0.000000e+00 : f32
    %36 = vector.broadcast %cst_16 : f32 to vector<256x128xf32>
    %37 = arith.maximumf %35, %36 : vector<256x128xf32>
    %c1_17 = arith.constant 1 : index
    %c0_18 = arith.constant 0 : index
    %38 = vector.load %arg4[%c1_17, %c0_18] : memref<8x128xf32, #tpu.memory_space<vmem>>, vector<1x128xf32>
    %39 = vector.broadcast %38 : vector<1x128xf32> to vector<256x128xf32>
    %40 = arith.mulf %37, %39 : vector<256x128xf32>
    %41 = arith.addf %21, %40 : vector<256x128xf32>
    %c6 = arith.constant 6 : index
    %c0_19 = arith.constant 0 : index
    %42 = vector.load %arg2[%c6, %c0_19] : memref<24x128xf32, #tpu.memory_space<vmem>>, vector<1x128xf32>
    %43 = vector.broadcast %42 : vector<1x128xf32> to vector<256x128xf32>
    %44 = arith.mulf %0, %43 : vector<256x128xf32>
    %c7 = arith.constant 7 : index
    %c0_20 = arith.constant 0 : index
    %45 = vector.load %arg2[%c7, %c0_20] : memref<24x128xf32, #tpu.memory_space<vmem>>, vector<1x128xf32>
    %46 = vector.broadcast %45 : vector<1x128xf32> to vector<256x128xf32>
    %47 = arith.mulf %1, %46 : vector<256x128xf32>
    %48 = arith.addf %44, %47 : vector<256x128xf32>
    %c8 = arith.constant 8 : index
    %c0_21 = arith.constant 0 : index
    %49 = vector.load %arg2[%c8, %c0_21] : memref<24x128xf32, #tpu.memory_space<vmem>>, vector<1x128xf32>
    %50 = vector.broadcast %49 : vector<1x128xf32> to vector<256x128xf32>
    %51 = arith.mulf %2, %50 : vector<256x128xf32>
    %52 = arith.addf %48, %51 : vector<256x128xf32>
    %c2_22 = arith.constant 2 : index
    %c0_23 = arith.constant 0 : index
    %53 = vector.load %arg3[%c2_22, %c0_23] : memref<8x128xf32, #tpu.memory_space<vmem>>, vector<1x128xf32>
    %54 = vector.broadcast %53 : vector<1x128xf32> to vector<256x128xf32>
    %55 = arith.addf %52, %54 : vector<256x128xf32>
    %cst_24 = arith.constant 0.000000e+00 : f32
    %56 = vector.broadcast %cst_24 : f32 to vector<256x128xf32>
    %57 = arith.maximumf %55, %56 : vector<256x128xf32>
    %c2_25 = arith.constant 2 : index
    %c0_26 = arith.constant 0 : index
    %58 = vector.load %arg4[%c2_25, %c0_26] : memref<8x128xf32, #tpu.memory_space<vmem>>, vector<1x128xf32>
    %59 = vector.broadcast %58 : vector<1x128xf32> to vector<256x128xf32>
    %60 = arith.mulf %57, %59 : vector<256x128xf32>
    %61 = arith.addf %41, %60 : vector<256x128xf32>
    %c9 = arith.constant 9 : index
    %c0_27 = arith.constant 0 : index
    %62 = vector.load %arg2[%c9, %c0_27] : memref<24x128xf32, #tpu.memory_space<vmem>>, vector<1x128xf32>
    %63 = vector.broadcast %62 : vector<1x128xf32> to vector<256x128xf32>
    %64 = arith.mulf %0, %63 : vector<256x128xf32>
    %c10 = arith.constant 10 : index
    %c0_28 = arith.constant 0 : index
    %65 = vector.load %arg2[%c10, %c0_28] : memref<24x128xf32, #tpu.memory_space<vmem>>, vector<1x128xf32>
    %66 = vector.broadcast %65 : vector<1x128xf32> to vector<256x128xf32>
    %67 = arith.mulf %1, %66 : vector<256x128xf32>
    %68 = arith.addf %64, %67 : vector<256x128xf32>
    %c11 = arith.constant 11 : index
    %c0_29 = arith.constant 0 : index
    %69 = vector.load %arg2[%c11, %c0_29] : memref<24x128xf32, #tpu.memory_space<vmem>>, vector<1x128xf32>
    %70 = vector.broadcast %69 : vector<1x128xf32> to vector<256x128xf32>
    %71 = arith.mulf %2, %70 : vector<256x128xf32>
    %72 = arith.addf %68, %71 : vector<256x128xf32>
    %c3_30 = arith.constant 3 : index
    %c0_31 = arith.constant 0 : index
    %73 = vector.load %arg3[%c3_30, %c0_31] : memref<8x128xf32, #tpu.memory_space<vmem>>, vector<1x128xf32>
    %74 = vector.broadcast %73 : vector<1x128xf32> to vector<256x128xf32>
    %75 = arith.addf %72, %74 : vector<256x128xf32>
    %cst_32 = arith.constant 0.000000e+00 : f32
    %76 = vector.broadcast %cst_32 : f32 to vector<256x128xf32>
    %77 = arith.maximumf %75, %76 : vector<256x128xf32>
    %c3_33 = arith.constant 3 : index
    %c0_34 = arith.constant 0 : index
    %78 = vector.load %arg4[%c3_33, %c0_34] : memref<8x128xf32, #tpu.memory_space<vmem>>, vector<1x128xf32>
    %79 = vector.broadcast %78 : vector<1x128xf32> to vector<256x128xf32>
    %80 = arith.mulf %77, %79 : vector<256x128xf32>
    %81 = arith.addf %61, %80 : vector<256x128xf32>
    %c12 = arith.constant 12 : index
    %c0_35 = arith.constant 0 : index
    %82 = vector.load %arg2[%c12, %c0_35] : memref<24x128xf32, #tpu.memory_space<vmem>>, vector<1x128xf32>
    %83 = vector.broadcast %82 : vector<1x128xf32> to vector<256x128xf32>
    %84 = arith.mulf %0, %83 : vector<256x128xf32>
    %c13 = arith.constant 13 : index
    %c0_36 = arith.constant 0 : index
    %85 = vector.load %arg2[%c13, %c0_36] : memref<24x128xf32, #tpu.memory_space<vmem>>, vector<1x128xf32>
    %86 = vector.broadcast %85 : vector<1x128xf32> to vector<256x128xf32>
    %87 = arith.mulf %1, %86 : vector<256x128xf32>
    %88 = arith.addf %84, %87 : vector<256x128xf32>
    %c14 = arith.constant 14 : index
    %c0_37 = arith.constant 0 : index
    %89 = vector.load %arg2[%c14, %c0_37] : memref<24x128xf32, #tpu.memory_space<vmem>>, vector<1x128xf32>
    %90 = vector.broadcast %89 : vector<1x128xf32> to vector<256x128xf32>
    %91 = arith.mulf %2, %90 : vector<256x128xf32>
    %92 = arith.addf %88, %91 : vector<256x128xf32>
    %c4_38 = arith.constant 4 : index
    %c0_39 = arith.constant 0 : index
    %93 = vector.load %arg3[%c4_38, %c0_39] : memref<8x128xf32, #tpu.memory_space<vmem>>, vector<1x128xf32>
    %94 = vector.broadcast %93 : vector<1x128xf32> to vector<256x128xf32>
    %95 = arith.addf %92, %94 : vector<256x128xf32>
    %cst_40 = arith.constant 0.000000e+00 : f32
    %96 = vector.broadcast %cst_40 : f32 to vector<256x128xf32>
    %97 = arith.maximumf %95, %96 : vector<256x128xf32>
    %c4_41 = arith.constant 4 : index
    %c0_42 = arith.constant 0 : index
    %98 = vector.load %arg4[%c4_41, %c0_42] : memref<8x128xf32, #tpu.memory_space<vmem>>, vector<1x128xf32>
    %99 = vector.broadcast %98 : vector<1x128xf32> to vector<256x128xf32>
    %100 = arith.mulf %97, %99 : vector<256x128xf32>
    %101 = arith.addf %81, %100 : vector<256x128xf32>
    %c15 = arith.constant 15 : index
    %c0_43 = arith.constant 0 : index
    %102 = vector.load %arg2[%c15, %c0_43] : memref<24x128xf32, #tpu.memory_space<vmem>>, vector<1x128xf32>
    %103 = vector.broadcast %102 : vector<1x128xf32> to vector<256x128xf32>
    %104 = arith.mulf %0, %103 : vector<256x128xf32>
    %c16 = arith.constant 16 : index
    %c0_44 = arith.constant 0 : index
    %105 = vector.load %arg2[%c16, %c0_44] : memref<24x128xf32, #tpu.memory_space<vmem>>, vector<1x128xf32>
    %106 = vector.broadcast %105 : vector<1x128xf32> to vector<256x128xf32>
    %107 = arith.mulf %1, %106 : vector<256x128xf32>
    %108 = arith.addf %104, %107 : vector<256x128xf32>
    %c17 = arith.constant 17 : index
    %c0_45 = arith.constant 0 : index
    %109 = vector.load %arg2[%c17, %c0_45] : memref<24x128xf32, #tpu.memory_space<vmem>>, vector<1x128xf32>
    %110 = vector.broadcast %109 : vector<1x128xf32> to vector<256x128xf32>
    %111 = arith.mulf %2, %110 : vector<256x128xf32>
    %112 = arith.addf %108, %111 : vector<256x128xf32>
    %c5_46 = arith.constant 5 : index
    %c0_47 = arith.constant 0 : index
    %113 = vector.load %arg3[%c5_46, %c0_47] : memref<8x128xf32, #tpu.memory_space<vmem>>, vector<1x128xf32>
    %114 = vector.broadcast %113 : vector<1x128xf32> to vector<256x128xf32>
    %115 = arith.addf %112, %114 : vector<256x128xf32>
    %cst_48 = arith.constant 0.000000e+00 : f32
    %116 = vector.broadcast %cst_48 : f32 to vector<256x128xf32>
    %117 = arith.maximumf %115, %116 : vector<256x128xf32>
    %c5_49 = arith.constant 5 : index
    %c0_50 = arith.constant 0 : index
    %118 = vector.load %arg4[%c5_49, %c0_50] : memref<8x128xf32, #tpu.memory_space<vmem>>, vector<1x128xf32>
    %119 = vector.broadcast %118 : vector<1x128xf32> to vector<256x128xf32>
    %120 = arith.mulf %117, %119 : vector<256x128xf32>
    %121 = arith.addf %101, %120 : vector<256x128xf32>
    %c18 = arith.constant 18 : index
    %c0_51 = arith.constant 0 : index
    %122 = vector.load %arg2[%c18, %c0_51] : memref<24x128xf32, #tpu.memory_space<vmem>>, vector<1x128xf32>
    %123 = vector.broadcast %122 : vector<1x128xf32> to vector<256x128xf32>
    %124 = arith.mulf %0, %123 : vector<256x128xf32>
    %c19 = arith.constant 19 : index
    %c0_52 = arith.constant 0 : index
    %125 = vector.load %arg2[%c19, %c0_52] : memref<24x128xf32, #tpu.memory_space<vmem>>, vector<1x128xf32>
    %126 = vector.broadcast %125 : vector<1x128xf32> to vector<256x128xf32>
    %127 = arith.mulf %1, %126 : vector<256x128xf32>
    %128 = arith.addf %124, %127 : vector<256x128xf32>
    %c20 = arith.constant 20 : index
    %c0_53 = arith.constant 0 : index
    %129 = vector.load %arg2[%c20, %c0_53] : memref<24x128xf32, #tpu.memory_space<vmem>>, vector<1x128xf32>
    %130 = vector.broadcast %129 : vector<1x128xf32> to vector<256x128xf32>
    %131 = arith.mulf %2, %130 : vector<256x128xf32>
    %132 = arith.addf %128, %131 : vector<256x128xf32>
    %c6_54 = arith.constant 6 : index
    %c0_55 = arith.constant 0 : index
    %133 = vector.load %arg3[%c6_54, %c0_55] : memref<8x128xf32, #tpu.memory_space<vmem>>, vector<1x128xf32>
    %134 = vector.broadcast %133 : vector<1x128xf32> to vector<256x128xf32>
    %135 = arith.addf %132, %134 : vector<256x128xf32>
    %cst_56 = arith.constant 0.000000e+00 : f32
    %136 = vector.broadcast %cst_56 : f32 to vector<256x128xf32>
    %137 = arith.maximumf %135, %136 : vector<256x128xf32>
    %c6_57 = arith.constant 6 : index
    %c0_58 = arith.constant 0 : index
    %138 = vector.load %arg4[%c6_57, %c0_58] : memref<8x128xf32, #tpu.memory_space<vmem>>, vector<1x128xf32>
    %139 = vector.broadcast %138 : vector<1x128xf32> to vector<256x128xf32>
    %140 = arith.mulf %137, %139 : vector<256x128xf32>
    %141 = arith.addf %121, %140 : vector<256x128xf32>
    %c21 = arith.constant 21 : index
    %c0_59 = arith.constant 0 : index
    %142 = vector.load %arg2[%c21, %c0_59] : memref<24x128xf32, #tpu.memory_space<vmem>>, vector<1x128xf32>
    %143 = vector.broadcast %142 : vector<1x128xf32> to vector<256x128xf32>
    %144 = arith.mulf %0, %143 : vector<256x128xf32>
    %c22 = arith.constant 22 : index
    %c0_60 = arith.constant 0 : index
    %145 = vector.load %arg2[%c22, %c0_60] : memref<24x128xf32, #tpu.memory_space<vmem>>, vector<1x128xf32>
    %146 = vector.broadcast %145 : vector<1x128xf32> to vector<256x128xf32>
    %147 = arith.mulf %1, %146 : vector<256x128xf32>
    %148 = arith.addf %144, %147 : vector<256x128xf32>
    %c23 = arith.constant 23 : index
    %c0_61 = arith.constant 0 : index
    %149 = vector.load %arg2[%c23, %c0_61] : memref<24x128xf32, #tpu.memory_space<vmem>>, vector<1x128xf32>
    %150 = vector.broadcast %149 : vector<1x128xf32> to vector<256x128xf32>
    %151 = arith.mulf %2, %150 : vector<256x128xf32>
    %152 = arith.addf %148, %151 : vector<256x128xf32>
    %c7_62 = arith.constant 7 : index
    %c0_63 = arith.constant 0 : index
    %153 = vector.load %arg3[%c7_62, %c0_63] : memref<8x128xf32, #tpu.memory_space<vmem>>, vector<1x128xf32>
    %154 = vector.broadcast %153 : vector<1x128xf32> to vector<256x128xf32>
    %155 = arith.addf %152, %154 : vector<256x128xf32>
    %cst_64 = arith.constant 0.000000e+00 : f32
    %156 = vector.broadcast %cst_64 : f32 to vector<256x128xf32>
    %157 = arith.maximumf %155, %156 : vector<256x128xf32>
    %c7_65 = arith.constant 7 : index
    %c0_66 = arith.constant 0 : index
    %158 = vector.load %arg4[%c7_65, %c0_66] : memref<8x128xf32, #tpu.memory_space<vmem>>, vector<1x128xf32>
    %159 = vector.broadcast %158 : vector<1x128xf32> to vector<256x128xf32>
    %160 = arith.mulf %157, %159 : vector<256x128xf32>
    %161 = arith.addf %141, %160 : vector<256x128xf32>
    %cst_67 = arith.constant dense<0.000000e+00> : vector<256xf32>
    %162 = vector.multi_reduction <add>, %161, %cst_67 [1] : vector<256x128xf32> to vector<256xf32>
    %c0_68 = arith.constant 0 : index
    %163 = memref.load %arg5[%c0_68] : memref<1xf32, #tpu.memory_space<smem>>
    %164 = vector.broadcast %163 : f32 to vector<256xf32>
    %165 = arith.addf %162, %164 : vector<256xf32>
    %c0_69 = arith.constant 0 : index
    %c0_70 = arith.constant 0 : index
    %c0_71 = arith.constant 0 : index
    %166 = vector.load %arg6[%c0_69, %c0_70, %c0_71] : memref<1x1x256xf32, #tpu.memory_space<vmem>>, vector<1x1x256xf32>
    %167 = vector.shape_cast %166 : vector<1x1x256xf32> to vector<256xf32>
    %168 = vector.shape_cast %165 : vector<256xf32> to vector<1x1x256xf32>
    tpu.vector_store %arg6[%c0_69, %c0_70, %c0_71], %168 {strides = array<i32>} : memref<1x1x256xf32, #tpu.memory_space<vmem>>, vector<1x1x256xf32>,
    return
  }
  func.func @transform_0(%arg0: i32) -> (i32, i32) {
    %c0_i32 = arith.constant 0 : i32
    %c0_i32_0 = arith.constant 0 : i32
    return %arg0, %c0_i32 : i32, i32
  }
  func.func @transform_1(%arg0: i32) -> (i32, i32) {
    %c0_i32 = arith.constant 0 : i32
    %c0_i32_0 = arith.constant 0 : i32
    %c0_i32_1 = arith.constant 0 : i32
    return %c0_i32, %c0_i32_0 : i32, i32
  }
  func.func @transform_2(%arg0: i32) -> (i32, i32) {
    %c0_i32 = arith.constant 0 : i32
    %c0_i32_0 = arith.constant 0 : i32
    %c0_i32_1 = arith.constant 0 : i32
    return %c0_i32, %c0_i32_0 : i32, i32
  }
  func.func @transform_3(%arg0: i32) -> (i32, i32) {
    %c0_i32 = arith.constant 0 : i32
    %c0_i32_0 = arith.constant 0 : i32
    %c0_i32_1 = arith.constant 0 : i32
    return %c0_i32, %c0_i32_0 : i32, i32
  }
  func.func @transform_4(%arg0: i32) -> i32 {
    %c0_i32 = arith.constant 0 : i32
    %c0_i32_0 = arith.constant 0 : i32
    return %c0_i32 : i32
  }
  func.func @transform_5(%arg0: i32) -> (i32, i32, i32) {
    %c0_i32 = arith.constant 0 : i32
    %c0_i32_0 = arith.constant 0 : i32
    %c0_i32_1 = arith.constant 0 : i32
    return %arg0, %c0_i32, %c0_i32_0 : i32, i32, i32
  }
}

</mosaic_0001>

<bundles_post_ra>
// kernel: tpu_custom_call.1
= control target key start
LH: loop header
LB: loop body
LE: loop exit
PB: predicated region body
PF: predicated region fallthrough
CT: control target
= control target key end

     0   :  { %s7325_s0 = inlined_call_operand.hbm [shape: f32[512,384], index: 0, kind: input, shape index: {}]   ;;  %s7326_s1 = inlined_call_operand.hbm [shape: f32[24,128], index: 1, kind: input, shape index: {}]   ;;  %s7327_s2 = inlined_call_operand.hbm [shape: f32[8,128], index: 2, kind: input, shape index: {}]   ;;  %s7328_s3 = inlined_call_operand.hbm [shape: f32[8,128], index: 3, kind: input, shape index: {}]   ;;  %s7329_s4 = inlined_call_operand.<no memory space> [shape: f32[1], index: 4, kind: input, shape index: {}]   ;;  %s7330_s5 = inlined_call_operand.hbm [shape: f32[2,1,256], index: 5, kind: output, shape index: {}]  }
   0x1   :  { %10 = sst [smem:[#allocation2]] %s7329_s4 }
   0x2   :  { %11 = vsyncpa [#allocation4], 0 }
   0x3   :  { %13 = vsyncpa [#allocation4 + $0x1], 0 }
   0x4   :  { %14 = vsyncpa [#allocation7], 0 }
   0x5   :  { %15 = vsyncpa [#allocation10], 0 }
   0x6   :  { %16 = vsyncpa [#allocation5], 0 }
   0x7   :  { %18 = vsyncpa [#allocation5 + $0x1], 0  ;;  %s4280_s20 = smov 0   ;;  %s4282_s21 = smov 0  }
   0x8   :  { %s4284_s22 = smov 0   ;;  %s4286_s23 = smov 0  }
   0x9 LB: > { %s4301_s4 = sadd.s32 4294967295, %s4237_s23   ;;  %s3737_s24 = sadd.s32 4294967294, %s4237_s23   ;;  %s4237_s23 = sphi %s4286_s23, %s7443_s23   ;;  %s4233_s22 = sphi %s4284_s22, %s7442_s22   ;;  %s4229_s21 = sphi %s4282_s21, %s7441_s21   ;;  %s4225_s20 = sphi %s4280_s20, %s7440_s20  }
   0xa   : > { %p44_p0 = scmp.ne.s32.totalorder %s4229_s21, %s4225_s20  ;;  %p45_p1 = scmp.eq.s32.totalorder %s4301_s4, 0 }
   0xb   : > { %p152_p2 = scmp.eq.s32.totalorder %s4301_s4, 1  ;;  %p158_p3 = scmp.eq.s32.totalorder %s3737_s24, 1 }
   0xc   : > { %p4310_p4 = por %p45_p1, %p44_p0  ;;  %p3738_p5 = scmp.ge.s32.totalorder %s4237_s23, 1 }
   0xd   : > { %p4315_p6 = por %p158_p3, %p44_p0  ;;  %p165_p7 = scmp.lt.s32.totalorder %s4237_s23, 3 }
   0xe   : > { %s176_s29 = sshll.u32 %s7326_s1, 4  ;;  %s4239_s6 = smov [#allocation6]   ;;  %s177_s29 = int_to_ptr.hbm [resolvable:$true] %s176_s29 }
   0xf   : > { %p4323_p8 = pnand %p3738_p5, %p165_p7  ;;  %s178_s7 = sshll.u32 %s4239_s6, 4  ;;  %s179_s7 = int_to_ptr.vmem [resolvable:$true] %s178_s7 }
  0x10   : > { %s191_s11 = sshll.u32 %s7327_s2, 4  ;;  %s4240_s12 = smov 128   ;;  %s192_s11 = int_to_ptr.hbm [resolvable:$true] %s191_s11 }
  0x11   : > { %p3774_p9 = pneg %p4323_p8  ;;  %s4241_s13 = smov 8  }
  0x12   : > { %s4242_s14 = smov [#allocation8]   ;;  %s203_s18 = sshll.u32 %s7328_s3, 4  ;;  %s204_s18 = int_to_ptr.hbm [resolvable:$true] %s203_s18 }
  0x13   : > { %p4331_p10 = pnand %p3774_p9, %p45_p1  ;;  %s193_s15 = sshll.u32 %s4242_s14, 4  ;;  %s194_s15 = int_to_ptr.vmem [resolvable:$true] %s193_s15 }
  0x14   : > { %s4243_s19 = smov [#allocation9]   ;;  %s4347_s27 = sadd.s32 1, %s4237_s23  }
  0x15   : > { %3777 = dma.hbm_to_vmem [thread:$0]  (!%p4331_p10), %s177_s29, 384, %s179_s7, [#allocation7], %s4240_s12, %s4240_s12, %s4241_s13  }
  0x16   : > { %3780 = dma.hbm_to_vmem [thread:$0]  (!%p4331_p10), %s192_s11, 128, %s194_s15, [#allocation7]  }
  0x17   : > { %s205_s24 = sshll.u32 %s4243_s19, 4  ;;  %s28_s28 = ssub.s32 %s4237_s23, %s4347_s27  ;;  %s206_s24 = int_to_ptr.vmem [resolvable:$true] %s205_s24 }
  0x18   : > { %3783 = dma.hbm_to_vmem [thread:$0]  (!%p4331_p10), %s204_s18, 128, %s206_s24, [#allocation10]  }
  0x19   : > { %s31_s29 = sadd.s32 1, %s4233_s22  ;;  %p29_p12 = scmp.eq.s32.totalorder %s28_s28, 0 }
  0x1a   : > { %p38_p13 = scmp.ne.s32.totalorder %s4233_s22, %s4229_s21  ;;  %p39_p0 = scmp.eq.s32.totalorder %s4237_s23, 0 }
  0x1b   : > { %p3795_p3 = scmp.lt.s32.totalorder %s4237_s23, 2  ;;  %s219_s9 = sand.u32 1, %s4233_s22  }
  0x1c   : > { %s4359_s6 = scalar_select %p29_p12, %s4233_s22, %s31_s29  }
  0x1d   : > { %p40_p5 = por %p39_p0, %p38_p13  ;;  %p4363_p7 = por %p152_p2, %p38_p13 }
  0x1e   : > { %s3756_s10 = smul.u32 768, %s4237_s23  ;;  %s220_s18 = scalar_lea.sflag [#allocation4], %s219_s9 }
  0x1f   : > { %s3755_s11 = smul.u32 768, %s219_s9  ;;  %p4372_p9 = pnand %p3795_p3, %p40_p5 }
  0x20   : > { %s229_s13 = scalar_lea.hbm %s7325_s0, %s3756_s10  ;;  %s4140_s10 = scalar_lea.hbm %s7325_s0, 1536 }
  0x21   : > { %s230_s15 = sshll.u32 %s229_s13, 4  ;;  %s223_s16 = scalar_lea.vmem [#allocation3], %s3755_s11  ;;  %s231_s15 = int_to_ptr.hbm [resolvable:$true] %s230_s15 }
  0x22   : > { %s232_s17 = sshll.u32 %s223_s16, 4  ;;  %s4133_s19 = sshra.s32 %s231_s15, 4  ;;  %s233_s17 = int_to_ptr.vmem [resolvable:$true] %s232_s17  ;;  %s4134_s19 = int_to_ptr.hbm [resolvable:$true] %s4133_s19 }
  0x23   : > { %s4135_s24 = scalar_lea.hbm %s4134_s19, 768  ;;  %p4137_p10 = pneg %p4372_p9 }
  0x24   : > { %p4136_p2 = scmp.ne.s32.totalorder %s4134_s19, %s4135_s24  ;;  %p4141_p0 = scmp.lt.s32.totalorder %s4134_s19, %s7325_s0 }
  0x25   : > { %p4142_p3 = scmp.lt.s32.totalorder %s4140_s10, %s4135_s24 }
  0x26   : > { %p4138_p12 = pnand %p4137_p10, %p4136_p2 }
  0x27   : > { %p4143_p5 = por %p4142_p3, %p4141_p0 }
  0x28   : > { %p4139_p13 = pneg %p4138_p12 }
  0x2a   : > { %p4144_p11 = pnand %p4143_p5, %p4139_p13 }
  0x2c   : > { %4147 = shalt.err (!%p4144_p11)
}
  0x2d   : > { %s4244_s9 = smov 384   ;;  %s4245_s11 = smov 24  }
  0x2e   : > { %3787 = dma.hbm_to_vmem [thread:$0]  (!%p4372_p9), %s231_s15, 12288, %s233_s17, %s220_s18, %s4244_s9, %s4244_s9, %s4245_s11  }
  0x2f   : > { %244 = sbr.rel (%p4323_p8) target bundleno = 1222 (0x4c6), region = 40 }
  0x34   : > { %s4389_s13 = sand.u32 1, %s4229_s21  }
  0x35   : > { %s3757_s16 = smul.u32 768, %s4389_s13  ;;  %s247_s19 = scalar_lea.sflag [#allocation4], %s4389_s13 }
  0x37   : > { %s4393_s24 = scalar_lea.vmem [#allocation3], %s3757_s16 }
  0x38   : > { %4208 = dma.done.wait (%p4310_p4), %s247_s19, 12288  }
  0x39   : > { %4210 = vsyncadd (%p4310_p4), %s247_s19, 4294955008 }
  0x3a   : > { %4212 = dma.done.wait (%p45_p1), [#allocation7], 512  }
  0x3b   : > { %4214 = vsyncadd (%p45_p1), [#allocation7], 4294966784 }
  0x3c   : > { %4216 = dma.done.wait (%p45_p1), [#allocation10], 128  }
  0x3d   : > { %4218 = vsyncadd (%p45_p1), [#allocation10], 4294967168  ;;  %v4408_v0 = vld [vmem:[%s4393_s24] sm:$0xff]  ;;  %v4411_v1 = vld [vmem:[%s4393_s24 + $0x8] sm:$0xff]  ;;  %s6955_s25 = sld [smem:[#allocation2]]  ;;  %vm3524_vm0 = vcmask 130112  }
  0x3e   : > { %v4414_v2 = vld [vmem:[%s4393_s24 + $0x10] sm:$0xff]  ;;  %v4416_v3 = vld [vmem:[#allocation6] ss:$0 sm:$0xff]  ;;  %v4418_v4 = vld [vmem:[#allocation6 + $0x1] ss:$0 sm:$0xff]  ;;  %vm3528_vm1 = vcmask 195712  }
  0x3f   : > { %v4420_v5 = vld [vmem:[#allocation6 + $0x2] ss:$0 sm:$0xff]  ;;  %v392_v6 = vmul.f32 %v4416_v3, %v4408_v0  ;;  %v426_v7 = vmul.f32 %v4418_v4, %v4411_v1  ;;  %v4428_v9 = vld [vmem:[#allocation6 + $0x3] ss:$0 sm:$0xff]  ;;  %v4430_v10 = vld [vmem:[#allocation6 + $0x4] ss:$0 sm:$0xff] }
  0x40   : > { %v492_v8 = vmul.f32 %v4420_v5, %v4414_v2  ;;  %v4432_v12 = vld [vmem:[#allocation8] ss:$0 sm:$0xff]  ;;  %v658_v13 = vmul.f32 %v4428_v9, %v4408_v0  ;;  %v4436_v14 = vld [vmem:[#allocation6 + $0x5] ss:$0 sm:$0xff]  ;;  %v692_v15 = vmul.f32 %v4430_v10, %v4411_v1  ;;  %v4440_v16 = vld [vmem:[#allocation8 + $0x1] ss:$0 sm:$0xff] }
  0x41   : > { %v458_v11 = vadd.f32 %v426_v7, %v392_v6  ;;  %7384 = vst [vmem:[#allocation16_spill] sm:$0xff] %v4440_v16  ;;  %v758_v18 = vmul.f32 %v4436_v14, %v4414_v2  ;;  %v4444_v19 = vld [vmem:[#allocation6 + $0x6] ss:$0 sm:$0xff]  ;;  %v4446_v20 = vld [vmem:[#allocation6 + $0x7] ss:$0 sm:$0xff]  ;;  %v4466_v34 = vld [vmem:[%s4393_s24 + $0x18] sm:$0xff] }
  0x42   : > { %v724_v21 = vadd.f32 %v692_v15, %v658_v13  ;;  %v4448_v22 = vld [vmem:[#allocation6 + $0x8] ss:$0 sm:$0xff]  ;;  %v4451_v24 = vld [vmem:[#allocation9] ss:$0 sm:$0xff]  ;;  %v956_v25 = vmul.f32 %v4444_v19, %v4408_v0  ;;  %v990_v26 = vmul.f32 %v4446_v20, %v4411_v1  ;;  %v4457_v27 = vld [vmem:[#allocation8 + $0x2] ss:$0 sm:$0xff]  ;;  %v393_v39 = vmul.f32 %v4416_v3, %v4466_v34 }
  0x43   : > { %v524_v17 = vadd.f32 %v492_v8, %v458_v11  ;;  %7385 = vst [vmem:[#allocation17_spill] sm:$0xff] %v4451_v24  ;;  %v1056_v29 = vmul.f32 %v4448_v22, %v4414_v2  ;;  %v4461_v30 = vld [vmem:[#allocation6 + $0x9] ss:$0 sm:$0xff]  ;;  %v4463_v33 = vld [vmem:[#allocation6 + $0xa] ss:$0 sm:$0xff]  ;;  %v659_v45 = vmul.f32 %v4428_v9, %v4466_v34  ;;  %v4491_v49 = vld [vmem:[%s4393_s24 + $0x20] sm:$0xff]  ;;  %v957_v50 = vmul.f32 %v4444_v19, %v4466_v34 }
  0x44   : > { %7386 = vst [vmem:[#allocation18_spill] sm:$0xff] %v4457_v27  ;;  %v790_v28 = vadd.f32 %v758_v18, %v724_v21  ;;  %v1022_v32 = vadd.f32 %v990_v26, %v956_v25  ;;  %v4469_v36 = vld [vmem:[#allocation9 + $0x1] ss:$0 sm:$0xff]  ;;  %v1254_v37 = vmul.f32 %v4461_v30, %v4408_v0  ;;  %v4473_v38 = vld [vmem:[#allocation6 + $0xb] ss:$0 sm:$0xff]  ;;  %v1288_v43 = vmul.f32 %v4463_v33, %v4411_v1  ;;  %s3750_s30 = sshll.u32 %s4389_s13, 1 }
  0x45   : > { %v558_v23 = vadd.f32 %v4432_v12, %v524_v17  ;;  %7387 = vst [vmem:[#allocation19_spill] sm:$0xff] %v4469_v36  ;;  %v4478_v42 = vld [vmem:[#allocation9 + $0x2] ss:$0 sm:$0xff]  ;;  %v4482_v44 = vld [vmem:[#allocation8 + $0x3] ss:$0 sm:$0xff]  ;;  %v1354_v47 = vmul.f32 %v4473_v38, %v4414_v2  ;;  %v1255_v51 = vmul.f32 %v4461_v30, %v4466_v34  ;;  %v427_v56 = vmul.f32 %v4418_v4, %v4491_v49  ;;  %v4522_v13 = vld [vmem:[%s4393_s24 + $0x28] sm:$0xff] }
  0x46   : > { %v824_v35 = vadd.f32 %v4440_v16, %v790_v28  ;;  %v1088_v41 = vadd.f32 %v1056_v29, %v1022_v32  ;;  %7388 = vst [vmem:[#allocation20_spill] sm:$0xff] %v4482_v44  ;;  %v4488_v48 = vld [vmem:[#allocation6 + $0xc] ss:$0 sm:$0xff]  ;;  %v1320_v53 = vadd.f32 %v1288_v43, %v1254_v37  ;;  %v4498_v54 = vld [vmem:[#allocation6 + $0xd] ss:$0 sm:$0xff]  ;;  %v693_v57 = vmul.f32 %v4430_v10, %v4491_v49  ;;  %s3752_s14 = sshll.u32 %s4301_s4, 1 }
  0x47   : > { %v590_v31 = vmax.f32 %v558_v23, 0.0  ;;  %7389 = vst [vmem:[#allocation21_spill] sm:$0xff] %v4488_v48  ;;  %v4500_v55 = vld [vmem:[#allocation6 + $0xe] ss:$0 sm:$0xff]  ;;  %v1552_v59 = vmul.f32 %v4488_v48, %v4408_v0  ;;  %v991_v60 = vmul.f32 %v4446_v20, %v4491_v49  ;;  %v1289_v61 = vmul.f32 %v4463_v33, %v4491_v49  ;;  %v4513_v6 = vld [vmem:[#allocation9 + $0x3] ss:$0 sm:$0xff]  ;;  %s3633_s4 = scalar_lea.hbm %s7330_s5, %s3752_s14 }
  0x48   : > { %v856_v46 = vmax.f32 %v824_v35, 0.0  ;;  %v1122_v52 = vadd.f32 %v4457_v27, %v1088_v41  ;;  %v1386_v63 = vadd.f32 %v1354_v47, %v1320_v53  ;;  %v1586_v7 = vmul.f32 %v4498_v54, %v4411_v1  ;;  %v4519_v11 = vld [vmem:[#allocation8 + $0x4] ss:$0 sm:$0xff]  ;;  %v4524_v17 = vld [vmem:[#allocation6 + $0xf] ss:$0 sm:$0xff]  ;;  %s292_s18 = scalar_lea.vmem [#allocation11], %s3750_s30 }
  0x49   : > { %v624_v40 = vmul.f32 %v4451_v24, %v590_v31  ;;  %v1652_v8 = vmul.f32 %v4500_v55, %v4414_v2  ;;  %v4526_v18 = vld [vmem:[#allocation6 + $0x10] ss:$0 sm:$0xff]  ;;  %v459_v21 = vadd.f32 %v427_v56, %v393_v39  ;;  %v493_v23 = vmul.f32 %v4420_v5, %v4522_v13  ;;  %v4532_v31 = vld [vmem:[#allocation6 + $0x11] ss:$0 sm:$0xff]  ;;  %v4540_v39 = vld [vmem:[#allocation8 + $0x5] ss:$0 sm:$0xff] }
  0x4a   : > { %v890_v58 = vmul.f32 %v4469_v36, %v856_v46  ;;  %v1154_v62 = vmax.f32 %v1122_v52, 0.0  ;;  %v725_v25 = vadd.f32 %v693_v57, %v659_v45  ;;  %v1420_v28 = vadd.f32 %v4482_v44, %v1386_v63  ;;  %v4544_v52 = vld [vmem:[#allocation6 + $0x12] ss:$0 sm:$0xff]  ;;  %v4546_v56 = vld [vmem:[#allocation6 + $0x13] ss:$0 sm:$0xff]  ;;  %s3635_s28 = sshll.u32 %s292_s18, 4  ;;  %s3636_s28 = int_to_ptr.vmem [resolvable:$true] %s3635_s28 }
  0x4b   : > { %v1618_v29 = vadd.f32 %v1586_v7, %v1552_v59  ;;  %v759_v32 = vmul.f32 %v4436_v14, %v4522_v13  ;;  %v1850_v35 = vmul.f32 %v4524_v17, %v4408_v0  ;;  %v1884_v37 = vmul.f32 %v4526_v18, %v4411_v1  ;;  %7390 = vst [vmem:[#allocation22_spill] sm:$0xff] %v4544_v52  ;;  %v4557_v7 = vld [vmem:[#allocation6 + $0x14] ss:$0 sm:$0xff]  ;;  %s3637_s29 = sshll.u32 %s3633_s4, 4  ;;  %s3623_s10 = scalar_lea.sflag [#allocation5], %s4389_s13  ;;  %s3638_s29 = int_to_ptr.hbm [resolvable:$true] %s3637_s29 }
  0x4c   : > { %v922_v15 = vadd.f32 %v890_v58, %v624_v40  ;;  %v1188_v26 = vmul.f32 %v4478_v42, %v1154_v62  ;;  %v525_v40 = vadd.f32 %v493_v23, %v459_v21  ;;  %v1023_v41 = vadd.f32 %v991_v60, %v957_v50  ;;  %7391 = vst [vmem:[#allocation23_spill] sm:$0xff] %v4546_v56  ;;  %v4553_v60 = vld [vmem:[#allocation9 + $0x4] ss:$0 sm:$0xff]  ;;  %v4559_v21 = vld [vmem:[#allocation9 + $0x5] ss:$0 sm:$0xff]  ;;  %s4177_s8 = sshra.s32 %s3638_s29, 4  ;;  %s4178_s8 = int_to_ptr.hbm [resolvable:$true] %s4177_s8 }
  0x4d   : > { %v1452_v45 = vmax.f32 %v1420_v28, 0.0  ;;  %v1684_v46 = vadd.f32 %v1652_v8, %v1618_v29  ;;  %v1950_v47 = vmul.f32 %v4532_v31, %v4414_v2  ;;  %v1916_v53 = vadd.f32 %v1884_v37, %v1850_v35  ;;  %v4568_v37 = vld [vmem:[#allocation6 + $0x15] ss:$0 sm:$0xff]  ;;  %s4179_s12 = scalar_lea.hbm %s4178_s8, 2  ;;  %s4183_s16 = scalar_lea.hbm %s7330_s5, 4 }
  0x4e   : > { %v1220_v43 = vadd.f32 %v1188_v26, %v922_v15  ;;  %v559_v57 = vadd.f32 %v4432_v12, %v525_v40  ;;  %v791_v58 = vadd.f32 %v759_v32, %v725_v25  ;;  %v1057_v59 = vmul.f32 %v4448_v22, %v4522_v13  ;;  %v4563_v25 = vld [vmem:[#allocation8 + $0x6] ss:$0 sm:$0xff]  ;;  %p4180_p1 = scmp.ne.s32.totalorder %s4178_s8, %s4179_s12  ;;  %p4184_p11 = scmp.lt.s32.totalorder %s4178_s8, %s7330_s5 }
  0x4f   : > { %v1486_v62 = vmul.f32 %v4513_v6, %v1452_v45  ;;  %v1718_v50 = vadd.f32 %v4519_v11, %v1684_v46  ;;  %v2148_v63 = vmul.f32 %v4544_v52, %v4408_v0  ;;  %v1321_v8 = vadd.f32 %v1289_v61, %v1255_v51  ;;  %v4571_v45 = vld [vmem:[#allocation6 + $0x16] ss:$0 sm:$0xff]  ;;  %v4573_v46 = vld [vmem:[#allocation6 + $0x17] ss:$0 sm:$0xff]  ;;  %p4185_p9 = scmp.lt.s32.totalorder %s4183_s16, %s4179_s12 }
  0x50   : > { %v1982_v15 = vadd.f32 %v1950_v47, %v1916_v53  ;;  %v2182_v23 = vmul.f32 %v4546_v56, %v4411_v1  ;;  %v825_v26 = vadd.f32 %v4440_v16, %v791_v58  ;;  %v1089_v28 = vadd.f32 %v1057_v59, %v1023_v41  ;;  %v4592_v16 = vld [vmem:[#allocation8 + $0x7] ss:$0 sm:$0xff]  ;;  %p4181_p4 = pnand %p4180_p1, %p4363_p7 }
  0x51   : > { %v1518_v29 = vadd.f32 %v1486_v62, %v1220_v43  ;;  %v1750_v32 = vmax.f32 %v1718_v50, 0.0  ;;  %v2248_v35 = vmul.f32 %v4557_v7, %v4414_v2  ;;  %v591_v40 = vmax.f32 %v559_v57, 0.0  ;;  %p4186_p2 = por %p4185_p9, %p4184_p11 }
  0x52   : > { %v2016_v51 = vadd.f32 %v4540_v39, %v1982_v15  ;;  %v2214_v61 = vadd.f32 %v2182_v23, %v2148_v63  ;;  %v1123_v47 = vadd.f32 %v4457_v27, %v1089_v28  ;;  %v1355_v41 = vmul.f32 %v4473_v38, %v4522_v13  ;;  %p4182_p8 = pneg %p4181_p4 }
  0x53   : > { %v1784_v43 = vmul.f32 %v4553_v60, %v1750_v32  ;;  %v2446_v53 = vmul.f32 %v4568_v37, %v4408_v0  ;;  %v625_v58 = vmul.f32 %v4451_v24, %v591_v40  ;;  %v1553_v57 = vmul.f32 %v4488_v48, %v4466_v34  ;;  %v4590_v40 = vld [vmem:[#allocation9 + $0x6] ss:$0 sm:$0xff] }
  0x54   : > { %v2048_v59 = vmax.f32 %v2016_v51, 0.0  ;;  %v2280_v62 = vadd.f32 %v2248_v35, %v2214_v61  ;;  %v2480_v50 = vmul.f32 %v4571_v45, %v4411_v1  ;;  %v2546_v63 = vmul.f32 %v4573_v46, %v4414_v2  ;;  %p4187_p10 = pnand %p4186_p2, %p4182_p8 }
  0x55   : > { %v1816_v15 = vadd.f32 %v1784_v43, %v1518_v29  ;;  %v857_v23 = vmax.f32 %v825_v26, 0.0  ;;  %v1155_v28 = vmax.f32 %v1123_v47, 0.0  ;;  %v1387_v32 = vadd.f32 %v1355_v41, %v1321_v8 }
  0x56   : > { %v2082_v27 = vmul.f32 %v4559_v21, %v2048_v59  ;;  %v2314_v0 = vadd.f32 %v4563_v25, %v2280_v62  ;;  %v2512_v24 = vadd.f32 %v2480_v50, %v2446_v53  ;;  %v1587_v35 = vmul.f32 %v4498_v54, %v4491_v49 }
  0x57   : > { %v891_v1 = vmul.f32 %v4469_v36, %v857_v23  ;;  %v1189_v2 = vmul.f32 %v4478_v42, %v1155_v28  ;;  %v1421_v26 = vadd.f32 %v4482_v44, %v1387_v32  ;;  %v1653_v8 = vmul.f32 %v4500_v55, %v4522_v13  ;;  %v4607_v23 = vld [vmem:[#allocation9 + $0x7] ss:$0 sm:$0xff] }
  0x58   : > { %v2114_v29 = vadd.f32 %v2082_v27, %v1816_v15  ;;  %v2346_v51 = vmax.f32 %v2314_v0, 0.0  ;;  %v2578_v61 = vadd.f32 %v2546_v63, %v2512_v24  ;;  %v1619_v47 = vadd.f32 %v1587_v35, %v1553_v57 }
  0x59   : > { %v923_v41 = vadd.f32 %v891_v1, %v625_v58  ;;  %v1453_v43 = vmax.f32 %v1421_v26, 0.0  ;;  %v1851_v53 = vmul.f32 %v4524_v17, %v4466_v34  ;;  %v1885_v59 = vmul.f32 %v4526_v18, %v4491_v49  ;;  %v4618_v1 = vld [vmem:[%s4393_s24 + $0x30] sm:$0xff]  ;;  %v4621_v26 = vld [vmem:[%s4393_s24 + $0x38] sm:$0xff] }
  0x5a   : > { %v2380_v62 = vmul.f32 %v4590_v40, %v2346_v51  ;;  %v2612_v50 = vadd.f32 %v4592_v16, %v2578_v61  ;;  %v1685_v27 = vadd.f32 %v1653_v8, %v1619_v47  ;;  %v1951_v24 = vmul.f32 %v4532_v31, %v4522_v13 }
  0x5b   : > { %v1221_v58 = vadd.f32 %v1189_v2, %v923_v41  ;;  %v1487_v57 = vmul.f32 %v4513_v6, %v1453_v43  ;;  %v1917_v63 = vadd.f32 %v1885_v59, %v1851_v53  ;;  %v2149_v15 = vmul.f32 %v4544_v52, %v4466_v34  ;;  %v4631_v53 = vld [vmem:[%s4393_s24 + $0x40] sm:$0xff] }
  0x5c   : > { %v2412_v28 = vadd.f32 %v2380_v62, %v2114_v29  ;;  %v2644_v32 = vmax.f32 %v2612_v50, 0.0  ;;  %v1719_v0 = vadd.f32 %v4519_v11, %v1685_v27  ;;  %v2183_v35 = vmul.f32 %v4546_v56, %v4491_v49 }
  0x5d   : > { %v1519_v8 = vadd.f32 %v1487_v57, %v1221_v58  ;;  %v1983_v2 = vadd.f32 %v1951_v24, %v1917_v63  ;;  %v2249_v51 = vmul.f32 %v4557_v7, %v4522_v13  ;;  %v2447_v61 = vmul.f32 %v4568_v37, %v4466_v34 }
  0x5e   : > { %v2678_v29 = vmul.f32 %v4607_v23, %v2644_v32  ;;  %v1751_v47 = vmax.f32 %v1719_v0, 0.0  ;;  %v2215_v41 = vadd.f32 %v2183_v35, %v2149_v15  ;;  %v2481_v43 = vmul.f32 %v4571_v45, %v4491_v49 }
  0x5f   : > { %v2017_v59 = vadd.f32 %v4540_v39, %v1983_v2  ;;  %v2547_v62 = vmul.f32 %v4573_v46, %v4522_v13  ;;  %v394_v50 = vmul.f32 %v4416_v3, %v4618_v1  ;;  %v428_v34 = vmul.f32 %v4418_v4, %v4621_v26 }
  0x60   : > { %v2710_v27 = vadd.f32 %v2678_v29, %v2412_v28  ;;  %v1785_v24 = vmul.f32 %v4553_v60, %v1751_v47  ;;  %v2281_v58 = vadd.f32 %v2249_v51, %v2215_v41  ;;  %v2513_v57 = vadd.f32 %v2481_v43, %v2447_v61 }
  0x61   : > { %v2049_v63 = vmax.f32 %v2017_v59, 0.0  ;;  %v460_v49 = vadd.f32 %v428_v34, %v394_v50  ;;  %v494_v15 = vmul.f32 %v4420_v5, %v4631_v53  ;;  %v660_v32 = vmul.f32 %v4428_v9, %v4618_v1 }
  0x62   : > { %2742 = vadd.xlane.f32.xlu0 %v2710_v27  ;;  %v1817_v13 = vadd.f32 %v1785_v24, %v1519_v8  ;;  %v2315_v0 = vadd.f32 %v4563_v25, %v2281_v58  ;;  %v2579_v35 = vadd.f32 %v2547_v62, %v2513_v57  ;;  %v694_v28 = vmul.f32 %v4430_v10, %v4621_v26 }
  0x63   : > { %v2083_v2 = vmul.f32 %v4559_v21, %v2049_v63  ;;  %v526_v51 = vadd.f32 %v494_v15, %v460_v49  ;;  %v760_v61 = vmul.f32 %v4436_v14, %v4631_v53  ;;  %v958_v29 = vmul.f32 %v4444_v19, %v4618_v1 }
  0x64   : > { %v2347_v47 = vmax.f32 %v2315_v0, 0.0  ;;  %v2613_v41 = vadd.f32 %v4592_v16, %v2579_v35  ;;  %v726_v43 = vadd.f32 %v694_v28, %v660_v32  ;;  %v992_v8 = vmul.f32 %v4446_v20, %v4621_v26  ;;  %v7392_v35 = vld [vmem:[#allocation16_spill] sm:$0xff] }
  0x65   : > { %v2115_v59 = vadd.f32 %v2083_v2, %v1817_v13  ;;  %v560_v62 = vadd.f32 %v4432_v12, %v526_v51  ;;  %v1058_v50 = vmul.f32 %v4448_v22, %v4631_v53  ;;  %v1256_v34 = vmul.f32 %v4461_v30, %v4618_v1  ;;  %v7393_v51 = vld [vmem:[#allocation17_spill] sm:$0xff] }
  0x66   : > { %v2381_v27 = vmul.f32 %v4590_v40, %v2347_v47  ;;  %v2645_v24 = vmax.f32 %v2613_v41, 0.0  ;;  %v792_v58 = vadd.f32 %v760_v61, %v726_v43  ;;  %v1024_v57 = vadd.f32 %v992_v8, %v958_v29 }
  0x67   : > { %v592_v63 = vmax.f32 %v560_v62, 0.0  ;;  %v1290_v49 = vmul.f32 %v4463_v33, %v4621_v26  ;;  %v1356_v15 = vmul.f32 %v4473_v38, %v4631_v53  ;;  %v1554_v32 = vmul.f32 %v4488_v48, %v4618_v1  ;;  %v7394_v62 = vld [vmem:[#allocation18_spill] sm:$0xff] }
  0x68   : > { %v2413_v13 = vadd.f32 %v2381_v27, %v2115_v59  ;;  %v2679_v0 = vmul.f32 %v4607_v23, %v2645_v24  ;;  %v826_v28 = vadd.f32 %v7392_v35, %v792_v58  ;;  %v1090_v2 = vadd.f32 %v1058_v50, %v1024_v57 }
  0x69   : > { %v626_v47 = vmul.f32 %v7393_v51, %v592_v63  ;;  %v1322_v61 = vadd.f32 %v1290_v49, %v1256_v34  ;;  %v1588_v29 = vmul.f32 %v4498_v54, %v4621_v26  ;;  %v1654_v41 = vmul.f32 %v4500_v55, %v4631_v53 }
  0x6a   : > { %v2711_v43 = vadd.f32 %v2679_v0, %v2413_v13  ;;  %v858_v8 = vmax.f32 %v826_v28, 0.0  ;;  %v1124_v48 = vadd.f32 %v7394_v62, %v1090_v2  ;;  %v1852_v59 = vmul.f32 %v4524_v17, %v4618_v1  ;;  %v4691_v28 = vld [vmem:[%s4393_s24 + $0x60] sm:$0xff] }
  0x6b   : > { %v1388_v27 = vadd.f32 %v1356_v15, %v1322_v61  ;;  %v1620_v24 = vadd.f32 %v1588_v29, %v1554_v32  ;;  %v1886_v50 = vmul.f32 %v4526_v18, %v4621_v26  ;;  %v1952_v34 = vmul.f32 %v4532_v31, %v4631_v53 }
  0x6c   : > { %2744 = vadd.xlane.f32.xlu0 %v2711_v43  ;;  %v892_v58 = vmul.f32 %v4469_v36, %v858_v8  ;;  %v1156_v57 = vmax.f32 %v1124_v48, 0.0  ;;  %v2150_v63 = vmul.f32 %v4544_v52, %v4618_v1  ;;  %v2184_v49 = vmul.f32 %v4546_v56, %v4621_v26 }
  0x6d   : > { %v1422_v15 = vadd.f32 %v4482_v44, %v1388_v27  ;;  %v1686_v32 = vadd.f32 %v1654_v41, %v1620_v24  ;;  %v1918_v13 = vadd.f32 %v1886_v50, %v1852_v59  ;;  %v2250_v0 = vmul.f32 %v4557_v7, %v4631_v53  ;;  %v4700_v59 = vld [vmem:[%s4393_s24 + $0x68] sm:$0xff]  ;;  %v4703_v27 = vld [vmem:[%s4393_s24 + $0x70] sm:$0xff] }
  0x6e   : > { %v924_v2 = vadd.f32 %v892_v58, %v626_v47  ;;  %v1190_v48 = vmul.f32 %v4478_v42, %v1156_v57  ;;  %v2216_v61 = vadd.f32 %v2184_v49, %v2150_v63  ;;  %v2448_v29 = vmul.f32 %v4568_v37, %v4618_v1 }
  0x6f   : > { %v1454_v43 = vmax.f32 %v1422_v15, 0.0  ;;  %v1720_v8 = vadd.f32 %v4519_v11, %v1686_v32  ;;  %v1984_v56 = vadd.f32 %v1952_v34, %v1918_v13  ;;  %v2482_v41 = vmul.f32 %v4571_v45, %v4621_v26 }
  0x70   : > { %v1222_v24 = vadd.f32 %v1190_v48, %v924_v2  ;;  %v2282_v50 = vadd.f32 %v2250_v0, %v2216_v61  ;;  %v2548_v47 = vmul.f32 %v4573_v46, %v4631_v53  ;;  %v396_v58 = vmul.f32 %v4416_v3, %v4691_v28 }
  0x71   : > { %v1488_v1 = vmul.f32 %v4513_v6, %v1454_v43  ;;  %v1752_v57 = vmax.f32 %v1720_v8, 0.0  ;;  %v2018_v34 = vadd.f32 %v4540_v39, %v1984_v56  ;;  %v2514_v63 = vadd.f32 %v2482_v41, %v2448_v29 }
  0x72   : > { %v2316_v26 = vadd.f32 %v4563_v25, %v2282_v50  ;;  %v430_v49 = vmul.f32 %v4418_v4, %v4700_v59  ;;  %v496_v15 = vmul.f32 %v4420_v5, %v4703_v27  ;;  %v662_v53 = vmul.f32 %v4428_v9, %v4691_v28 }
  0x73   : > { %v1520_v32 = vadd.f32 %v1488_v1, %v1222_v24  ;;  %v1786_v13 = vmul.f32 %v4553_v60, %v1752_v57  ;;  %v2050_v0 = vmax.f32 %v2018_v34, 0.0  ;;  %v2580_v2 = vadd.f32 %v2548_v47, %v2514_v63 }
  0x74   : > { %v2348_v48 = vmax.f32 %v2316_v26, 0.0  ;;  %v462_v61 = vadd.f32 %v430_v49, %v396_v58  ;;  %v696_v56 = vmul.f32 %v4430_v10, %v4700_v59  ;;  %v762_v29 = vmul.f32 %v4436_v14, %v4703_v27 }
  0x75   : > { %v1818_v43 = vadd.f32 %v1786_v13, %v1520_v32  ;;  %v2084_v8 = vmul.f32 %v4559_v21, %v2050_v0  ;;  %v2614_v41 = vadd.f32 %v4592_v16, %v2580_v2  ;;  %v960_v24 = vmul.f32 %v4444_v19, %v4691_v28 }
  0x76   : > { %v2382_v50 = vmul.f32 %v4590_v40, %v2348_v48  ;;  %v528_v1 = vadd.f32 %v496_v15, %v462_v61  ;;  %v728_v47 = vadd.f32 %v696_v56, %v662_v53  ;;  %v994_v58 = vmul.f32 %v4446_v20, %v4700_v59  ;;  %v7395_v48 = vld [vmem:[#allocation21_spill] sm:$0xff] }
  0x77   : > { %v2116_v57 = vadd.f32 %v2084_v8, %v1818_v43  ;;  %v2646_v34 = vmax.f32 %v2614_v41, 0.0  ;;  %v1060_v63 = vmul.f32 %v4448_v22, %v4703_v27  ;;  %v1258_v26 = vmul.f32 %v4461_v30, %v4691_v28 }
  0x78   : > { %v562_v49 = vadd.f32 %v4432_v12, %v528_v1  ;;  %v794_v32 = vadd.f32 %v762_v29, %v728_v47  ;;  %v1026_v13 = vadd.f32 %v994_v58, %v960_v24  ;;  %v1292_v0 = vmul.f32 %v4463_v33, %v4700_v59 }
  0x79   : > { %v2414_v15 = vadd.f32 %v2382_v50, %v2116_v57  ;;  %v2680_v53 = vmul.f32 %v4607_v23, %v2646_v34  ;;  %v1358_v2 = vmul.f32 %v4473_v38, %v4703_v27  ;;  %v1556_v61 = vmul.f32 %v7395_v48, %v4691_v28 }
  0x7a   : > { %v594_v56 = vmax.f32 %v562_v49, 0.0  ;;  %v828_v43 = vadd.f32 %v7392_v35, %v794_v32  ;;  %v1092_v8 = vadd.f32 %v1060_v63, %v1026_v13  ;;  %v1324_v41 = vadd.f32 %v1292_v0, %v1258_v26 }
  0x7b   : > { %v2712_v1 = vadd.f32 %v2680_v53, %v2414_v15  ;;  %v1590_v29 = vmul.f32 %v4498_v54, %v4700_v59  ;;  %v1656_v24 = vmul.f32 %v4500_v55, %v4703_v27  ;;  %v1854_v50 = vmul.f32 %v4524_v17, %v4691_v28  ;;  %v7396_v53 = vld [vmem:[#allocation23_spill] sm:$0xff] }
  0x7c   : > { %v628_v47 = vmul.f32 %v7393_v51, %v594_v56  ;;  %v860_v58 = vmax.f32 %v828_v43, 0.0  ;;  %v1126_v57 = vadd.f32 %v7394_v62, %v1092_v8  ;;  %v1390_v34 = vadd.f32 %v1358_v2, %v1324_v41  ;;  %v4766_v41 = vld [vmem:[%s4393_s24 + $0x48] sm:$0xff] }
  0x7d   : > { %2746 = vadd.xlane.f32.xlu1 %v2712_v1  ;;  %v1622_v63 = vadd.f32 %v1590_v29, %v1556_v61  ;;  %v1888_v26 = vmul.f32 %v4526_v18, %v4700_v59  ;;  %v1954_v49 = vmul.f32 %v4532_v31, %v4703_v27  ;;  %v2152_v32 = vmul.f32 %v4544_v52, %v4691_v28 }
  0x7e   : > { %v894_v13 = vmul.f32 %v4469_v36, %v860_v58  ;;  %v1158_v0 = vmax.f32 %v1126_v57, 0.0  ;;  %v1424_v15 = vadd.f32 %v4482_v44, %v1390_v34  ;;  %v2186_v2 = vmul.f32 %v7396_v53, %v4700_v59  ;;  %v4770_v34 = vld [vmem:[%s4393_s24 + $0x50] sm:$0xff] }
  0x7f   : > { %v1688_v61 = vadd.f32 %v1656_v24, %v1622_v63  ;;  %v1920_v56 = vadd.f32 %v1888_v26, %v1854_v50  ;;  %v2252_v43 = vmul.f32 %v4557_v7, %v4703_v27  ;;  %v2450_v8 = vmul.f32 %v4568_v37, %v4691_v28  ;;  %v4778_v63 = vld [vmem:[%s4393_s24 + $0x58] sm:$0xff] }
  0x80   : > { %v926_v1 = vadd.f32 %v894_v13, %v628_v47  ;;  %v1192_v29 = vmul.f32 %v4478_v42, %v1158_v0  ;;  %v1456_v58 = vmax.f32 %v1424_v15, 0.0  ;;  %v2218_v57 = vadd.f32 %v2186_v2, %v2152_v32 }
  0x81   : > { %v1722_v44 = vadd.f32 %v4519_v11, %v1688_v61  ;;  %v1986_v36 = vadd.f32 %v1954_v49, %v1920_v56  ;;  %v2484_v24 = vmul.f32 %v4571_v45, %v4700_v59  ;;  %v2550_v50 = vmul.f32 %v4573_v46, %v4703_v27 }
  0x82   : > { %v1224_v28 = vadd.f32 %v1192_v29, %v926_v1  ;;  %v1490_v47 = vmul.f32 %v4513_v6, %v1456_v58  ;;  %v2284_v26 = vadd.f32 %v2252_v43, %v2218_v57  ;;  %v395_v32 = vmul.f32 %v4416_v3, %v4766_v41 }
  0x83   : > { %v1754_v13 = vmax.f32 %v1722_v44, 0.0  ;;  %v2020_v0 = vadd.f32 %v4540_v39, %v1986_v36  ;;  %v2516_v15 = vadd.f32 %v2484_v24, %v2450_v8  ;;  %v429_v49 = vmul.f32 %v4418_v4, %v4770_v34 }
  0x84   : > { %v1522_v59 = vadd.f32 %v1490_v47, %v1224_v28  ;;  %v2318_v2 = vadd.f32 %v4563_v25, %v2284_v26  ;;  %v495_v27 = vmul.f32 %v4420_v5, %v4778_v63  ;;  %v661_v61 = vmul.f32 %v4428_v9, %v4766_v41 }
  0x85   : > { %v1788_v56 = vmul.f32 %v4553_v60, %v1754_v13  ;;  %v2052_v43 = vmax.f32 %v2020_v0, 0.0  ;;  %v2582_v1 = vadd.f32 %v2550_v50, %v2516_v15  ;;  %v461_v44 = vadd.f32 %v429_v49, %v395_v32 }
  0x86   : > { %v2350_v29 = vmax.f32 %v2318_v2, 0.0  ;;  %v695_v36 = vmul.f32 %v4430_v10, %v4770_v34  ;;  %v761_v8 = vmul.f32 %v4436_v14, %v4778_v63  ;;  %v959_v58 = vmul.f32 %v4444_v19, %v4766_v41 }
  0x87   : > { %v1820_v57 = vadd.f32 %v1788_v56, %v1522_v59  ;;  %v2086_v24 = vmul.f32 %v4559_v21, %v2052_v43  ;;  %v2616_v28 = vadd.f32 %v4592_v16, %v2582_v1  ;;  %v527_v47 = vadd.f32 %v495_v27, %v461_v44 }
  0x88   : > { %v2384_v26 = vmul.f32 %v4590_v40, %v2350_v29  ;;  %v727_v50 = vadd.f32 %v695_v36, %v661_v61  ;;  %v993_v32 = vmul.f32 %v4446_v20, %v4770_v34  ;;  %v1059_v13 = vmul.f32 %v4448_v22, %v4778_v63 }
  0x89   : > { %v2118_v0 = vadd.f32 %v2086_v24, %v1820_v57  ;;  %v2648_v15 = vmax.f32 %v2616_v28, 0.0  ;;  %v561_v49 = vadd.f32 %v4432_v12, %v527_v47  ;;  %v1257_v59 = vmul.f32 %v4461_v30, %v4766_v41 }
  0x8a   : > { %v793_v2 = vadd.f32 %v761_v8, %v727_v50  ;;  %v1025_v56 = vadd.f32 %v993_v32, %v959_v58  ;;  %v1291_v27 = vmul.f32 %v4463_v33, %v4770_v34  ;;  %v1357_v61 = vmul.f32 %v4473_v38, %v4778_v63 }
  0x8b   : > { %v2416_v43 = vadd.f32 %v2384_v26, %v2118_v0  ;;  %v2682_v1 = vmul.f32 %v4607_v23, %v2648_v15  ;;  %v593_v44 = vmax.f32 %v561_v49, 0.0  ;;  %v1555_v29 = vmul.f32 %v7395_v48, %v4766_v41 }
  0x8c   : > { %v827_v36 = vadd.f32 %v7392_v35, %v793_v2  ;;  %v1091_v57 = vadd.f32 %v1059_v13, %v1025_v56  ;;  %v1323_v24 = vadd.f32 %v1291_v27, %v1257_v59  ;;  %v1589_v8 = vmul.f32 %v4498_v54, %v4770_v34  ;;  %v7397_v56 = vld [vmem:[#allocation19_spill] sm:$0xff] }
  0x8d   : > { %v2714_v58 = vadd.f32 %v2682_v1, %v2416_v43  ;;  %v627_v28 = vmul.f32 %v7393_v51, %v593_v44  ;;  %v1655_v47 = vmul.f32 %v4500_v55, %v4778_v63  ;;  %v1853_v26 = vmul.f32 %v4524_v17, %v4766_v41  ;;  %v7398_v1 = vld [vmem:[#allocation20_spill] sm:$0xff] }
  0x8e   : > { %v859_v50 = vmax.f32 %v827_v36, 0.0  ;;  %v1125_v32 = vadd.f32 %v7394_v62, %v1091_v57  ;;  %v1389_v0 = vadd.f32 %v1357_v61, %v1323_v24  ;;  %v1621_v15 = vadd.f32 %v1589_v8, %v1555_v29  ;;  %v4839_v8 = vld [vmem:[%s4393_s24 + $0x78] sm:$0xff] }
  0x8f   : > { %2750 = vadd.xlane.f32.xlu2 %v2714_v58  ;;  %v1887_v13 = vmul.f32 %v4526_v18, %v4770_v34  ;;  %v1953_v49 = vmul.f32 %v4532_v31, %v4778_v63  ;;  %v2151_v59 = vmul.f32 %v4544_v52, %v4766_v41  ;;  %v2185_v2 = vmul.f32 %v7396_v53, %v4770_v34 }
  0x90   : > { %v893_v27 = vmul.f32 %v7397_v56, %v859_v50  ;;  %v1157_v43 = vmax.f32 %v1125_v32, 0.0  ;;  %v1423_v61 = vadd.f32 %v7398_v1, %v1389_v0  ;;  %v1687_v44 = vadd.f32 %v1655_v47, %v1621_v15  ;;  %v4844_v32 = vld [vmem:[%s4393_s24 + $0x80] sm:$0xff] }
  0x91   : > { %v1919_v29 = vadd.f32 %v1887_v13, %v1853_v26  ;;  %v2217_v36 = vadd.f32 %v2185_v2, %v2151_v59  ;;  %v2251_v57 = vmul.f32 %v4557_v7, %v4778_v63  ;;  %v2449_v24 = vmul.f32 %v4568_v37, %v4766_v41  ;;  %v4851_v13 = vld [vmem:[%s4393_s24 + $0x88] sm:$0xff] }
  0x92   : > { %v925_v58 = vadd.f32 %v893_v27, %v627_v28  ;;  %v1191_v53 = vmul.f32 %v4478_v42, %v1157_v43  ;;  %v1455_v52 = vmax.f32 %v1423_v61, 0.0  ;;  %v1721_v50 = vadd.f32 %v4519_v11, %v1687_v44 }
  0x93   : > { %v1985_v0 = vadd.f32 %v1953_v49, %v1919_v29  ;;  %v2283_v47 = vadd.f32 %v2251_v57, %v2217_v36  ;;  %v2483_v26 = vmul.f32 %v4571_v45, %v4770_v34  ;;  %v2549_v15 = vmul.f32 %v4573_v46, %v4778_v63 }
  0x94   : > { %v1223_v41 = vadd.f32 %v1191_v53, %v925_v58  ;;  %v1489_v28 = vmul.f32 %v4513_v6, %v1455_v52  ;;  %v1753_v59 = vmax.f32 %v1721_v50, 0.0  ;;  %v397_v2 = vmul.f32 %v4416_v3, %v4839_v8 }
  0x95   : > { %v2019_v27 = vadd.f32 %v4540_v39, %v1985_v0  ;;  %v2317_v49 = vadd.f32 %v4563_v25, %v2283_v47  ;;  %v2515_v43 = vadd.f32 %v2483_v26, %v2449_v24  ;;  %v431_v34 = vmul.f32 %v4418_v4, %v4844_v32 }
  0x96   : > { %v1521_v61 = vadd.f32 %v1489_v28, %v1223_v41  ;;  %v1787_v63 = vmul.f32 %v4553_v60, %v1753_v59  ;;  %v497_v53 = vmul.f32 %v4420_v5, %v4851_v13  ;;  %v663_v52 = vmul.f32 %v4428_v9, %v4839_v8 }
  0x97   : > { %v2051_v44 = vmax.f32 %v2019_v27, 0.0  ;;  %v2349_v29 = vmax.f32 %v2317_v49, 0.0  ;;  %v2581_v3 = vadd.f32 %v2549_v15, %v2515_v43  ;;  %v463_v36 = vadd.f32 %v431_v34, %v397_v2 }
  0x98   : > { %v1819_v57 = vadd.f32 %v1787_v63, %v1521_v61  ;;  %v697_v24 = vmul.f32 %v4430_v10, %v4844_v32  ;;  %v763_v4 = vmul.f32 %v4436_v14, %v4851_v13  ;;  %v961_v58 = vmul.f32 %v4444_v19, %v4839_v8 }
  0x99   : > { %v2085_v50 = vmul.f32 %v4559_v21, %v2051_v44  ;;  %v2383_v5 = vmul.f32 %v4590_v40, %v2349_v29  ;;  %v2615_v0 = vadd.f32 %v4592_v16, %v2581_v3  ;;  %v529_v47 = vadd.f32 %v497_v53, %v463_v36 }
  0x9a   : > { %v729_v26 = vadd.f32 %v697_v24, %v663_v52  ;;  %v995_v15 = vmul.f32 %v4446_v20, %v4844_v32  ;;  %v1061_v41 = vmul.f32 %v4448_v22, %v4851_v13  ;;  %v1259_v28 = vmul.f32 %v4461_v30, %v4839_v8 }
  0x9b   : > { %v2117_v59 = vadd.f32 %v2085_v50, %v1819_v57  ;;  %v2647_v2 = vmax.f32 %v2615_v0, 0.0  ;;  %v563_v27 = vadd.f32 %v4432_v12, %v529_v47  ;;  %v1293_v49 = vmul.f32 %v4463_v33, %v4844_v32 }
  0x9c   : > { %v795_v43 = vadd.f32 %v763_v4, %v729_v26  ;;  %v1027_v34 = vadd.f32 %v995_v15, %v961_v58  ;;  %v1359_v61 = vmul.f32 %v4473_v38, %v4851_v13  ;;  %v1557_v63 = vmul.f32 %v7395_v48, %v4839_v8 }
  0x9d   : > { %v2415_v53 = vadd.f32 %v2383_v5, %v2117_v59  ;;  %v2681_v52 = vmul.f32 %v4607_v23, %v2647_v2  ;;  %v595_v44 = vmax.f32 %v563_v27, 0.0  ;;  %v1325_v29 = vadd.f32 %v1293_v49, %v1259_v28  ;;  %v7400_v28 = vld [vmem:[#allocation23_spill] sm:$0xff] }
  0x9e   : > { %v829_v3 = vadd.f32 %v7392_v35, %v795_v43  ;;  %v1093_v36 = vadd.f32 %v1061_v41, %v1027_v34  ;;  %v1591_v12 = vmul.f32 %v4498_v54, %v4844_v32  ;;  %v1657_v57 = vmul.f32 %v4500_v55, %v4851_v13 }
  0x9f   : > { %v2713_v24 = vadd.f32 %v2681_v52, %v2415_v53  ;;  %v629_v4 = vmul.f32 %v7393_v51, %v595_v44  ;;  %v1391_v58 = vadd.f32 %v1359_v61, %v1325_v29  ;;  %v1855_v50 = vmul.f32 %v4524_v17, %v4839_v8  ;;  %v7399_v51 = vld [vmem:[#allocation22_spill] sm:$0xff] }
  0xa0   : > { %v861_v5 = vmax.f32 %v829_v3, 0.0  ;;  %v1127_v0 = vadd.f32 %v7394_v62, %v1093_v36  ;;  %v1623_v47 = vadd.f32 %v1591_v12, %v1557_v63  ;;  %v1889_v35 = vmul.f32 %v4526_v18, %v4844_v32  ;;  %v4912_v53 = vld [vmem:[%s4393_s24 + $0xc0] sm:$0xff]  ;;  %v4920_v36 = vld [vmem:[%s4393_s24 + $0xd0] sm:$0xff] }
  0xa1   : > { %2748 = vadd.xlane.f32.xlu1 %v2713_v24  ;;  %v1425_v26 = vadd.f32 %v7398_v1, %v1391_v58  ;;  %v1955_v15 = vmul.f32 %v4532_v31, %v4851_v13  ;;  %v2153_v41 = vmul.f32 %v7399_v51, %v4839_v8  ;;  %v2187_v59 = vmul.f32 %v7400_v28, %v4844_v32 }
  0xa2   : > { %v895_v62 = vmul.f32 %v7397_v56, %v861_v5  ;;  %v1159_v2 = vmax.f32 %v1127_v0, 0.0  ;;  %v1689_v27 = vadd.f32 %v1657_v57, %v1623_v47  ;;  %v1921_v49 = vadd.f32 %v1889_v35, %v1855_v50  ;;  %v4917_v56 = vld [vmem:[%s4393_s24 + $0xc8] sm:$0xff]  ;;  %v4928_v50 = vld [vmem:[#allocation6] ss:$0 sm:$0xff]  ;;  %v4933_v35 = vld [vmem:[#allocation6 + $0x1] ss:$0 sm:$0xff] }
  0xa3   : > { %v1457_v43 = vmax.f32 %v1425_v26, 0.0  ;;  %v2219_v34 = vadd.f32 %v2187_v59, %v2153_v41  ;;  %v2253_v61 = vmul.f32 %v4557_v7, %v4851_v13  ;;  %v2451_v63 = vmul.f32 %v4568_v37, %v4839_v8  ;;  %v4937_v26 = vld [vmem:[#allocation6 + $0x2] ss:$0 sm:$0xff] }
  0xa4   : > { %v927_v52 = vadd.f32 %v895_v62, %v629_v4  ;;  %v1193_v44 = vmul.f32 %v4478_v42, %v1159_v2  ;;  %v1723_v29 = vadd.f32 %v4519_v11, %v1689_v27  ;;  %v1987_v3 = vadd.f32 %v1955_v15, %v1921_v49 }
  0xa5   : > { %v1491_v12 = vmul.f32 %v4513_v6, %v1457_v43  ;;  %v2285_v57 = vadd.f32 %v2253_v61, %v2219_v34  ;;  %v2485_v24 = vmul.f32 %v4571_v45, %v4844_v32  ;;  %v2551_v8 = vmul.f32 %v4573_v46, %v4851_v13 }
  0xa6   : > { %v1225_v58 = vadd.f32 %v1193_v44, %v927_v52  ;;  %v1755_v4 = vmax.f32 %v1723_v29, 0.0  ;;  %v2021_v42 = vadd.f32 %v4540_v39, %v1987_v3  ;;  %v400_v5 = vmul.f32 %v4928_v50, %v4912_v53 }
  0xa7   : > { %v2319_v0 = vadd.f32 %v4563_v25, %v2285_v57  ;;  %v2517_v47 = vadd.f32 %v2485_v24, %v2451_v63  ;;  %v434_v32 = vmul.f32 %v4933_v35, %v4917_v56  ;;  %v500_v13 = vmul.f32 %v4937_v26, %v4920_v36 }
  0xa8   : > { %v1523_v15 = vadd.f32 %v1491_v12, %v1225_v58  ;;  %v1789_v41 = vmul.f32 %v4553_v60, %v1755_v4  ;;  %v2053_v59 = vmax.f32 %v2021_v42, 0.0  ;;  %v666_v62 = vmul.f32 %v4428_v9, %v4912_v53 }
  0xa9   : > { %v2351_v2 = vmax.f32 %v2319_v0, 0.0  ;;  %v2583_v27 = vadd.f32 %v2551_v8, %v2517_v47  ;;  %v466_v49 = vadd.f32 %v434_v32, %v400_v5  ;;  %v700_v43 = vmul.f32 %v4430_v10, %v4917_v56  ;;  %v4959_v8 = vld [vmem:[#allocation8] ss:$0 sm:$0xff]  ;;  %v4969_v47 = vld [vmem:[#allocation8 + $0x1] ss:$0 sm:$0xff] }
  0xaa   : > { %v1821_v34 = vadd.f32 %v1789_v41, %v1523_v15  ;;  %v2087_v61 = vmul.f32 %v4559_v21, %v2053_v59  ;;  %v766_v63 = vmul.f32 %v4436_v14, %v4920_v36  ;;  %v964_v52 = vmul.f32 %v4444_v19, %v4912_v53 }
  0xab   : > { %v2385_v44 = vmul.f32 %v4590_v40, %v2351_v2  ;;  %v2617_v29 = vadd.f32 %v4592_v16, %v2583_v27  ;;  %v532_v9 = vadd.f32 %v500_v13, %v466_v49  ;;  %v732_v3 = vadd.f32 %v700_v43, %v666_v62  ;;  %v4981_v49 = vld [vmem:[#allocation8 + $0x2] ss:$0 sm:$0xff] }
  0xac   : > { %v2119_v12 = vadd.f32 %v2087_v61, %v1821_v34  ;;  %v998_v57 = vmul.f32 %v4446_v20, %v4917_v56  ;;  %v1064_v10 = vmul.f32 %v4448_v22, %v4920_v36  ;;  %v1262_v24 = vmul.f32 %v4461_v30, %v4912_v53 }
  0xad   : > { %v2649_v14 = vmax.f32 %v2617_v29, 0.0  ;;  %v566_v19 = vadd.f32 %v4959_v8, %v532_v9  ;;  %v798_v58 = vadd.f32 %v766_v63, %v732_v3  ;;  %v1296_v4 = vmul.f32 %v4463_v33, %v4917_v56  ;;  %v4999_v3 = vld [vmem:[%s4393_s24 + $0x108] sm:$0xff] }
  0xae   : > { %v2417_v42 = vadd.f32 %v2385_v44, %v2119_v12  ;;  %v1030_v5 = vadd.f32 %v998_v57, %v964_v52  ;;  %v1362_v20 = vmul.f32 %v4473_v38, %v4920_v36  ;;  %v1560_v22 = vmul.f32 %v7395_v48, %v4912_v53  ;;  %v4978_v48 = vld [vmem:[#allocation9] ss:$0 sm:$0xff] }
  0xaf   : > { %v2683_v0 = vmul.f32 %v4607_v23, %v2649_v14  ;;  %v598_v30 = vmax.f32 %v566_v19, 0.0  ;;  %v832_v32 = vadd.f32 %v4969_v47, %v798_v58  ;;  %v1328_v13 = vadd.f32 %v1296_v4, %v1262_v24  ;;  %v5010_v58 = vld [vmem:[%s4393_s24 + $0x110] sm:$0xff] }
  0xb0   : > { %v1096_v15 = vadd.f32 %v1064_v10, %v1030_v5  ;;  %v1594_v33 = vmul.f32 %v4498_v54, %v4917_v56  ;;  %v1660_v41 = vmul.f32 %v4500_v55, %v4920_v36  ;;  %v1858_v38 = vmul.f32 %v4524_v17, %v4912_v53  ;;  %v4988_v17 = vld [vmem:[#allocation9 + $0x1] ss:$0 sm:$0xff] }
  0xb1   : > { %v2715_v59 = vadd.f32 %v2683_v0, %v2417_v42  ;;  %v632_v62 = vmul.f32 %v4978_v48, %v598_v30  ;;  %v864_v2 = vmax.f32 %v832_v32, 0.0  ;;  %v1394_v27 = vadd.f32 %v1362_v20, %v1328_v13  ;;  %7401 = vst [vmem:[#allocation16_spill] sm:$0xff] %v4988_v17  ;;  %v5026_v32 = vld [vmem:[#allocation6 + $0x3] ss:$0 sm:$0xff] }
  0xb2   : > { %v1130_v43 = vadd.f32 %v4981_v49, %v1096_v15  ;;  %v1626_v34 = vadd.f32 %v1594_v33, %v1560_v22  ;;  %v1892_v54 = vmul.f32 %v4526_v18, %v4917_v56  ;;  %v1958_v55 = vmul.f32 %v4532_v31, %v4920_v36 }
  0xb3   : > { %2752 = vadd.xlane.f32.xlu2 %v2715_v59  ;;  %v898_v61 = vmul.f32 %v4988_v17, %v864_v2  ;;  %v1428_v63 = vadd.f32 %v7398_v1, %v1394_v27  ;;  %v2156_v52 = vmul.f32 %v7399_v51, %v4912_v53  ;;  %v2190_v44 = vmul.f32 %v7400_v28, %v4917_v56  ;;  %v5003_v51 = vld [vmem:[#allocation9 + $0x2] ss:$0 sm:$0xff]  ;;  %v5031_v59 = vld [vmem:[#allocation6 + $0x4] ss:$0 sm:$0xff] }
  0xb4   : > { %v1162_v29 = vmax.f32 %v1130_v43, 0.0  ;;  %v1692_v18 = vadd.f32 %v1660_v41, %v1626_v34  ;;  %v1924_v9 = vadd.f32 %v1892_v54, %v1858_v38  ;;  %v2256_v31 = vmul.f32 %v4557_v7, %v4920_v36  ;;  %v5013_v7 = vld [vmem:[%s4393_s24 + $0x118] sm:$0xff] }
  0xb5   : > { %v930_v12 = vadd.f32 %v898_v61, %v632_v62  ;;  %v1460_v57 = vmax.f32 %v1428_v63, 0.0  ;;  %v2222_v10 = vadd.f32 %v2190_v44, %v2156_v52  ;;  %v2454_v1 = vmul.f32 %v4568_v37, %v4912_v53  ;;  %v5035_v62 = vld [vmem:[#allocation6 + $0x5] ss:$0 sm:$0xff]  ;;  %v5046_v52 = vld [vmem:[#allocation6 + $0x7] ss:$0 sm:$0xff] }
  0xb6   : > { %v1196_v24 = vmul.f32 %v5003_v51, %v1162_v29  ;;  %v1726_v28 = vadd.f32 %v4519_v11, %v1692_v18  ;;  %v1990_v14 = vadd.f32 %v1958_v55, %v1924_v9  ;;  %v2488_v19 = vmul.f32 %v4571_v45, %v4917_v56  ;;  %v5050_v9 = vld [vmem:[#allocation6 + $0x8] ss:$0 sm:$0xff] }
  0xb7   : > { %v1494_v4 = vmul.f32 %v4513_v6, %v1460_v57  ;;  %v2288_v42 = vadd.f32 %v2256_v31, %v2222_v10  ;;  %v2554_v53 = vmul.f32 %v4573_v46, %v4920_v36  ;;  %v403_v5 = vmul.f32 %v4928_v50, %v4999_v3  ;;  %v5054_v31 = vld [vmem:[#allocation6 + $0x9] ss:$0 sm:$0xff] }
  0xb8   : > { %v1228_v20 = vadd.f32 %v1196_v24, %v930_v12  ;;  %v1758_v22 = vmax.f32 %v1726_v28, 0.0  ;;  %v2024_v11 = vadd.f32 %v4540_v39, %v1990_v14  ;;  %v2520_v0 = vadd.f32 %v2488_v19, %v2454_v1  ;;  %v5059_v1 = vld [vmem:[#allocation6 + $0xa] ss:$0 sm:$0xff]  ;;  %v5064_v19 = vld [vmem:[#allocation6 + $0xb] ss:$0 sm:$0xff] }
  0xb9   : > { %v2322_v56 = vadd.f32 %v4563_v25, %v2288_v42  ;;  %v437_v30 = vmul.f32 %v4933_v35, %v5010_v58  ;;  %v503_v6 = vmul.f32 %v4937_v26, %v5013_v7  ;;  %v669_v36 = vmul.f32 %v5026_v32, %v4999_v3  ;;  %v5068_v42 = vld [vmem:[#allocation6 + $0xc] ss:$0 sm:$0xff] }
  0xba   : > { %v1526_v13 = vadd.f32 %v1494_v4, %v1228_v20  ;;  %v1792_v15 = vmul.f32 %v4553_v60, %v1758_v22  ;;  %v2056_v33 = vmax.f32 %v2024_v11, 0.0  ;;  %v2586_v41 = vadd.f32 %v2554_v53, %v2520_v0  ;;  %v5041_v60 = vld [vmem:[#allocation6 + $0x6] ss:$0 sm:$0xff]  ;;  %7402 = vst [vmem:[#allocation17_spill] sm:$0xff] %v5068_v42 }
  0xbb   : > { %v2354_v39 = vmax.f32 %v2322_v56, 0.0  ;;  %v469_v38 = vadd.f32 %v437_v30, %v403_v5  ;;  %v703_v25 = vmul.f32 %v5031_v59, %v5010_v58  ;;  %v769_v2 = vmul.f32 %v5035_v62, %v5013_v7  ;;  %v5073_v56 = vld [vmem:[#allocation6 + $0xd] ss:$0 sm:$0xff] }
  0xbc   : > { %v1824_v27 = vadd.f32 %v1792_v15, %v1526_v13  ;;  %v2090_v43 = vmul.f32 %v4559_v21, %v2056_v33  ;;  %v2620_v34 = vadd.f32 %v4592_v16, %v2586_v41  ;;  %v967_v54 = vmul.f32 %v5041_v60, %v4999_v3  ;;  %v5081_v13 = vld [vmem:[#allocation6 + $0xf] ss:$0 sm:$0xff] }
  0xbd   : > { %v2388_v55 = vmul.f32 %v4590_v40, %v2354_v39  ;;  %v535_v61 = vadd.f32 %v503_v6, %v469_v38  ;;  %v735_v63 = vadd.f32 %v703_v25, %v669_v36  ;;  %v1001_v44 = vmul.f32 %v5046_v52, %v5010_v58  ;;  %v5077_v6 = vld [vmem:[#allocation6 + $0xe] ss:$0 sm:$0xff] }
  0xbe   : > { %v2122_v29 = vadd.f32 %v2090_v43, %v1824_v27  ;;  %v2652_v18 = vmax.f32 %v2620_v34, 0.0  ;;  %v1067_v21 = vmul.f32 %v5050_v9, %v5013_v7  ;;  %v1265_v12 = vmul.f32 %v5054_v31, %v4999_v3  ;;  %v5091_v43 = vld [vmem:[#allocation6 + $0x11] ss:$0 sm:$0xff] }
  0xbf   : > { %v569_v40 = vadd.f32 %v4959_v8, %v535_v61  ;;  %v801_v57 = vadd.f32 %v769_v2, %v735_v63  ;;  %v1033_v10 = vadd.f32 %v1001_v44, %v967_v54  ;;  %v1299_v24 = vmul.f32 %v5059_v1, %v5010_v58  ;;  %v5087_v2 = vld [vmem:[#allocation6 + $0x10] ss:$0 sm:$0xff]  ;;  %v5095_v54 = vld [vmem:[#allocation6 + $0x12] ss:$0 sm:$0xff]  ;;  %v5100_v44 = vld [vmem:[#allocation8 + $0x3] ss:$0 sm:$0xff] }
  0xc0   : > { %v2420_v28 = vadd.f32 %v2388_v55, %v2122_v29  ;;  %v2686_v14 = vmul.f32 %v4607_v23, %v2652_v18  ;;  %v1365_v4 = vmul.f32 %v5064_v19, %v5013_v7  ;;  %v1563_v53 = vmul.f32 %v5068_v42, %v4999_v3  ;;  %7403 = vst [vmem:[#allocation18_spill] sm:$0xff] %v5095_v54  ;;  %v5103_v18 = vld [vmem:[#allocation6 + $0x13] ss:$0 sm:$0xff] }
  0xc1   : > { %v601_v5 = vmax.f32 %v569_v40, 0.0  ;;  %v835_v20 = vadd.f32 %v4969_v47, %v801_v57  ;;  %v1099_v22 = vadd.f32 %v1067_v21, %v1033_v10  ;;  %v1331_v11 = vadd.f32 %v1299_v24, %v1265_v12  ;;  %7404 = vst [vmem:[#allocation21_spill] sm:$0xff] %v5100_v44  ;;  %v5107_v57 = vld [vmem:[#allocation6 + $0x14] ss:$0 sm:$0xff] }
  0xc2   : > { %v2718_v0 = vadd.f32 %v2686_v14, %v2420_v28  ;;  %v1597_v30 = vmul.f32 %v5073_v56, %v5010_v58  ;;  %v1663_v36 = vmul.f32 %v5077_v6, %v5013_v7  ;;  %v1861_v15 = vmul.f32 %v5081_v13, %v4999_v3  ;;  %7405 = vst [vmem:[#allocation19_spill] sm:$0xff] %v5103_v18  ;;  %v5114_v28 = vld [vmem:[%s4393_s24 + $0x90] sm:$0xff] }
  0xc3   : > { %v635_v33 = vmul.f32 %v4978_v48, %v601_v5  ;;  %v867_v41 = vmax.f32 %v835_v20, 0.0  ;;  %v1133_v39 = vadd.f32 %v4981_v49, %v1099_v22  ;;  %v1397_v38 = vadd.f32 %v1365_v4, %v1331_v11  ;;  %v5118_v20 = vld [vmem:[%s4393_s24 + $0x98] sm:$0xff] }
  0xc4   : > { %2758 = vadd.xlane.f32.xlu2 %v2718_v0  ;;  %v1629_v25 = vadd.f32 %v1597_v30, %v1563_v53  ;;  %v1895_v27 = vmul.f32 %v5087_v2, %v5010_v58  ;;  %v1961_v34 = vmul.f32 %v5091_v43, %v5013_v7  ;;  %v2159_v55 = vmul.f32 %v5095_v54, %v4999_v3  ;;  %v5120_v22 = vld [vmem:[#allocation8 + $0x4] ss:$0 sm:$0xff] }
  0xc5   : > { %v901_v61 = vmul.f32 %v4988_v17, %v867_v41  ;;  %v1165_v63 = vmax.f32 %v1133_v39, 0.0  ;;  %v1431_v29 = vadd.f32 %v5100_v44, %v1397_v38  ;;  %v2193_v21 = vmul.f32 %v5103_v18, %v5010_v58 }
  0xc6   : > { %v1695_v12 = vadd.f32 %v1663_v36, %v1629_v25  ;;  %v1927_v40 = vadd.f32 %v1895_v27, %v1861_v15  ;;  %v2259_v10 = vmul.f32 %v5107_v57, %v5013_v7  ;;  %v2457_v24 = vmul.f32 %v4568_v37, %v4999_v3  ;;  %v5128_v3 = vld [vmem:[%s4393_s24 + $0xa0] sm:$0xff]  ;;  %v5135_v25 = vld [vmem:[#allocation8 + $0x5] ss:$0 sm:$0xff] }
  0xc7   : > { %v933_v14 = vadd.f32 %v901_v61, %v635_v33  ;;  %v1199_v4 = vmul.f32 %v5003_v51, %v1165_v63  ;;  %v1463_v53 = vmax.f32 %v1431_v29, 0.0  ;;  %v2225_v5 = vadd.f32 %v2193_v21, %v2159_v55  ;;  %v5130_v15 = vld [vmem:[#allocation9 + $0x3] ss:$0 sm:$0xff]  ;;  %v5147_v63 = vld [vmem:[#allocation9 + $0x4] ss:$0 sm:$0xff] }
  0xc8   : > { %v1729_v11 = vadd.f32 %v5120_v22, %v1695_v12  ;;  %v1993_v0 = vadd.f32 %v1961_v34, %v1927_v40  ;;  %v2491_v30 = vmul.f32 %v4571_v45, %v5010_v58  ;;  %v2557_v37 = vmul.f32 %v4573_v46, %v5013_v7  ;;  %v5140_v7 = vld [vmem:[#allocation8 + $0x6] ss:$0 sm:$0xff] }
  0xc9   : > { %v1231_v36 = vadd.f32 %v1199_v4, %v933_v14  ;;  %v1497_v33 = vmul.f32 %v5130_v15, %v1463_v53  ;;  %v2291_v41 = vadd.f32 %v2259_v10, %v2225_v5  ;;  %v398_v39 = vmul.f32 %v4928_v50, %v5114_v28  ;;  %v5156_v5 = vld [vmem:[#allocation9 + $0x5] ss:$0 sm:$0xff] }
  0xca   : > { %v1761_v38 = vmax.f32 %v1729_v11, 0.0  ;;  %v2027_v27 = vadd.f32 %v5135_v25, %v1993_v0  ;;  %v2523_v45 = vadd.f32 %v2491_v30, %v2457_v24  ;;  %v432_v46 = vmul.f32 %v4933_v35, %v5118_v20 }
  0xcb   : > { %v1529_v58 = vadd.f32 %v1497_v33, %v1231_v36  ;;  %v2325_v34 = vadd.f32 %v5140_v7, %v2291_v41  ;;  %v498_v55 = vmul.f32 %v4937_v26, %v5128_v3  ;;  %v664_v61 = vmul.f32 %v5026_v32, %v5114_v28 }
  0xcc   : > { %v1795_v29 = vmul.f32 %v5147_v63, %v1761_v38  ;;  %v2059_v21 = vmax.f32 %v2027_v27, 0.0  ;;  %v2589_v12 = vadd.f32 %v2557_v37, %v2523_v45  ;;  %v464_v40 = vadd.f32 %v432_v46, %v398_v39  ;;  %v5160_v37 = vld [vmem:[#allocation9 + $0x6] ss:$0 sm:$0xff] }
  0xcd   : > { %v2357_v10 = vmax.f32 %v2325_v34, 0.0  ;;  %v698_v24 = vmul.f32 %v5031_v59, %v5118_v20  ;;  %v764_v14 = vmul.f32 %v5035_v62, %v5128_v3  ;;  %v962_v4 = vmul.f32 %v5041_v60, %v5114_v28 }
  0xce   : > { %v1827_v53 = vadd.f32 %v1795_v29, %v1529_v58  ;;  %v2093_v11 = vmul.f32 %v5156_v5, %v2059_v21  ;;  %v2623_v0 = vadd.f32 %v4592_v16, %v2589_v12  ;;  %v530_v30 = vadd.f32 %v498_v55, %v464_v40 }
  0xcf   : > { %v2391_v36 = vmul.f32 %v5160_v37, %v2357_v10  ;;  %v730_v33 = vadd.f32 %v698_v24, %v664_v61  ;;  %v996_v41 = vmul.f32 %v5046_v52, %v5118_v20  ;;  %v1062_v39 = vmul.f32 %v5050_v9, %v5128_v3 }
  0xd0   : > { %v2125_v38 = vadd.f32 %v2093_v11, %v1827_v53  ;;  %v2655_v27 = vmax.f32 %v2623_v0, 0.0  ;;  %v564_v45 = vadd.f32 %v4959_v8, %v530_v30  ;;  %v1260_v46 = vmul.f32 %v5054_v31, %v5114_v28 }
  0xd1   : > { %v796_v16 = vadd.f32 %v764_v14, %v730_v33  ;;  %v1028_v58 = vadd.f32 %v996_v41, %v962_v4  ;;  %v1294_v34 = vmul.f32 %v5059_v1, %v5118_v20  ;;  %v1360_v55 = vmul.f32 %v5064_v19, %v5128_v3 }
  0xd2   : > { %v2423_v61 = vadd.f32 %v2391_v36, %v2125_v38  ;;  %v2689_v29 = vmul.f32 %v4607_v23, %v2655_v27  ;;  %v596_v21 = vmax.f32 %v564_v45, 0.0  ;;  %v1558_v12 = vmul.f32 %v5068_v42, %v5114_v28 }
  0xd3   : > { %v830_v40 = vadd.f32 %v4969_v47, %v796_v16  ;;  %v1094_v10 = vadd.f32 %v1062_v39, %v1028_v58  ;;  %v1326_v24 = vadd.f32 %v1294_v34, %v1260_v46  ;;  %v1592_v14 = vmul.f32 %v5073_v56, %v5118_v20 }
  0xd4   : > { %v2721_v4 = vadd.f32 %v2689_v29, %v2423_v61  ;;  %v630_v53 = vmul.f32 %v4978_v48, %v596_v21  ;;  %v1658_v11 = vmul.f32 %v5077_v6, %v5128_v3  ;;  %v1856_v23 = vmul.f32 %v5081_v13, %v5114_v28  ;;  %v5198_v29 = vld [vmem:[#allocation6 + $0x15] ss:$0 sm:$0xff] }
  0xd5   : > { %v862_v0 = vmax.f32 %v830_v40, 0.0  ;;  %v1128_v30 = vadd.f32 %v4981_v49, %v1094_v10  ;;  %v1392_v36 = vadd.f32 %v1360_v55, %v1326_v24  ;;  %v1624_v33 = vadd.f32 %v1592_v14, %v1558_v12  ;;  %v5203_v12 = vld [vmem:[%s4393_s24 + $0x150] sm:$0xff] }
  0xd6   : > { %2764 = vadd.xlane.f32.xlu2 %v2721_v4  ;;  %v1890_v41 = vmul.f32 %v5087_v2, %v5118_v20  ;;  %v1956_v39 = vmul.f32 %v5091_v43, %v5128_v3  ;;  %v2154_v38 = vmul.f32 %v5095_v54, %v5114_v28  ;;  %v2188_v27 = vmul.f32 %v5103_v18, %v5118_v20  ;;  %v5208_v4 = vld [vmem:[%s4393_s24 + $0x158] sm:$0xff] }
  0xd7   : > { %v896_v45 = vmul.f32 %v4988_v17, %v862_v0  ;;  %v1160_v46 = vmax.f32 %v1128_v30, 0.0  ;;  %v1426_v16 = vadd.f32 %v5100_v44, %v1392_v36  ;;  %v1690_v58 = vadd.f32 %v1658_v11, %v1624_v33  ;;  %v5210_v0 = vld [vmem:[#allocation6 + $0x16] ss:$0 sm:$0xff]  ;;  %v5214_v36 = vld [vmem:[#allocation6 + $0x17] ss:$0 sm:$0xff] }
  0xd8   : > { %v1922_v34 = vadd.f32 %v1890_v41, %v1856_v23  ;;  %v2220_v55 = vadd.f32 %v2188_v27, %v2154_v38  ;;  %v2254_v61 = vmul.f32 %v5107_v57, %v5128_v3  ;;  %v2452_v21 = vmul.f32 %v5198_v29, %v5114_v28 }
  0xd9   : > { %v928_v40 = vadd.f32 %v896_v45, %v630_v53  ;;  %v1194_v10 = vmul.f32 %v5003_v51, %v1160_v46  ;;  %v1458_v24 = vmax.f32 %v1426_v16, 0.0  ;;  %v1724_v14 = vadd.f32 %v5120_v22, %v1690_v58  ;;  %v5219_v53 = vld [vmem:[%s4393_s24 + $0x160] sm:$0xff] }
  0xda   : > { %v1988_v11 = vadd.f32 %v1956_v39, %v1922_v34  ;;  %v2286_v23 = vadd.f32 %v2254_v61, %v2220_v55  ;;  %v2486_v30 = vmul.f32 %v5210_v0, %v5118_v20  ;;  %v2552_v28 = vmul.f32 %v5214_v36, %v5128_v3 }
  0xdb   : > { %v1226_v33 = vadd.f32 %v1194_v10, %v928_v40  ;;  %v1492_v41 = vmul.f32 %v5130_v15, %v1458_v24  ;;  %v1756_v38 = vmax.f32 %v1724_v14, 0.0  ;;  %v406_v39 = vmul.f32 %v4928_v50, %v5203_v12 }
  0xdc   : > { %v2022_v27 = vadd.f32 %v5135_v25, %v1988_v11  ;;  %v2320_v45 = vadd.f32 %v5140_v7, %v2286_v23  ;;  %v2518_v46 = vadd.f32 %v2486_v30, %v2452_v21  ;;  %v440_v20 = vmul.f32 %v4933_v35, %v5208_v4 }
  0xdd   : > { %v1524_v16 = vadd.f32 %v1492_v41, %v1226_v33  ;;  %v1790_v3 = vmul.f32 %v5147_v63, %v1756_v38  ;;  %v506_v58 = vmul.f32 %v4937_v26, %v5219_v53  ;;  %v672_v34 = vmul.f32 %v5026_v32, %v5203_v12  ;;  %v5241_v33 = vld [vmem:[#allocation8 + $0x7] ss:$0 sm:$0xff] }
  0xde   : > { %v2054_v55 = vmax.f32 %v2022_v27, 0.0  ;;  %v2352_v61 = vmax.f32 %v2320_v45, 0.0  ;;  %v2584_v40 = vadd.f32 %v2552_v28, %v2518_v46  ;;  %v472_v10 = vadd.f32 %v440_v20, %v406_v39 }
  0xdf   : > { %v1822_v24 = vadd.f32 %v1790_v3, %v1524_v16  ;;  %v706_v21 = vmul.f32 %v5031_v59, %v5208_v4  ;;  %v772_v14 = vmul.f32 %v5035_v62, %v5219_v53  ;;  %v970_v11 = vmul.f32 %v5041_v60, %v5203_v12 }
  0xe0   : > { %v2088_v23 = vmul.f32 %v5156_v5, %v2054_v55  ;;  %v2386_v30 = vmul.f32 %v5160_v37, %v2352_v61  ;;  %v2618_v41 = vadd.f32 %v5241_v33, %v2584_v40  ;;  %v538_v28 = vadd.f32 %v506_v58, %v472_v10  ;;  %v5257_v10 = vld [vmem:[#allocation9 + $0x7] ss:$0 sm:$0xff] }
  0xe1   : > { %v738_v38 = vadd.f32 %v706_v21, %v672_v34  ;;  %v1004_v39 = vmul.f32 %v5046_v52, %v5208_v4  ;;  %v1070_v27 = vmul.f32 %v5050_v9, %v5219_v53  ;;  %v1268_v45 = vmul.f32 %v5054_v31, %v5203_v12 }
  0xe2   : > { %v2120_v46 = vadd.f32 %v2088_v23, %v1822_v24  ;;  %v2650_v20 = vmax.f32 %v2618_v41, 0.0  ;;  %v572_v16 = vadd.f32 %v4959_v8, %v538_v28  ;;  %v1302_v3 = vmul.f32 %v5059_v1, %v5208_v4 }
  0xe3   : > { %v804_v55 = vadd.f32 %v772_v14, %v738_v38  ;;  %v1036_v61 = vadd.f32 %v1004_v39, %v970_v11  ;;  %v1368_v58 = vmul.f32 %v5064_v19, %v5219_v53  ;;  %v1566_v34 = vmul.f32 %v5068_v42, %v5203_v12 }
  0xe4   : > { %v2418_v40 = vadd.f32 %v2386_v30, %v2120_v46  ;;  %v2684_v21 = vmul.f32 %v5257_v10, %v2650_v20  ;;  %v604_v24 = vmax.f32 %v572_v16, 0.0  ;;  %v1334_v23 = vadd.f32 %v1302_v3, %v1268_v45 }
  0xe5   : > { %v838_v41 = vadd.f32 %v4969_v47, %v804_v55  ;;  %v1102_v28 = vadd.f32 %v1070_v27, %v1036_v61  ;;  %v1600_v14 = vmul.f32 %v5073_v56, %v5208_v4  ;;  %v1666_v11 = vmul.f32 %v5077_v6, %v5219_v53 }
  0xe6   : > { %v2716_v38 = vadd.f32 %v2684_v21, %v2418_v40  ;;  %v638_v39 = vmul.f32 %v4978_v48, %v604_v24  ;;  %v1400_v42 = vadd.f32 %v1368_v58, %v1334_v23  ;;  %v1864_v30 = vmul.f32 %v5081_v13, %v5203_v12 }
  0xe7   : > { %v870_v46 = vmax.f32 %v838_v41, 0.0  ;;  %v1136_v20 = vadd.f32 %v4981_v49, %v1102_v28  ;;  %v1632_v45 = vadd.f32 %v1600_v14, %v1566_v34  ;;  %v1898_v27 = vmul.f32 %v5087_v2, %v5208_v4  ;;  %v5284_v28 = vld [vmem:[%s4393_s24 + $0xa8] sm:$0xff] }
  0xe8   : > { %2754 = vadd.xlane.f32.xlu0 %v2716_v38  ;;  %v1434_v16 = vadd.f32 %v5100_v44, %v1400_v42  ;;  %v1964_v3 = vmul.f32 %v5091_v43, %v5219_v53  ;;  %v2162_v55 = vmul.f32 %v5095_v54, %v5203_v12  ;;  %v2196_v61 = vmul.f32 %v5103_v18, %v5208_v4 }
  0xe9   : > { %v904_v58 = vmul.f32 %v4988_v17, %v870_v46  ;;  %v1168_v34 = vmax.f32 %v1136_v20, 0.0  ;;  %v1698_v40 = vadd.f32 %v1666_v11, %v1632_v45  ;;  %v1930_v21 = vadd.f32 %v1898_v27, %v1864_v30  ;;  %v5289_v46 = vld [vmem:[%s4393_s24 + $0xb0] sm:$0xff]  ;;  %v5292_v11 = vld [vmem:[%s4393_s24 + $0xb8] sm:$0xff] }
  0xea   : > { %v1466_v24 = vmax.f32 %v1434_v16, 0.0  ;;  %v2228_v23 = vadd.f32 %v2196_v61, %v2162_v55  ;;  %v2262_v42 = vmul.f32 %v5107_v57, %v5219_v53  ;;  %v2460_v41 = vmul.f32 %v5198_v29, %v5203_v12 }
  0xeb   : > { %v936_v14 = vadd.f32 %v904_v58, %v638_v39  ;;  %v1202_v38 = vmul.f32 %v5003_v51, %v1168_v34  ;;  %v1732_v18 = vadd.f32 %v5120_v22, %v1698_v40  ;;  %v1996_v54 = vadd.f32 %v1964_v3, %v1930_v21 }
  0xec   : > { %v1500_v30 = vmul.f32 %v5130_v15, %v1466_v24  ;;  %v2294_v20 = vadd.f32 %v2262_v42, %v2228_v23  ;;  %v2494_v45 = vmul.f32 %v5210_v0, %v5208_v4  ;;  %v2560_v12 = vmul.f32 %v5214_v36, %v5219_v53 }
  0xed   : > { %v1234_v27 = vadd.f32 %v1202_v38, %v936_v14  ;;  %v1764_v39 = vmax.f32 %v1732_v18, 0.0  ;;  %v2030_v16 = vadd.f32 %v5135_v25, %v1996_v54  ;;  %v399_v3 = vmul.f32 %v4928_v50, %v5284_v28 }
  0xee   : > { %v2328_v55 = vadd.f32 %v5140_v7, %v2294_v20  ;;  %v2526_v61 = vadd.f32 %v2494_v45, %v2460_v41  ;;  %v433_v58 = vmul.f32 %v4933_v35, %v5289_v46  ;;  %v499_v34 = vmul.f32 %v4937_v26, %v5292_v11 }
  0xef   : > { %v1532_v4 = vadd.f32 %v1500_v30, %v1234_v27  ;;  %v1798_v40 = vmul.f32 %v5147_v63, %v1764_v39  ;;  %v2062_v53 = vmax.f32 %v2030_v16, 0.0  ;;  %v665_v18 = vmul.f32 %v5026_v32, %v5284_v28 }
  0xf0   : > { %v2360_v54 = vmax.f32 %v2328_v55, 0.0  ;;  %v2592_v21 = vadd.f32 %v2560_v12, %v2526_v61  ;;  %v465_v24 = vadd.f32 %v433_v58, %v399_v3  ;;  %v699_v23 = vmul.f32 %v5031_v59, %v5289_v46 }
  0xf1   : > { %v1830_v42 = vadd.f32 %v1798_v40, %v1532_v4  ;;  %v2096_v41 = vmul.f32 %v5156_v5, %v2062_v53  ;;  %v765_v14 = vmul.f32 %v5035_v62, %v5292_v11  ;;  %v963_v38 = vmul.f32 %v5041_v60, %v5284_v28 }
  0xf2   : > { %v2394_v30 = vmul.f32 %v5160_v37, %v2360_v54  ;;  %v2626_v20 = vadd.f32 %v5241_v33, %v2592_v21  ;;  %v531_v45 = vadd.f32 %v499_v34, %v465_v24  ;;  %v731_v27 = vadd.f32 %v699_v23, %v665_v18  ;;  %v7406_v18 = vld [vmem:[#allocation17_spill] sm:$0xff] }
  0xf3   : > { %v2128_v12 = vadd.f32 %v2096_v41, %v1830_v42  ;;  %v997_v39 = vmul.f32 %v5046_v52, %v5289_v46  ;;  %v1063_v16 = vmul.f32 %v5050_v9, %v5292_v11  ;;  %v1261_v3 = vmul.f32 %v5054_v31, %v5284_v28 }
  0xf4   : > { %v2658_v55 = vmax.f32 %v2626_v20, 0.0  ;;  %v565_v61 = vadd.f32 %v4959_v8, %v531_v45  ;;  %v797_v58 = vadd.f32 %v765_v14, %v731_v27  ;;  %v1295_v4 = vmul.f32 %v5059_v1, %v5289_v46 }
  0xf5   : > { %v2426_v40 = vadd.f32 %v2394_v30, %v2128_v12  ;;  %v1029_v34 = vadd.f32 %v997_v39, %v963_v38  ;;  %v1361_v53 = vmul.f32 %v5064_v19, %v5292_v11  ;;  %v1559_v54 = vmul.f32 %v7406_v18, %v5284_v28 }
  0xf6   : > { %v2692_v21 = vmul.f32 %v5257_v10, %v2658_v55  ;;  %v597_v24 = vmax.f32 %v565_v61, 0.0  ;;  %v831_v23 = vadd.f32 %v4969_v47, %v797_v58  ;;  %v1327_v42 = vadd.f32 %v1295_v4, %v1261_v3  ;;  %v7407_v4 = vld [vmem:[#allocation18_spill] sm:$0xff] }
  0xf7   : > { %v1095_v41 = vadd.f32 %v1063_v16, %v1029_v34  ;;  %v1593_v14 = vmul.f32 %v5073_v56, %v5289_v46  ;;  %v1659_v30 = vmul.f32 %v5077_v6, %v5292_v11  ;;  %v1857_v38 = vmul.f32 %v5081_v13, %v5284_v28  ;;  %v7408_v34 = vld [vmem:[#allocation19_spill] sm:$0xff] }
  0xf8   : > { %v2724_v20 = vadd.f32 %v2692_v21, %v2426_v40  ;;  %v631_v45 = vmul.f32 %v4978_v48, %v597_v24  ;;  %v863_v27 = vmax.f32 %v831_v23, 0.0  ;;  %v1393_v12 = vadd.f32 %v1361_v53, %v1327_v42  ;;  %v5355_v42 = vld [vmem:[%s4393_s24 + $0xd8] sm:$0xff] }
  0xf9   : > { %v1129_v39 = vadd.f32 %v4981_v49, %v1095_v41  ;;  %v1625_v55 = vadd.f32 %v1593_v14, %v1559_v54  ;;  %v1891_v16 = vmul.f32 %v5087_v2, %v5289_v46  ;;  %v1957_v3 = vmul.f32 %v5091_v43, %v5292_v11 }
  0xfa   : > { %2770 = vadd.xlane.f32.xlu2 %v2724_v20  ;;  %v897_v61 = vmul.f32 %v4988_v17, %v863_v27  ;;  %v1427_v58 = vadd.f32 %v5100_v44, %v1393_v12  ;;  %v2155_v40 = vmul.f32 %v7407_v4, %v5284_v28  ;;  %v2189_v53 = vmul.f32 %v7408_v34, %v5289_v46 }
  0xfb   : > { %v1161_v54 = vmax.f32 %v1129_v39, 0.0  ;;  %v1691_v21 = vadd.f32 %v1659_v30, %v1625_v55  ;;  %v1923_v24 = vadd.f32 %v1891_v16, %v1857_v38  ;;  %v2255_v23 = vmul.f32 %v5107_v57, %v5292_v11  ;;  %v5364_v38 = vld [vmem:[%s4393_s24 + $0xe0] sm:$0xff]  ;;  %v5367_v39 = vld [vmem:[%s4393_s24 + $0xe8] sm:$0xff] }
  0xfc   : > { %v929_v41 = vadd.f32 %v897_v61, %v631_v45  ;;  %v1459_v14 = vmax.f32 %v1427_v58, 0.0  ;;  %v2221_v20 = vadd.f32 %v2189_v53, %v2155_v40  ;;  %v2453_v27 = vmul.f32 %v5198_v29, %v5284_v28 }
  0xfd   : > { %v1195_v12 = vmul.f32 %v5003_v51, %v1161_v54  ;;  %v1725_v44 = vadd.f32 %v5120_v22, %v1691_v21  ;;  %v1989_v17 = vadd.f32 %v1957_v3, %v1923_v24  ;;  %v2487_v30 = vmul.f32 %v5210_v0, %v5289_v46 }
  0xfe   : > { %v1493_v55 = vmul.f32 %v5130_v15, %v1459_v14  ;;  %v2287_v45 = vadd.f32 %v2255_v23, %v2221_v20  ;;  %v2553_v16 = vmul.f32 %v5214_v36, %v5292_v11  ;;  %v401_v28 = vmul.f32 %v4928_v50, %v5355_v42 }
  0xff   : > { %v1227_v61 = vadd.f32 %v1195_v12, %v929_v41  ;;  %v1757_v58 = vmax.f32 %v1725_v44, 0.0  ;;  %v2023_v3 = vadd.f32 %v5135_v25, %v1989_v17  ;;  %v2519_v40 = vadd.f32 %v2487_v30, %v2453_v27 }
 0x100   : > { %v2321_v46 = vadd.f32 %v5140_v7, %v2287_v45  ;;  %v435_v53 = vmul.f32 %v4933_v35, %v5364_v38  ;;  %v501_v54 = vmul.f32 %v4937_v26, %v5367_v39  ;;  %v667_v21 = vmul.f32 %v5026_v32, %v5355_v42 }
 0x101   : > { %v1525_v11 = vadd.f32 %v1493_v55, %v1227_v61  ;;  %v1791_v24 = vmul.f32 %v5147_v63, %v1757_v58  ;;  %v2055_v23 = vmax.f32 %v2023_v3, 0.0  ;;  %v2585_v41 = vadd.f32 %v2553_v16, %v2519_v40 }
 0x102   : > { %v2353_v44 = vmax.f32 %v2321_v46, 0.0  ;;  %v467_v14 = vadd.f32 %v435_v53, %v401_v28  ;;  %v701_v17 = vmul.f32 %v5031_v59, %v5364_v38  ;;  %v767_v20 = vmul.f32 %v5035_v62, %v5367_v39 }
 0x103   : > { %v1823_v27 = vadd.f32 %v1791_v24, %v1525_v11  ;;  %v2089_v12 = vmul.f32 %v5156_v5, %v2055_v23  ;;  %v2619_v30 = vadd.f32 %v5241_v33, %v2585_v41  ;;  %v965_v55 = vmul.f32 %v5041_v60, %v5355_v42 }
 0x104   : > { %v2387_v45 = vmul.f32 %v5160_v37, %v2353_v44  ;;  %v533_v61 = vadd.f32 %v501_v54, %v467_v14  ;;  %v733_v16 = vadd.f32 %v701_v17, %v667_v21  ;;  %v999_v28 = vmul.f32 %v5046_v52, %v5364_v38 }
 0x105   : > { %v2121_v58 = vadd.f32 %v2089_v12, %v1823_v27  ;;  %v2651_v3 = vmax.f32 %v2619_v30, 0.0  ;;  %v1065_v40 = vmul.f32 %v5050_v9, %v5367_v39  ;;  %v1263_v46 = vmul.f32 %v5054_v31, %v5355_v42 }
 0x106   : > { %v567_v53 = vadd.f32 %v4959_v8, %v533_v61  ;;  %v799_v11 = vadd.f32 %v767_v20, %v733_v16  ;;  %v1031_v24 = vadd.f32 %v999_v28, %v965_v55  ;;  %v1297_v23 = vmul.f32 %v5059_v1, %v5364_v38 }
 0x107   : > { %v2419_v54 = vadd.f32 %v2387_v45, %v2121_v58  ;;  %v2685_v21 = vmul.f32 %v5257_v10, %v2651_v3  ;;  %v1363_v41 = vmul.f32 %v5064_v19, %v5367_v39  ;;  %v1561_v44 = vmul.f32 %v7406_v18, %v5355_v42 }
 0x108   : > { %v599_v14 = vmax.f32 %v567_v53, 0.0  ;;  %v833_v17 = vadd.f32 %v4969_v47, %v799_v11  ;;  %v1097_v27 = vadd.f32 %v1065_v40, %v1031_v24  ;;  %v1329_v12 = vadd.f32 %v1297_v23, %v1263_v46  ;;  %v7409_v11 = vld [vmem:[#allocation16_spill] sm:$0xff] }
 0x109   : > { %v2717_v30 = vadd.f32 %v2685_v21, %v2419_v54  ;;  %v1595_v20 = vmul.f32 %v5073_v56, %v5364_v38  ;;  %v1661_v55 = vmul.f32 %v5077_v6, %v5367_v39  ;;  %v1859_v45 = vmul.f32 %v5081_v13, %v5355_v42  ;;  %v7410_v54 = vld [vmem:[#allocation21_spill] sm:$0xff] }
 0x10a   : > { %v633_v61 = vmul.f32 %v4978_v48, %v599_v14  ;;  %v865_v16 = vmax.f32 %v833_v17, 0.0  ;;  %v1131_v28 = vadd.f32 %v4981_v49, %v1097_v27  ;;  %v1395_v58 = vadd.f32 %v1363_v41, %v1329_v12  ;;  %v5430_v12 = vld [vmem:[%s4393_s24 + $0x198] sm:$0xff] }
 0x10b   : > { %2756 = vadd.xlane.f32.xlu1 %v2717_v30  ;;  %v1627_v3 = vadd.f32 %v1595_v20, %v1561_v44  ;;  %v1893_v40 = vmul.f32 %v5087_v2, %v5364_v38  ;;  %v1959_v46 = vmul.f32 %v5091_v43, %v5367_v39  ;;  %v2157_v53 = vmul.f32 %v7407_v4, %v5355_v42 }
 0x10c   : > { %v899_v24 = vmul.f32 %v7409_v11, %v865_v16  ;;  %v1163_v23 = vmax.f32 %v1131_v28, 0.0  ;;  %v1429_v21 = vadd.f32 %v7410_v54, %v1395_v58  ;;  %v2191_v41 = vmul.f32 %v7408_v34, %v5364_v38  ;;  %v5434_v58 = vld [vmem:[%s4393_s24 + $0x1a0] sm:$0xff] }
 0x10d   : > { %v1693_v44 = vadd.f32 %v1661_v55, %v1627_v3  ;;  %v1925_v14 = vadd.f32 %v1893_v40, %v1859_v45  ;;  %v2257_v17 = vmul.f32 %v5107_v57, %v5367_v39  ;;  %v2455_v27 = vmul.f32 %v5198_v29, %v5355_v42  ;;  %v5442_v3 = vld [vmem:[%s4393_s24 + $0x1a8] sm:$0xff] }
 0x10e   : > { %v931_v30 = vadd.f32 %v899_v24, %v633_v61  ;;  %v1197_v20 = vmul.f32 %v5003_v51, %v1163_v23  ;;  %v1461_v16 = vmax.f32 %v1429_v21, 0.0  ;;  %v2223_v28 = vadd.f32 %v2191_v41, %v2157_v53 }
 0x10f   : > { %v1727_v54 = vadd.f32 %v5120_v22, %v1693_v44  ;;  %v1991_v11 = vadd.f32 %v1959_v46, %v1925_v14  ;;  %v2489_v55 = vmul.f32 %v5210_v0, %v5364_v38  ;;  %v2555_v45 = vmul.f32 %v5214_v36, %v5367_v39 }
 0x110   : > { %v1229_v42 = vadd.f32 %v1197_v20, %v931_v30  ;;  %v1495_v61 = vmul.f32 %v5130_v15, %v1461_v16  ;;  %v2289_v40 = vadd.f32 %v2257_v17, %v2223_v28  ;;  %v409_v53 = vmul.f32 %v4928_v50, %v5430_v12 }
 0x111   : > { %v1759_v24 = vmax.f32 %v1727_v54, 0.0  ;;  %v2025_v23 = vadd.f32 %v5135_v25, %v1991_v11  ;;  %v2521_v21 = vadd.f32 %v2489_v55, %v2455_v27  ;;  %v443_v46 = vmul.f32 %v4933_v35, %v5434_v58 }
 0x112   : > { %v1527_v38 = vadd.f32 %v1495_v61, %v1229_v42  ;;  %v2323_v41 = vadd.f32 %v5140_v7, %v2289_v40  ;;  %v509_v39 = vmul.f32 %v4937_v26, %v5442_v3  ;;  %v675_v44 = vmul.f32 %v5026_v32, %v5430_v12 }
 0x113   : > { %v1793_v14 = vmul.f32 %v5147_v63, %v1759_v24  ;;  %v2057_v17 = vmax.f32 %v2025_v23, 0.0  ;;  %v2587_v50 = vadd.f32 %v2555_v45, %v2521_v21  ;;  %v475_v54 = vadd.f32 %v443_v46, %v409_v53 }
 0x114   : > { %v2355_v30 = vmax.f32 %v2323_v41, 0.0  ;;  %v709_v11 = vmul.f32 %v5031_v59, %v5434_v58  ;;  %v775_v35 = vmul.f32 %v5035_v62, %v5442_v3  ;;  %v973_v27 = vmul.f32 %v5041_v60, %v5430_v12 }
 0x115   : > { %v1825_v20 = vadd.f32 %v1793_v14, %v1527_v38  ;;  %v2091_v26 = vmul.f32 %v5156_v5, %v2057_v17  ;;  %v2621_v16 = vadd.f32 %v5241_v33, %v2587_v50  ;;  %v541_v28 = vadd.f32 %v509_v39, %v475_v54 }
 0x116   : > { %v2389_v55 = vmul.f32 %v5160_v37, %v2355_v30  ;;  %v741_v45 = vadd.f32 %v709_v11, %v675_v44  ;;  %v1007_v42 = vmul.f32 %v5046_v52, %v5434_v58  ;;  %v1073_v61 = vmul.f32 %v5050_v9, %v5442_v3 }
 0x117   : > { %v2123_v40 = vadd.f32 %v2091_v26, %v1825_v20  ;;  %v2653_v53 = vmax.f32 %v2621_v16, 0.0  ;;  %v575_v24 = vadd.f32 %v4959_v8, %v541_v28  ;;  %v1271_v23 = vmul.f32 %v5054_v31, %v5430_v12 }
 0x118   : > { %v807_v21 = vadd.f32 %v775_v35, %v741_v45  ;;  %v1039_v46 = vadd.f32 %v1007_v42, %v973_v27  ;;  %v1305_v38 = vmul.f32 %v5059_v1, %v5434_v58  ;;  %v1371_v41 = vmul.f32 %v5064_v19, %v5442_v3 }
 0x119   : > { %v2421_v39 = vadd.f32 %v2389_v55, %v2123_v40  ;;  %v2687_v44 = vmul.f32 %v5257_v10, %v2653_v53  ;;  %v607_v14 = vmax.f32 %v575_v24, 0.0  ;;  %v1569_v17 = vmul.f32 %v7406_v18, %v5430_v12  ;;  %v7412_v53 = vld [vmem:[#allocation21_spill] sm:$0xff] }
 0x11a   : > { %v841_v8 = vadd.f32 %v4969_v47, %v807_v21  ;;  %v1105_v50 = vadd.f32 %v1073_v61, %v1039_v46  ;;  %v1337_v54 = vadd.f32 %v1305_v38, %v1271_v23  ;;  %v1603_v30 = vmul.f32 %v5073_v56, %v5434_v58  ;;  %v7411_v61 = vld [vmem:[#allocation16_spill] sm:$0xff] }
 0x11b   : > { %v2719_v11 = vadd.f32 %v2687_v44, %v2421_v39  ;;  %v641_v35 = vmul.f32 %v4978_v48, %v607_v14  ;;  %v1669_v27 = vmul.f32 %v5077_v6, %v5442_v3  ;;  %v1867_v20 = vmul.f32 %v5081_v13, %v5430_v12  ;;  %v5503_v39 = vld [vmem:[%s4393_s24 + $0xf0] sm:$0xff] }
 0x11c   : > { %v873_v26 = vmax.f32 %v841_v8, 0.0  ;;  %v1139_v16 = vadd.f32 %v4981_v49, %v1105_v50  ;;  %v1403_v28 = vadd.f32 %v1371_v41, %v1337_v54  ;;  %v1635_v47 = vadd.f32 %v1603_v30, %v1569_v17  ;;  %v5508_v50 = vld [vmem:[%s4393_s24 + $0xf8] sm:$0xff] }
 0x11d   : > { %2760 = vadd.xlane.f32.xlu0 %v2719_v11  ;;  %v1901_v55 = vmul.f32 %v5087_v2, %v5434_v58  ;;  %v1967_v45 = vmul.f32 %v5091_v43, %v5442_v3  ;;  %v2165_v48 = vmul.f32 %v7407_v4, %v5430_v12  ;;  %v2199_v42 = vmul.f32 %v7408_v34, %v5434_v58 }
 0x11e   : > { %v907_v40 = vmul.f32 %v7411_v61, %v873_v26  ;;  %v1171_v49 = vmax.f32 %v1139_v16, 0.0  ;;  %v1437_v24 = vadd.f32 %v7412_v53, %v1403_v28  ;;  %v1701_v23 = vadd.f32 %v1669_v27, %v1635_v47 }
 0x11f   : > { %v1933_v21 = vadd.f32 %v1901_v55, %v1867_v20  ;;  %v2231_v46 = vadd.f32 %v2199_v42, %v2165_v48  ;;  %v2265_v38 = vmul.f32 %v5107_v57, %v5442_v3  ;;  %v2463_v41 = vmul.f32 %v5198_v29, %v5430_v12  ;;  %v5515_v20 = vld [vmem:[%s4393_s24 + $0x100] sm:$0xff] }
 0x120   : > { %v939_v44 = vadd.f32 %v907_v40, %v641_v35  ;;  %v1205_v14 = vmul.f32 %v5003_v51, %v1171_v49  ;;  %v1469_v17 = vmax.f32 %v1437_v24, 0.0  ;;  %v1735_v8 = vadd.f32 %v5120_v22, %v1701_v23  ;;  %v5518_v51 = vld [vmem:[#allocation6] ss:$0 sm:$0xff]  ;;  %v5529_v42 = vld [vmem:[#allocation6 + $0x2] ss:$0 sm:$0xff] }
 0x121   : > { %v1999_v54 = vadd.f32 %v1967_v45, %v1933_v21  ;;  %v2297_v30 = vadd.f32 %v2265_v38, %v2231_v46  ;;  %v2497_v11 = vmul.f32 %v5210_v0, %v5434_v58  ;;  %v2563_v27 = vmul.f32 %v5214_v36, %v5442_v3  ;;  %v5524_v58 = vld [vmem:[#allocation6 + $0x1] ss:$0 sm:$0xff] }
 0x122   : > { %v1237_v12 = vadd.f32 %v1205_v14, %v939_v44  ;;  %v1503_v35 = vmul.f32 %v5130_v15, %v1469_v17  ;;  %v1767_v26 = vmax.f32 %v1735_v8, 0.0  ;;  %v402_v16 = vmul.f32 %v5518_v51, %v5503_v39 }
 0x123   : > { %v2033_v28 = vadd.f32 %v5135_v25, %v1999_v54  ;;  %v2331_v47 = vadd.f32 %v5140_v7, %v2297_v30  ;;  %v2529_v55 = vadd.f32 %v2497_v11, %v2463_v41  ;;  %v436_v3 = vmul.f32 %v5524_v58, %v5508_v50 }
 0x124   : > { %v1535_v45 = vadd.f32 %v1503_v35, %v1237_v12  ;;  %v1801_v48 = vmul.f32 %v5147_v63, %v1767_v26  ;;  %v502_v61 = vmul.f32 %v5529_v42, %v5515_v20  ;;  %v668_v40 = vmul.f32 %v5026_v32, %v5503_v39 }
 0x125   : > { %v2065_v49 = vmax.f32 %v2033_v28, 0.0  ;;  %v2363_v24 = vmax.f32 %v2331_v47, 0.0  ;;  %v2595_v23 = vadd.f32 %v2563_v27, %v2529_v55  ;;  %v468_v21 = vadd.f32 %v436_v3, %v402_v16  ;;  %v5560_v3 = vld [vmem:[#allocation8 + $0x1] ss:$0 sm:$0xff] }
 0x126   : > { %v1833_v46 = vadd.f32 %v1801_v48, %v1535_v45  ;;  %v702_v38 = vmul.f32 %v5031_v59, %v5508_v50  ;;  %v768_v41 = vmul.f32 %v5035_v62, %v5515_v20  ;;  %v966_v44 = vmul.f32 %v5041_v60, %v5503_v39  ;;  %v5550_v60 = vld [vmem:[#allocation8] ss:$0 sm:$0xff] }
 0x127   : > { %v2099_v14 = vmul.f32 %v5156_v5, %v2065_v49  ;;  %v2397_v17 = vmul.f32 %v5160_v37, %v2363_v24  ;;  %v2629_v32 = vadd.f32 %v5241_v33, %v2595_v23  ;;  %v534_v8 = vadd.f32 %v502_v61, %v468_v21  ;;  %v5572_v21 = vld [vmem:[#allocation8 + $0x2] ss:$0 sm:$0xff] }
 0x128   : > { %v734_v54 = vadd.f32 %v702_v38, %v668_v40  ;;  %v1000_v30 = vmul.f32 %v5046_v52, %v5508_v50  ;;  %v1066_v59 = vmul.f32 %v5050_v9, %v5515_v20  ;;  %v1264_v62 = vmul.f32 %v5054_v31, %v5503_v39  ;;  %v5567_v40 = vld [vmem:[#allocation9] ss:$0 sm:$0xff] }
 0x129   : > { %v2131_v11 = vadd.f32 %v2099_v14, %v1833_v46  ;;  %v2661_v27 = vmax.f32 %v2629_v32, 0.0  ;;  %v568_v12 = vadd.f32 %v5550_v60, %v534_v8  ;;  %v1298_v35 = vmul.f32 %v5059_v1, %v5508_v50  ;;  %v5584_v14 = vld [vmem:[#allocation9 + $0x1] ss:$0 sm:$0xff] }
 0x12a   : > { %v800_v26 = vadd.f32 %v768_v41, %v734_v54  ;;  %v1032_v16 = vadd.f32 %v1000_v30, %v966_v44  ;;  %v1364_v52 = vmul.f32 %v5064_v19, %v5515_v20  ;;  %v1562_v9 = vmul.f32 %v7406_v18, %v5503_v39  ;;  %7413 = vst [vmem:[#allocation20_spill] sm:$0xff] %v5584_v14  ;;  %v5592_v30 = vld [vmem:[%s4393_s24 + $0x120] sm:$0xff] }
 0x12b   : > { %v2429_v28 = vadd.f32 %v2397_v17, %v2131_v11  ;;  %v2695_v31 = vmul.f32 %v5257_v10, %v2661_v27  ;;  %v600_v47 = vmax.f32 %v568_v12, 0.0  ;;  %v1330_v55 = vadd.f32 %v1298_v35, %v1264_v62  ;;  %v5599_v12 = vld [vmem:[%s4393_s24 + $0x128] sm:$0xff]  ;;  %v5602_v35 = vld [vmem:[%s4393_s24 + $0x130] sm:$0xff] }
 0x12c   : > { %v834_v45 = vadd.f32 %v5560_v3, %v800_v26  ;;  %v1098_v48 = vadd.f32 %v1066_v59, %v1032_v16  ;;  %v1596_v1 = vmul.f32 %v5073_v56, %v5508_v50  ;;  %v1662_v61 = vmul.f32 %v5077_v6, %v5515_v20  ;;  %v5594_v59 = vld [vmem:[#allocation9 + $0x2] ss:$0 sm:$0xff] }
 0x12d   : > { %v2727_v19 = vadd.f32 %v2695_v31, %v2429_v28  ;;  %v634_v18 = vmul.f32 %v5567_v40, %v600_v47  ;;  %v1396_v49 = vadd.f32 %v1364_v52, %v1330_v55  ;;  %v1860_v24 = vmul.f32 %v5081_v13, %v5503_v39 }
 0x12e   : > { %v866_v23 = vmax.f32 %v834_v45, 0.0  ;;  %v1132_v46 = vadd.f32 %v5572_v21, %v1098_v48  ;;  %v1628_v38 = vadd.f32 %v1596_v1, %v1562_v9  ;;  %v1894_v56 = vmul.f32 %v5087_v2, %v5508_v50  ;;  %v5618_v48 = vld [vmem:[#allocation6 + $0x3] ss:$0 sm:$0xff] }
 0x12f   : > { %2776 = vadd.xlane.f32.xlu2 %v2727_v19  ;;  %v1430_v6 = vadd.f32 %v7412_v53, %v1396_v49  ;;  %v1960_v41 = vmul.f32 %v5091_v43, %v5515_v20  ;;  %v2158_v44 = vmul.f32 %v7407_v4, %v5503_v39  ;;  %v2192_v13 = vmul.f32 %v7408_v34, %v5508_v50 }
 0x130   : > { %v900_v17 = vmul.f32 %v5584_v14, %v866_v23  ;;  %v1164_v32 = vmax.f32 %v1132_v46, 0.0  ;;  %v1694_v2 = vadd.f32 %v1662_v61, %v1628_v38  ;;  %v1926_v8 = vadd.f32 %v1894_v56, %v1860_v24  ;;  %v5627_v23 = vld [vmem:[#allocation6 + $0x5] ss:$0 sm:$0xff]  ;;  %v5631_v46 = vld [vmem:[#allocation6 + $0x6] ss:$0 sm:$0xff] }
 0x131   : > { %v1462_v54 = vmax.f32 %v1430_v6, 0.0  ;;  %v2224_v53 = vadd.f32 %v2192_v13, %v2158_v44  ;;  %v2258_v43 = vmul.f32 %v5107_v57, %v5515_v20  ;;  %v2456_v4 = vmul.f32 %v5198_v29, %v5503_v39 }
 0x132   : > { %v932_v34 = vadd.f32 %v900_v17, %v634_v18  ;;  %v1198_v62 = vmul.f32 %v5594_v59, %v1164_v32  ;;  %v1728_v11 = vadd.f32 %v5120_v22, %v1694_v2  ;;  %v1992_v27 = vadd.f32 %v1960_v41, %v1926_v8  ;;  %v5637_v17 = vld [vmem:[#allocation6 + $0x7] ss:$0 sm:$0xff]  ;;  %v5641_v32 = vld [vmem:[#allocation6 + $0x8] ss:$0 sm:$0xff]  ;;  %v5645_v8 = vld [vmem:[#allocation6 + $0x9] ss:$0 sm:$0xff] }
 0x133   : > { %v1496_v26 = vmul.f32 %v5130_v15, %v1462_v54  ;;  %v2290_v57 = vadd.f32 %v2258_v43, %v2224_v53  ;;  %v2490_v39 = vmul.f32 %v5210_v0, %v5508_v50  ;;  %v2556_v16 = vmul.f32 %v5214_v36, %v5515_v20 }
 0x134   : > { %v1230_v52 = vadd.f32 %v1198_v62, %v932_v34  ;;  %v1760_v9 = vmax.f32 %v1728_v11, 0.0  ;;  %v2026_v28 = vadd.f32 %v5135_v25, %v1992_v27  ;;  %v404_v22 = vmul.f32 %v5518_v51, %v5592_v30  ;;  %v5654_v27 = vld [vmem:[#allocation6 + $0xb] ss:$0 sm:$0xff] }
 0x135   : > { %v2324_v31 = vadd.f32 %v5140_v7, %v2290_v57  ;;  %v2522_v47 = vadd.f32 %v2490_v39, %v2456_v4  ;;  %v438_v15 = vmul.f32 %v5524_v58, %v5599_v12  ;;  %v504_v55 = vmul.f32 %v5529_v42, %v5602_v35  ;;  %v5622_v7 = vld [vmem:[#allocation6 + $0x4] ss:$0 sm:$0xff]  ;;  %v5650_v4 = vld [vmem:[#allocation6 + $0xa] ss:$0 sm:$0xff]  ;;  %v5658_v57 = vld [vmem:[#allocation6 + $0xc] ss:$0 sm:$0xff] }
 0x136   : > { %v1528_v50 = vadd.f32 %v1496_v26, %v1230_v52  ;;  %v1794_v45 = vmul.f32 %v5147_v63, %v1760_v9  ;;  %v2058_v20 = vmax.f32 %v2026_v28, 0.0  ;;  %v670_v25 = vmul.f32 %v5618_v48, %v5592_v30 }
 0x137   : > { %v2356_v1 = vmax.f32 %v2324_v31, 0.0  ;;  %v2588_v61 = vadd.f32 %v2556_v16, %v2522_v47  ;;  %v470_v19 = vadd.f32 %v438_v15, %v404_v22  ;;  %v704_v18 = vmul.f32 %v5622_v7, %v5599_v12  ;;  %v5664_v31 = vld [vmem:[#allocation6 + $0xd] ss:$0 sm:$0xff]  ;;  %v5668_v15 = vld [vmem:[#allocation6 + $0xe] ss:$0 sm:$0xff] }
 0x138   : > { %v1826_v49 = vadd.f32 %v1794_v45, %v1528_v50  ;;  %v2092_v24 = vmul.f32 %v5156_v5, %v2058_v20  ;;  %v770_v63 = vmul.f32 %v5627_v23, %v5602_v35  ;;  %v968_v38 = vmul.f32 %v5631_v46, %v5592_v30  ;;  %v5672_v50 = vld [vmem:[#allocation6 + $0xf] ss:$0 sm:$0xff] }
 0x139   : > { %v2390_v56 = vmul.f32 %v5160_v37, %v2356_v1  ;;  %v2622_v6 = vadd.f32 %v5241_v33, %v2588_v61  ;;  %v536_v41 = vadd.f32 %v504_v55, %v470_v19  ;;  %v736_v44 = vadd.f32 %v704_v18, %v670_v25 }
 0x13a   : > { %v2124_v13 = vadd.f32 %v2092_v24, %v1826_v49  ;;  %v1002_v5 = vmul.f32 %v5637_v17, %v5599_v12  ;;  %v1068_v2 = vmul.f32 %v5641_v32, %v5602_v35  ;;  %v1266_v37 = vmul.f32 %v5645_v8, %v5592_v30  ;;  %v5678_v49 = vld [vmem:[#allocation6 + $0x10] ss:$0 sm:$0xff] }
 0x13b   : > { %v2654_v54 = vmax.f32 %v2622_v6, 0.0  ;;  %v570_v53 = vadd.f32 %v5550_v60, %v536_v41  ;;  %v802_v43 = vadd.f32 %v770_v63, %v736_v44  ;;  %v1300_v34 = vmul.f32 %v5650_v4, %v5599_v12  ;;  %v5682_v63 = vld [vmem:[#allocation6 + $0x11] ss:$0 sm:$0xff]  ;;  %v5687_v6 = vld [vmem:[#allocation8 + $0x3] ss:$0 sm:$0xff] }
 0x13c   : > { %v2422_v62 = vadd.f32 %v2390_v56, %v2124_v13  ;;  %v1034_v11 = vadd.f32 %v1002_v5, %v968_v38  ;;  %v1366_v26 = vmul.f32 %v5654_v27, %v5602_v35  ;;  %v1564_v39 = vmul.f32 %v5658_v57, %v5592_v30  ;;  %7414 = vst [vmem:[#allocation22_spill] sm:$0xff] %v5687_v6  ;;  %v5690_v44 = vld [vmem:[#allocation6 + $0x12] ss:$0 sm:$0xff]  ;;  %v5694_v5 = vld [vmem:[#allocation6 + $0x13] ss:$0 sm:$0xff] }
 0x13d   : > { %v2688_v16 = vmul.f32 %v5257_v10, %v2654_v54  ;;  %v602_v52 = vmax.f32 %v570_v53, 0.0  ;;  %v836_v9 = vadd.f32 %v5560_v3, %v802_v43  ;;  %v1332_v28 = vadd.f32 %v1300_v34, %v1266_v37  ;;  %7415 = vst [vmem:[#allocation23_spill] sm:$0xff] %v5690_v44  ;;  %v5698_v43 = vld [vmem:[#allocation6 + $0x14] ss:$0 sm:$0xff] }
 0x13e   : > { %v1100_v22 = vadd.f32 %v1068_v2, %v1034_v11  ;;  %v1598_v47 = vmul.f32 %v5664_v31, %v5599_v12  ;;  %v1664_v55 = vmul.f32 %v5668_v15, %v5602_v35  ;;  %v1862_v45 = vmul.f32 %v5672_v50, %v5592_v30  ;;  %7416 = vst [vmem:[#allocation17_spill] sm:$0xff] %v5694_v5 }
 0x13f   : > { %v2720_v20 = vadd.f32 %v2688_v16, %v2422_v62  ;;  %v636_v25 = vmul.f32 %v5567_v40, %v602_v52  ;;  %v868_v1 = vmax.f32 %v836_v9, 0.0  ;;  %v1398_v61 = vadd.f32 %v1366_v26, %v1332_v28  ;;  %v5703_v62 = vld [vmem:[%s4393_s24 + $0x1e0] sm:$0xff]  ;;  %v5708_v9 = vld [vmem:[#allocation8 + $0x4] ss:$0 sm:$0xff] }
 0x140   : > { %v1134_v19 = vadd.f32 %v5572_v21, %v1100_v22  ;;  %v1630_v18 = vadd.f32 %v1598_v47, %v1564_v39  ;;  %v1896_v24 = vmul.f32 %v5678_v49, %v5599_v12  ;;  %v1962_v38 = vmul.f32 %v5682_v63, %v5602_v35 }
 0x141   : > { %2762 = vadd.xlane.f32.xlu1 %v2720_v20  ;;  %v902_v56 = vmul.f32 %v5584_v14, %v868_v1  ;;  %v1432_v41 = vadd.f32 %v5687_v6, %v1398_v61  ;;  %v2160_v13 = vmul.f32 %v5690_v44, %v5592_v30  ;;  %v2194_v2 = vmul.f32 %v5694_v5, %v5599_v12  ;;  %v5719_v20 = vld [vmem:[#allocation9 + $0x3] ss:$0 sm:$0xff] }
 0x142   : > { %v1166_v37 = vmax.f32 %v1134_v19, 0.0  ;;  %v1696_v54 = vadd.f32 %v1664_v55, %v1630_v18  ;;  %v1928_v53 = vadd.f32 %v1896_v24, %v1862_v45  ;;  %v2260_v34 = vmul.f32 %v5698_v43, %v5602_v35  ;;  %v5714_v55 = vld [vmem:[%s4393_s24 + $0x1e8] sm:$0xff]  ;;  %v5717_v45 = vld [vmem:[%s4393_s24 + $0x1f0] sm:$0xff]  ;;  %v5726_v18 = vld [vmem:[#allocation8 + $0x5] ss:$0 sm:$0xff] }
 0x143   : > { %v934_v11 = vadd.f32 %v902_v56, %v636_v25  ;;  %v1464_v26 = vmax.f32 %v1432_v41, 0.0  ;;  %v2226_v39 = vadd.f32 %v2194_v2, %v2160_v13  ;;  %v2458_v16 = vmul.f32 %v5198_v29, %v5592_v30  ;;  %v5729_v24 = vld [vmem:[#allocation8 + $0x6] ss:$0 sm:$0xff]  ;;  %v5738_v13 = vld [vmem:[#allocation9 + $0x4] ss:$0 sm:$0xff] }
 0x144   : > { %v1200_v52 = vmul.f32 %v5594_v59, %v1166_v37  ;;  %v1730_v28 = vadd.f32 %v5708_v9, %v1696_v54  ;;  %v1994_v22 = vadd.f32 %v1962_v38, %v1928_v53  ;;  %v2492_v47 = vmul.f32 %v5210_v0, %v5599_v12 }
 0x145   : > { %v1498_v25 = vmul.f32 %v5719_v20, %v1464_v26  ;;  %v2292_v1 = vadd.f32 %v2260_v34, %v2226_v39  ;;  %v2558_v29 = vmul.f32 %v5214_v36, %v5602_v35  ;;  %v412_v30 = vmul.f32 %v5518_v51, %v5703_v62 }
 0x146   : > { %v1232_v61 = vadd.f32 %v1200_v52, %v934_v11  ;;  %v1762_v19 = vmax.f32 %v1730_v28, 0.0  ;;  %v2028_v0 = vadd.f32 %v5726_v18, %v1994_v22  ;;  %v2524_v12 = vadd.f32 %v2492_v47, %v2458_v16  ;;  %v5745_v16 = vld [vmem:[#allocation9 + $0x5] ss:$0 sm:$0xff]  ;;  %v5751_v47 = vld [vmem:[#allocation9 + $0x6] ss:$0 sm:$0xff] }
 0x147   : > { %v2326_v38 = vadd.f32 %v5729_v24, %v2292_v1  ;;  %v446_v56 = vmul.f32 %v5524_v58, %v5714_v55  ;;  %v512_v36 = vmul.f32 %v5529_v42, %v5717_v45  ;;  %v678_v35 = vmul.f32 %v5618_v48, %v5703_v62 }
 0x148   : > { %v1530_v41 = vadd.f32 %v1498_v25, %v1232_v61  ;;  %v1796_v2 = vmul.f32 %v5738_v13, %v1762_v19  ;;  %v2060_v37 = vmax.f32 %v2028_v0, 0.0  ;;  %v2590_v54 = vadd.f32 %v2558_v29, %v2524_v12 }
 0x149   : > { %v2358_v53 = vmax.f32 %v2326_v38, 0.0  ;;  %v478_v34 = vadd.f32 %v446_v56, %v412_v30  ;;  %v712_v11 = vmul.f32 %v5622_v7, %v5714_v55  ;;  %v778_v26 = vmul.f32 %v5627_v23, %v5717_v45 }
 0x14a   : > { %v1828_v39 = vadd.f32 %v1796_v2, %v1530_v41  ;;  %v2094_v52 = vmul.f32 %v5745_v16, %v2060_v37  ;;  %v2624_v28 = vadd.f32 %v5241_v33, %v2590_v54  ;;  %v976_v22 = vmul.f32 %v5631_v46, %v5703_v62 }
 0x14b   : > { %v2392_v25 = vmul.f32 %v5751_v47, %v2358_v53  ;;  %v544_v1 = vadd.f32 %v512_v36, %v478_v34  ;;  %v744_v29 = vadd.f32 %v712_v11, %v678_v35  ;;  %v1010_v30 = vmul.f32 %v5637_v17, %v5714_v55 }
 0x14c   : > { %v2126_v61 = vadd.f32 %v2094_v52, %v1828_v39  ;;  %v2656_v19 = vmax.f32 %v2624_v28, 0.0  ;;  %v1076_v0 = vmul.f32 %v5641_v32, %v5717_v45  ;;  %v1274_v33 = vmul.f32 %v5645_v8, %v5703_v62 }
 0x14d   : > { %v578_v12 = vadd.f32 %v5550_v60, %v544_v1  ;;  %v810_v38 = vadd.f32 %v778_v26, %v744_v29  ;;  %v1042_v56 = vadd.f32 %v1010_v30, %v976_v22  ;;  %v1308_v41 = vmul.f32 %v5650_v4, %v5714_v55 }
 0x14e   : > { %v2424_v36 = vadd.f32 %v2392_v25, %v2126_v61  ;;  %v2690_v35 = vmul.f32 %v5257_v10, %v2656_v19  ;;  %v1374_v2 = vmul.f32 %v5654_v27, %v5717_v45  ;;  %v1572_v37 = vmul.f32 %v5658_v57, %v5703_v62 }
 0x14f   : > { %v610_v54 = vmax.f32 %v578_v12, 0.0  ;;  %v844_v53 = vadd.f32 %v5560_v3, %v810_v38  ;;  %v1108_v34 = vadd.f32 %v1076_v0, %v1042_v56  ;;  %v1340_v11 = vadd.f32 %v1308_v41, %v1274_v33 }
 0x150   : > { %v2722_v39 = vadd.f32 %v2690_v35, %v2424_v36  ;;  %v1606_v26 = vmul.f32 %v5664_v31, %v5714_v55  ;;  %v1672_v52 = vmul.f32 %v5668_v15, %v5717_v45  ;;  %v1870_v10 = vmul.f32 %v5672_v50, %v5703_v62  ;;  %v5789_v35 = vld [vmem:[#allocation6 + $0x15] ss:$0 sm:$0xff] }
 0x151   : > { %v644_v28 = vmul.f32 %v5567_v40, %v610_v54  ;;  %v876_v22 = vmax.f32 %v844_v53, 0.0  ;;  %v1142_v25 = vadd.f32 %v5572_v21, %v1108_v34  ;;  %v1406_v1 = vadd.f32 %v1374_v2, %v1340_v11 }
 0x152   : > { %2766 = vadd.xlane.f32.xlu0 %v2722_v39  ;;  %v1638_v29 = vadd.f32 %v1606_v26, %v1572_v37  ;;  %v1904_v30 = vmul.f32 %v5678_v49, %v5714_v55  ;;  %v1970_v61 = vmul.f32 %v5682_v63, %v5717_v45  ;;  %v2168_v19 = vmul.f32 %v5690_v44, %v5703_v62  ;;  %v5794_v37 = vld [vmem:[%s4393_s24 + $0x138] sm:$0xff]  ;;  %v5798_v39 = vld [vmem:[%s4393_s24 + $0x140] sm:$0xff] }
 0x153   : > { %v910_v0 = vmul.f32 %v5584_v14, %v876_v22  ;;  %v1174_v33 = vmax.f32 %v1142_v25, 0.0  ;;  %v1440_v12 = vadd.f32 %v5687_v6, %v1406_v1  ;;  %v2202_v38 = vmul.f32 %v5694_v5, %v5714_v55  ;;  %v5805_v25 = vld [vmem:[#allocation6 + $0x17] ss:$0 sm:$0xff] }
 0x154   : > { %v1704_v56 = vadd.f32 %v1672_v52, %v1638_v29  ;;  %v1936_v41 = vadd.f32 %v1904_v30, %v1870_v10  ;;  %v2268_v36 = vmul.f32 %v5698_v43, %v5717_v45  ;;  %v2466_v2 = vmul.f32 %v5789_v35, %v5703_v62  ;;  %v5801_v10 = vld [vmem:[#allocation6 + $0x16] ss:$0 sm:$0xff] }
 0x155   : > { %v942_v54 = vadd.f32 %v910_v0, %v644_v28  ;;  %v1208_v53 = vmul.f32 %v5594_v59, %v1174_v33  ;;  %v1472_v34 = vmax.f32 %v1440_v12, 0.0  ;;  %v2234_v11 = vadd.f32 %v2202_v38, %v2168_v19  ;;  %v5810_v28 = vld [vmem:[%s4393_s24 + $0x148] sm:$0xff] }
 0x156   : > { %v1738_v26 = vadd.f32 %v5708_v9, %v1704_v56  ;;  %v2002_v52 = vadd.f32 %v1970_v61, %v1936_v41  ;;  %v2500_v22 = vmul.f32 %v5801_v10, %v5714_v55  ;;  %v2566_v62 = vmul.f32 %v5805_v25, %v5717_v45 }
 0x157   : > { %v1240_v1 = vadd.f32 %v1208_v53, %v942_v54  ;;  %v1506_v29 = vmul.f32 %v5719_v20, %v1472_v34  ;;  %v2300_v30 = vadd.f32 %v2268_v36, %v2234_v11  ;;  %v405_v19 = vmul.f32 %v5518_v51, %v5794_v37 }
 0x158   : > { %v1770_v61 = vmax.f32 %v1738_v26, 0.0  ;;  %v2036_v0 = vadd.f32 %v5726_v18, %v2002_v52  ;;  %v2532_v33 = vadd.f32 %v2500_v22, %v2466_v2  ;;  %v439_v55 = vmul.f32 %v5524_v58, %v5798_v39 }
 0x159   : > { %v1538_v12 = vadd.f32 %v1506_v29, %v1240_v1  ;;  %v2334_v38 = vadd.f32 %v5729_v24, %v2300_v30  ;;  %v505_v45 = vmul.f32 %v5529_v42, %v5810_v28  ;;  %v671_v56 = vmul.f32 %v5618_v48, %v5794_v37  ;;  %v5831_v1 = vld [vmem:[#allocation8 + $0x7] ss:$0 sm:$0xff] }
 0x15a   : > { %v1804_v41 = vmul.f32 %v5738_v13, %v1770_v61  ;;  %v2068_v36 = vmax.f32 %v2036_v0, 0.0  ;;  %v2598_v54 = vadd.f32 %v2566_v62, %v2532_v33  ;;  %v471_v53 = vadd.f32 %v439_v55, %v405_v19 }
 0x15b   : > { %v2366_v34 = vmax.f32 %v2334_v38, 0.0  ;;  %v705_v2 = vmul.f32 %v5622_v7, %v5798_v39  ;;  %v771_v11 = vmul.f32 %v5627_v23, %v5810_v28  ;;  %v969_v26 = vmul.f32 %v5631_v46, %v5794_v37 }
 0x15c   : > { %v1836_v52 = vadd.f32 %v1804_v41, %v1538_v12  ;;  %v2102_v22 = vmul.f32 %v5745_v16, %v2068_v36  ;;  %v2632_v29 = vadd.f32 %v5831_v1, %v2598_v54  ;;  %v537_v30 = vadd.f32 %v505_v45, %v471_v53  ;;  %v5846_v53 = vld [vmem:[#allocation9 + $0x7] ss:$0 sm:$0xff] }
 0x15d   : > { %v2400_v62 = vmul.f32 %v5751_v47, %v2366_v34  ;;  %v737_v19 = vadd.f32 %v705_v2, %v671_v56  ;;  %v1003_v61 = vmul.f32 %v5637_v17, %v5798_v39  ;;  %v1069_v0 = vmul.f32 %v5641_v32, %v5810_v28 }
 0x15e   : > { %v2134_v33 = vadd.f32 %v2102_v22, %v1836_v52  ;;  %v2664_v55 = vmax.f32 %v2632_v29, 0.0  ;;  %v571_v12 = vadd.f32 %v5550_v60, %v537_v30  ;;  %v1267_v38 = vmul.f32 %v5645_v8, %v5794_v37 }
 0x15f   : > { %v803_v41 = vadd.f32 %v771_v11, %v737_v19  ;;  %v1035_v36 = vadd.f32 %v1003_v61, %v969_v26  ;;  %v1301_v45 = vmul.f32 %v5650_v4, %v5798_v39  ;;  %v1367_v56 = vmul.f32 %v5654_v27, %v5810_v28 }
 0x160   : > { %v2432_v54 = vadd.f32 %v2400_v62, %v2134_v33  ;;  %v2698_v34 = vmul.f32 %v5846_v53, %v2664_v55  ;;  %v603_v2 = vmax.f32 %v571_v12, 0.0  ;;  %v1565_v52 = vmul.f32 %v5658_v57, %v5794_v37 }
 0x161   : > { %v837_v22 = vadd.f32 %v5560_v3, %v803_v41  ;;  %v1101_v29 = vadd.f32 %v1069_v0, %v1035_v36  ;;  %v1333_v11 = vadd.f32 %v1301_v45, %v1267_v38  ;;  %v1599_v26 = vmul.f32 %v5664_v31, %v5798_v39 }
 0x162   : > { %v2730_v30 = vadd.f32 %v2698_v34, %v2432_v54  ;;  %v637_v19 = vmul.f32 %v5567_v40, %v603_v2  ;;  %v1665_v62 = vmul.f32 %v5668_v15, %v5810_v28  ;;  %v1863_v61 = vmul.f32 %v5672_v50, %v5794_v37 }
 0x163   : > { %v869_v33 = vmax.f32 %v837_v22, 0.0  ;;  %v1135_v55 = vadd.f32 %v5572_v21, %v1101_v29  ;;  %v1399_v12 = vadd.f32 %v1367_v56, %v1333_v11  ;;  %v1631_v41 = vadd.f32 %v1599_v26, %v1565_v52  ;;  %v5875_v26 = vld [vmem:[%s4393_s24 + $0x168] sm:$0xff] }
 0x164   : > { %2782 = vadd.xlane.f32.xlu2 %v2730_v30  ;;  %v1897_v0 = vmul.f32 %v5678_v49, %v5798_v39  ;;  %v1963_v38 = vmul.f32 %v5682_v63, %v5810_v28  ;;  %v2161_v36 = vmul.f32 %v5690_v44, %v5794_v37  ;;  %v2195_v45 = vmul.f32 %v5694_v5, %v5798_v39 }
 0x165   : > { %v903_v54 = vmul.f32 %v5584_v14, %v869_v33  ;;  %v1167_v34 = vmax.f32 %v1135_v55, 0.0  ;;  %v1433_v56 = vadd.f32 %v5687_v6, %v1399_v12  ;;  %v1697_v2 = vadd.f32 %v1665_v62, %v1631_v41  ;;  %v5880_v55 = vld [vmem:[%s4393_s24 + $0x170] sm:$0xff] }
 0x166   : > { %v1929_v52 = vadd.f32 %v1897_v0, %v1863_v61  ;;  %v2227_v22 = vadd.f32 %v2195_v45, %v2161_v36  ;;  %v2261_v29 = vmul.f32 %v5698_v43, %v5810_v28  ;;  %v2459_v11 = vmul.f32 %v5789_v35, %v5794_v37  ;;  %v5887_v0 = vld [vmem:[%s4393_s24 + $0x178] sm:$0xff] }
 0x167   : > { %v935_v30 = vadd.f32 %v903_v54, %v637_v19  ;;  %v1201_v5 = vmul.f32 %v5594_v59, %v1167_v34  ;;  %v1465_v44 = vmax.f32 %v1433_v56, 0.0  ;;  %v1731_v33 = vadd.f32 %v5708_v9, %v1697_v2 }
 0x168   : > { %v1995_v12 = vadd.f32 %v1963_v38, %v1929_v52  ;;  %v2293_v62 = vadd.f32 %v2261_v29, %v2227_v22  ;;  %v2493_v61 = vmul.f32 %v5801_v10, %v5798_v39  ;;  %v2559_v41 = vmul.f32 %v5805_v25, %v5810_v28 }
 0x169   : > { %v1233_v37 = vadd.f32 %v1201_v5, %v935_v30  ;;  %v1499_v19 = vmul.f32 %v5719_v20, %v1465_v44  ;;  %v1763_v36 = vmax.f32 %v1731_v33, 0.0  ;;  %v407_v45 = vmul.f32 %v5518_v51, %v5875_v26 }
 0x16a   : > { %v2029_v54 = vadd.f32 %v5726_v18, %v1995_v12  ;;  %v2327_v38 = vadd.f32 %v5729_v24, %v2293_v62  ;;  %v2525_v34 = vadd.f32 %v2493_v61, %v2459_v11  ;;  %v441_v39 = vmul.f32 %v5524_v58, %v5880_v55 }
 0x16b   : > { %v1531_v56 = vadd.f32 %v1499_v19, %v1233_v37  ;;  %v1797_v28 = vmul.f32 %v5738_v13, %v1763_v36  ;;  %v507_v5 = vmul.f32 %v5529_v42, %v5887_v0  ;;  %v673_v44 = vmul.f32 %v5618_v48, %v5875_v26 }
 0x16c   : > { %v2061_v2 = vmax.f32 %v2029_v54, 0.0  ;;  %v2359_v52 = vmax.f32 %v2327_v38, 0.0  ;;  %v2591_v22 = vadd.f32 %v2559_v41, %v2525_v34  ;;  %v473_v29 = vadd.f32 %v441_v39, %v407_v45 }
 0x16d   : > { %v1829_v30 = vadd.f32 %v1797_v28, %v1531_v56  ;;  %v707_v11 = vmul.f32 %v5622_v7, %v5880_v55  ;;  %v773_v33 = vmul.f32 %v5627_v23, %v5887_v0  ;;  %v971_v12 = vmul.f32 %v5631_v46, %v5875_v26 }
 0x16e   : > { %v2095_v62 = vmul.f32 %v5745_v16, %v2061_v2  ;;  %v2393_v61 = vmul.f32 %v5751_v47, %v2359_v52  ;;  %v2625_v37 = vadd.f32 %v5831_v1, %v2591_v22  ;;  %v539_v19 = vadd.f32 %v507_v5, %v473_v29 }
 0x16f   : > { %v739_v36 = vadd.f32 %v707_v11, %v673_v44  ;;  %v1005_v41 = vmul.f32 %v5637_v17, %v5880_v55  ;;  %v1071_v45 = vmul.f32 %v5641_v32, %v5887_v0  ;;  %v1269_v54 = vmul.f32 %v5645_v8, %v5875_v26 }
 0x170   : > { %v2127_v38 = vadd.f32 %v2095_v62, %v1829_v30  ;;  %v2657_v34 = vmax.f32 %v2625_v37, 0.0  ;;  %v573_v39 = vadd.f32 %v5550_v60, %v539_v19  ;;  %v1303_v56 = vmul.f32 %v5650_v4, %v5880_v55 }
 0x171   : > { %v805_v28 = vadd.f32 %v773_v33, %v739_v36  ;;  %v1037_v2 = vadd.f32 %v1005_v41, %v971_v12  ;;  %v1369_v5 = vmul.f32 %v5654_v27, %v5887_v0  ;;  %v1567_v44 = vmul.f32 %v5658_v57, %v5875_v26 }
 0x172   : > { %v2425_v52 = vadd.f32 %v2393_v61, %v2127_v38  ;;  %v2691_v22 = vmul.f32 %v5846_v53, %v2657_v34  ;;  %v605_v29 = vmax.f32 %v573_v39, 0.0  ;;  %v1335_v11 = vadd.f32 %v1303_v56, %v1269_v54  ;;  %v7417_v56 = vld [vmem:[#allocation23_spill] sm:$0xff] }
 0x173   : > { %v839_v30 = vadd.f32 %v5560_v3, %v805_v28  ;;  %v1103_v62 = vadd.f32 %v1071_v45, %v1037_v2  ;;  %v1601_v37 = vmul.f32 %v5664_v31, %v5880_v55  ;;  %v1667_v33 = vmul.f32 %v5668_v15, %v5887_v0  ;;  %v7418_v2 = vld [vmem:[#allocation17_spill] sm:$0xff] }
 0x174   : > { %v2723_v12 = vadd.f32 %v2691_v22, %v2425_v52  ;;  %v639_v19 = vmul.f32 %v5567_v40, %v605_v29  ;;  %v1401_v36 = vadd.f32 %v1369_v5, %v1335_v11  ;;  %v1865_v61 = vmul.f32 %v5672_v50, %v5875_v26 }
 0x175   : > { %v871_v41 = vmax.f32 %v839_v30, 0.0  ;;  %v1137_v38 = vadd.f32 %v5572_v21, %v1103_v62  ;;  %v1633_v54 = vadd.f32 %v1601_v37, %v1567_v44  ;;  %v1899_v45 = vmul.f32 %v5678_v49, %v5880_v55 }
 0x176   : > { %2768 = vadd.xlane.f32.xlu1 %v2723_v12  ;;  %v1435_v34 = vadd.f32 %v5687_v6, %v1401_v36  ;;  %v1965_v39 = vmul.f32 %v5682_v63, %v5887_v0  ;;  %v2163_v28 = vmul.f32 %v7417_v56, %v5875_v26  ;;  %v2197_v5 = vmul.f32 %v7418_v2, %v5880_v55  ;;  %v5948_v12 = vld [vmem:[%s4393_s24 + $0x228] sm:$0xff] }
 0x177   : > { %v905_v52 = vmul.f32 %v5584_v14, %v871_v41  ;;  %v1169_v44 = vmax.f32 %v1137_v38, 0.0  ;;  %v1699_v22 = vadd.f32 %v1667_v33, %v1633_v54  ;;  %v1931_v29 = vadd.f32 %v1899_v45, %v1865_v61  ;;  %v5953_v41 = vld [vmem:[%s4393_s24 + $0x230] sm:$0xff]  ;;  %v5956_v33 = vld [vmem:[%s4393_s24 + $0x238] sm:$0xff] }
 0x178   : > { %v1467_v11 = vmax.f32 %v1435_v34, 0.0  ;;  %v2229_v30 = vadd.f32 %v2197_v5, %v2163_v28  ;;  %v2263_v62 = vmul.f32 %v5698_v43, %v5887_v0  ;;  %v2461_v37 = vmul.f32 %v5789_v35, %v5875_v26 }
 0x179   : > { %v937_v36 = vadd.f32 %v905_v52, %v639_v19  ;;  %v1203_v56 = vmul.f32 %v5594_v59, %v1169_v44  ;;  %v1733_v2 = vadd.f32 %v5708_v9, %v1699_v22  ;;  %v1997_v6 = vadd.f32 %v1965_v39, %v1931_v29 }
 0x17a   : > { %v1501_v61 = vmul.f32 %v5719_v20, %v1467_v11  ;;  %v2295_v38 = vadd.f32 %v2263_v62, %v2229_v30  ;;  %v2495_v54 = vmul.f32 %v5801_v10, %v5880_v55  ;;  %v2561_v26 = vmul.f32 %v5805_v25, %v5887_v0 }
 0x17b   : > { %v1235_v45 = vadd.f32 %v1203_v56, %v937_v36  ;;  %v1765_v19 = vmax.f32 %v1733_v2, 0.0  ;;  %v2031_v34 = vadd.f32 %v5726_v18, %v1997_v6  ;;  %v415_v39 = vmul.f32 %v5518_v51, %v5948_v12 }
 0x17c   : > { %v2329_v28 = vadd.f32 %v5729_v24, %v2295_v38  ;;  %v2527_v5 = vadd.f32 %v2495_v54, %v2461_v37  ;;  %v449_v52 = vmul.f32 %v5524_v58, %v5953_v41  ;;  %v515_v44 = vmul.f32 %v5529_v42, %v5956_v33 }
 0x17d   : > { %v1533_v55 = vadd.f32 %v1501_v61, %v1235_v45  ;;  %v1799_v22 = vmul.f32 %v5738_v13, %v1765_v19  ;;  %v2063_v0 = vmax.f32 %v2031_v34, 0.0  ;;  %v681_v56 = vmul.f32 %v5618_v48, %v5948_v12 }
 0x17e   : > { %v2361_v6 = vmax.f32 %v2329_v28, 0.0  ;;  %v2593_v2 = vadd.f32 %v2561_v26, %v2527_v5  ;;  %v481_v29 = vadd.f32 %v449_v52, %v415_v39  ;;  %v715_v11 = vmul.f32 %v5622_v7, %v5953_v41 }
 0x17f   : > { %v1831_v30 = vadd.f32 %v1799_v22, %v1533_v55  ;;  %v2097_v62 = vmul.f32 %v5745_v16, %v2063_v0  ;;  %v781_v37 = vmul.f32 %v5627_v23, %v5956_v33  ;;  %v979_v36 = vmul.f32 %v5631_v46, %v5948_v12 }
 0x180   : > { %v2395_v61 = vmul.f32 %v5751_v47, %v2361_v6  ;;  %v2627_v38 = vadd.f32 %v5831_v1, %v2593_v2  ;;  %v547_v54 = vadd.f32 %v515_v44, %v481_v29  ;;  %v747_v45 = vadd.f32 %v715_v11, %v681_v56 }
 0x181   : > { %v2129_v26 = vadd.f32 %v2097_v62, %v1831_v30  ;;  %v1013_v19 = vmul.f32 %v5637_v17, %v5953_v41  ;;  %v1079_v34 = vmul.f32 %v5641_v32, %v5956_v33  ;;  %v1277_v39 = vmul.f32 %v5645_v8, %v5948_v12 }
 0x182   : > { %v2659_v28 = vmax.f32 %v2627_v38, 0.0  ;;  %v581_v5 = vadd.f32 %v5550_v60, %v547_v54  ;;  %v813_v52 = vadd.f32 %v781_v37, %v747_v45  ;;  %v1311_v55 = vmul.f32 %v5650_v4, %v5953_v41 }
 0x183   : > { %v2427_v22 = vadd.f32 %v2395_v61, %v2129_v26  ;;  %v1045_v44 = vadd.f32 %v1013_v19, %v979_v36  ;;  %v1377_v0 = vmul.f32 %v5654_v27, %v5956_v33  ;;  %v1575_v56 = vmul.f32 %v5658_v57, %v5948_v12 }
 0x184   : > { %v2693_v6 = vmul.f32 %v5846_v53, %v2659_v28  ;;  %v613_v2 = vmax.f32 %v581_v5, 0.0  ;;  %v847_v29 = vadd.f32 %v5560_v3, %v813_v52  ;;  %v1343_v11 = vadd.f32 %v1311_v55, %v1277_v39  ;;  %v7419_v5 = vld [vmem:[#allocation22_spill] sm:$0xff]  ;;  %v7420_v55 = vld [vmem:[#allocation23_spill] sm:$0xff] }
 0x185   : > { %v1111_v30 = vadd.f32 %v1079_v34, %v1045_v44  ;;  %v1609_v62 = vmul.f32 %v5664_v31, %v5953_v41  ;;  %v1675_v37 = vmul.f32 %v5668_v15, %v5956_v33  ;;  %v1873_v36 = vmul.f32 %v5672_v50, %v5948_v12  ;;  %v7421_v44 = vld [vmem:[#allocation17_spill] sm:$0xff] }
 0x186   : > { %v2725_v61 = vadd.f32 %v2693_v6, %v2427_v22  ;;  %v647_v38 = vmul.f32 %v5567_v40, %v613_v2  ;;  %v879_v54 = vmax.f32 %v847_v29, 0.0  ;;  %v1409_v45 = vadd.f32 %v1377_v0, %v1343_v11  ;;  %v6019_v11 = vld [vmem:[%s4393_s24 + $0x180] sm:$0xff] }
 0x187   : > { %v1145_v26 = vadd.f32 %v5572_v21, %v1111_v30  ;;  %v1641_v19 = vadd.f32 %v1609_v62, %v1575_v56  ;;  %v1907_v34 = vmul.f32 %v5678_v49, %v5953_v41  ;;  %v1973_v39 = vmul.f32 %v5682_v63, %v5956_v33 }
 0x188   : > { %2772 = vadd.xlane.f32.xlu0 %v2725_v61  ;;  %v913_v28 = vmul.f32 %v5584_v14, %v879_v54  ;;  %v1443_v52 = vadd.f32 %v7419_v5, %v1409_v45  ;;  %v2171_v22 = vmul.f32 %v7420_v55, %v5948_v12  ;;  %v2205_v0 = vmul.f32 %v7421_v44, %v5953_v41 }
 0x189   : > { %v1177_v56 = vmax.f32 %v1145_v26, 0.0  ;;  %v1707_v6 = vadd.f32 %v1675_v37, %v1641_v19  ;;  %v1939_v2 = vadd.f32 %v1907_v34, %v1873_v36  ;;  %v2271_v29 = vmul.f32 %v5698_v43, %v5956_v33  ;;  %v6028_v36 = vld [vmem:[%s4393_s24 + $0x188] sm:$0xff]  ;;  %v6031_v26 = vld [vmem:[%s4393_s24 + $0x190] sm:$0xff] }
 0x18a   : > { %v945_v30 = vadd.f32 %v913_v28, %v647_v38  ;;  %v1475_v62 = vmax.f32 %v1443_v52, 0.0  ;;  %v2237_v61 = vadd.f32 %v2205_v0, %v2171_v22  ;;  %v2469_v54 = vmul.f32 %v5789_v35, %v5948_v12 }
 0x18b   : > { %v1211_v45 = vmul.f32 %v5594_v59, %v1177_v56  ;;  %v1741_v5 = vadd.f32 %v5708_v9, %v1707_v6  ;;  %v2005_v14 = vadd.f32 %v1973_v39, %v1939_v2  ;;  %v2503_v37 = vmul.f32 %v5801_v10, %v5953_v41 }
 0x18c   : > { %v1509_v19 = vmul.f32 %v5719_v20, %v1475_v62  ;;  %v2303_v38 = vadd.f32 %v2271_v29, %v2237_v61  ;;  %v2569_v34 = vmul.f32 %v5805_v25, %v5956_v33  ;;  %v408_v12 = vmul.f32 %v5518_v51, %v6019_v11 }
 0x18d   : > { %v1243_v28 = vadd.f32 %v1211_v45, %v945_v30  ;;  %v1773_v52 = vmax.f32 %v1741_v5, 0.0  ;;  %v2039_v39 = vadd.f32 %v5726_v18, %v2005_v14  ;;  %v2535_v22 = vadd.f32 %v2503_v37, %v2469_v54 }
 0x18e   : > { %v2337_v41 = vadd.f32 %v5729_v24, %v2303_v38  ;;  %v442_v0 = vmul.f32 %v5524_v58, %v6028_v36  ;;  %v508_v56 = vmul.f32 %v5529_v42, %v6031_v26  ;;  %v674_v6 = vmul.f32 %v5618_v48, %v6019_v11 }
 0x18f   : > { %v1541_v33 = vadd.f32 %v1509_v19, %v1243_v28  ;;  %v1807_v2 = vmul.f32 %v5738_v13, %v1773_v52  ;;  %v2071_v51 = vmax.f32 %v2039_v39, 0.0  ;;  %v2601_v29 = vadd.f32 %v2569_v34, %v2535_v22 }
 0x190   : > { %v2369_v5 = vmax.f32 %v2337_v41, 0.0  ;;  %v474_v30 = vadd.f32 %v442_v0, %v408_v12  ;;  %v708_v14 = vmul.f32 %v5622_v7, %v6028_v36  ;;  %v774_v62 = vmul.f32 %v5627_v23, %v6031_v26 }
 0x191   : > { %v1839_v58 = vadd.f32 %v1807_v2, %v1541_v33  ;;  %v2105_v61 = vmul.f32 %v5745_v16, %v2071_v51  ;;  %v2635_v42 = vadd.f32 %v5831_v1, %v2601_v29  ;;  %v972_v54 = vmul.f32 %v5631_v46, %v6019_v11 }
 0x192   : > { %v2403_v45 = vmul.f32 %v5751_v47, %v2369_v5  ;;  %v540_v37 = vadd.f32 %v508_v56, %v474_v30  ;;  %v740_v19 = vadd.f32 %v708_v14, %v674_v6  ;;  %v1006_v38 = vmul.f32 %v5637_v17, %v6028_v36 }
 0x193   : > { %v2137_v34 = vadd.f32 %v2105_v61, %v1839_v58  ;;  %v2667_v12 = vmax.f32 %v2635_v42, 0.0  ;;  %v1072_v28 = vmul.f32 %v5641_v32, %v6031_v26  ;;  %v1270_v52 = vmul.f32 %v5645_v8, %v6019_v11 }
 0x194   : > { %v574_v39 = vadd.f32 %v5550_v60, %v540_v37  ;;  %v806_v22 = vadd.f32 %v774_v62, %v740_v19  ;;  %v1038_v41 = vadd.f32 %v1006_v38, %v972_v54  ;;  %v1304_v0 = vmul.f32 %v5650_v4, %v6028_v36 }
 0x195   : > { %v2435_v56 = vadd.f32 %v2403_v45, %v2137_v34  ;;  %v2701_v6 = vmul.f32 %v5846_v53, %v2667_v12  ;;  %v1370_v33 = vmul.f32 %v5654_v27, %v6031_v26  ;;  %v1568_v2 = vmul.f32 %v5658_v57, %v6019_v11  ;;  %v7422_v34 = vld [vmem:[#allocation20_spill] sm:$0xff] }
 0x196   : > { %v606_v51 = vmax.f32 %v574_v39, 0.0  ;;  %v840_v29 = vadd.f32 %v5560_v3, %v806_v22  ;;  %v1104_v5 = vadd.f32 %v1072_v28, %v1038_v41  ;;  %v1336_v30 = vadd.f32 %v1304_v0, %v1270_v52  ;;  %v7423_v28 = vld [vmem:[#allocation22_spill] sm:$0xff] }
 0x197   : > { %v2733_v60 = vadd.f32 %v2701_v6, %v2435_v56  ;;  %v1602_v14 = vmul.f32 %v5664_v31, %v6028_v36  ;;  %v1668_v62 = vmul.f32 %v5668_v15, %v6031_v26  ;;  %v1866_v58 = vmul.f32 %v5672_v50, %v6019_v11  ;;  %v6094_v56 = vld [vmem:[%s4393_s24 + $0x1b0] sm:$0xff] }
 0x198   : > { %v640_v61 = vmul.f32 %v5567_v40, %v606_v51  ;;  %v872_v42 = vmax.f32 %v840_v29, 0.0  ;;  %v1138_v54 = vadd.f32 %v5572_v21, %v1104_v5  ;;  %v1402_v45 = vadd.f32 %v1370_v33, %v1336_v30  ;;  %v6098_v29 = vld [vmem:[%s4393_s24 + $0x1b8] sm:$0xff] }
 0x199   : > { %2788 = vadd.xlane.f32.xlu2 %v2733_v60  ;;  %v1634_v3 = vadd.f32 %v1602_v14, %v1568_v2  ;;  %v1900_v37 = vmul.f32 %v5678_v49, %v6028_v36  ;;  %v1966_v19 = vmul.f32 %v5682_v63, %v6031_v26  ;;  %v2164_v38 = vmul.f32 %v7420_v55, %v6019_v11 }
 0x19a   : > { %v906_v12 = vmul.f32 %v7422_v34, %v872_v42  ;;  %v1170_v40 = vmax.f32 %v1138_v54, 0.0  ;;  %v1436_v52 = vadd.f32 %v7423_v28, %v1402_v45  ;;  %v2198_v21 = vmul.f32 %v7421_v44, %v6028_v36 }
 0x19b   : > { %v1700_v39 = vadd.f32 %v1668_v62, %v1634_v3  ;;  %v1932_v22 = vadd.f32 %v1900_v37, %v1866_v58  ;;  %v2264_v41 = vmul.f32 %v5698_v43, %v6031_v26  ;;  %v2462_v0 = vmul.f32 %v5789_v35, %v6019_v11  ;;  %v6106_v62 = vld [vmem:[%s4393_s24 + $0x1c0] sm:$0xff] }
 0x19c   : > { %v938_v6 = vadd.f32 %v906_v12, %v640_v61  ;;  %v1204_v33 = vmul.f32 %v5594_v59, %v1170_v40  ;;  %v1468_v2 = vmax.f32 %v1436_v52, 0.0  ;;  %v2230_v51 = vadd.f32 %v2198_v21, %v2164_v38  ;;  %v6109_v59 = vld [vmem:[#allocation6] ss:$0 sm:$0xff]  ;;  %v6114_v37 = vld [vmem:[#allocation6 + $0x1] ss:$0 sm:$0xff] }
 0x19d   : > { %v1734_v5 = vadd.f32 %v5708_v9, %v1700_v39  ;;  %v1998_v30 = vadd.f32 %v1966_v19, %v1932_v22  ;;  %v2496_v60 = vmul.f32 %v5801_v10, %v6028_v36  ;;  %v2562_v14 = vmul.f32 %v5805_v25, %v6031_v26  ;;  %v6119_v38 = vld [vmem:[#allocation6 + $0x2] ss:$0 sm:$0xff] }
 0x19e   : > { %v1236_v11 = vadd.f32 %v1204_v33, %v938_v6  ;;  %v1502_v58 = vmul.f32 %v5719_v20, %v1468_v2  ;;  %v2296_v61 = vadd.f32 %v2264_v41, %v2230_v51  ;;  %v410_v42 = vmul.f32 %v6109_v59, %v6094_v56 }
 0x19f   : > { %v1766_v54 = vmax.f32 %v1734_v5, 0.0  ;;  %v2032_v45 = vadd.f32 %v5726_v18, %v1998_v30  ;;  %v2528_v3 = vadd.f32 %v2496_v60, %v2462_v0  ;;  %v444_v36 = vmul.f32 %v6114_v37, %v6098_v29 }
 0x1a0   : > { %v1534_v26 = vadd.f32 %v1502_v58, %v1236_v11  ;;  %v2330_v19 = vadd.f32 %v5729_v24, %v2296_v61  ;;  %v510_v34 = vmul.f32 %v6119_v38, %v6106_v62  ;;  %v676_v12 = vmul.f32 %v5618_v48, %v6094_v56  ;;  %v6139_v11 = vld [vmem:[#allocation8] ss:$0 sm:$0xff] }
 0x1a1   : > { %v1800_v40 = vmul.f32 %v5738_v13, %v1766_v54  ;;  %v2064_v52 = vmax.f32 %v2032_v45, 0.0  ;;  %v2594_v21 = vadd.f32 %v2562_v14, %v2528_v3  ;;  %v476_v39 = vadd.f32 %v444_v36, %v410_v42 }
 0x1a2   : > { %v2362_v22 = vmax.f32 %v2330_v19, 0.0  ;;  %v710_v41 = vmul.f32 %v5622_v7, %v6098_v29  ;;  %v776_v0 = vmul.f32 %v5627_v23, %v6106_v62  ;;  %v974_v6 = vmul.f32 %v5631_v46, %v6094_v56 }
 0x1a3   : > { %v1832_v33 = vadd.f32 %v1800_v40, %v1534_v26  ;;  %v2098_v2 = vmul.f32 %v5745_v16, %v2064_v52  ;;  %v2628_v48 = vadd.f32 %v5831_v1, %v2594_v21  ;;  %v542_v51 = vadd.f32 %v510_v34, %v476_v39  ;;  %v6151_v26 = vld [vmem:[#allocation8 + $0x1] ss:$0 sm:$0xff]  ;;  %v6156_v40 = vld [vmem:[#allocation9] ss:$0 sm:$0xff]  ;;  %v6163_v39 = vld [vmem:[#allocation8 + $0x2] ss:$0 sm:$0xff] }
 0x1a4   : > { %v2396_v5 = vmul.f32 %v5751_v47, %v2362_v22  ;;  %v742_v30 = vadd.f32 %v710_v41, %v676_v12  ;;  %v1008_v60 = vmul.f32 %v5637_v17, %v6098_v29  ;;  %v1074_v7 = vmul.f32 %v5641_v32, %v6106_v62 }
 0x1a5   : > { %v2130_v14 = vadd.f32 %v2098_v2, %v1832_v33  ;;  %v2660_v23 = vmax.f32 %v2628_v48, 0.0  ;;  %v576_v46 = vadd.f32 %v6139_v11, %v542_v51  ;;  %v1272_v58 = vmul.f32 %v5645_v8, %v6094_v56  ;;  %v6174_v33 = vld [vmem:[#allocation9 + $0x1] ss:$0 sm:$0xff] }
 0x1a6   : > { %v808_v61 = vadd.f32 %v776_v0, %v742_v30  ;;  %v1040_v42 = vadd.f32 %v1008_v60, %v974_v6  ;;  %v1306_v54 = vmul.f32 %v5650_v4, %v6098_v29  ;;  %v1372_v17 = vmul.f32 %v5654_v27, %v6106_v62  ;;  %7424 = vst [vmem:[#allocation18_spill] sm:$0xff] %v6174_v33  ;;  %v6183_v60 = vld [vmem:[%s4393_s24 + $0x270] sm:$0xff] }
 0x1a7   : > { %v2428_v45 = vadd.f32 %v2396_v5, %v2130_v14  ;;  %v2694_v32 = vmul.f32 %v5846_v53, %v2660_v23  ;;  %v608_v3 = vmax.f32 %v576_v46, 0.0  ;;  %v1570_v36 = vmul.f32 %v5658_v57, %v6094_v56  ;;  %v6190_v46 = vld [vmem:[%s4393_s24 + $0x278] sm:$0xff] }
 0x1a8   : > { %v842_v19 = vadd.f32 %v6151_v26, %v808_v61  ;;  %v1106_v8 = vadd.f32 %v1074_v7, %v1040_v42  ;;  %v1338_v34 = vadd.f32 %v1306_v54, %v1272_v58  ;;  %v1604_v12 = vmul.f32 %v5664_v31, %v6098_v29  ;;  %v6185_v7 = vld [vmem:[#allocation9 + $0x2] ss:$0 sm:$0xff] }
 0x1a9   : > { %v2726_v4 = vadd.f32 %v2694_v32, %v2428_v45  ;;  %v642_v27 = vmul.f32 %v6156_v40, %v608_v3  ;;  %v1670_v52 = vmul.f32 %v5668_v15, %v6106_v62  ;;  %v1868_v57 = vmul.f32 %v5672_v50, %v6094_v56  ;;  %v6197_v42 = vld [vmem:[%s4393_s24 + $0x280] sm:$0xff] }
 0x1aa   : > { %v874_v21 = vmax.f32 %v842_v19, 0.0  ;;  %v1140_v22 = vadd.f32 %v6163_v39, %v1106_v8  ;;  %v1404_v41 = vadd.f32 %v1372_v17, %v1338_v34  ;;  %v1636_v0 = vadd.f32 %v1604_v12, %v1570_v36  ;;  %v6209_v34 = vld [vmem:[#allocation6 + $0x3] ss:$0 sm:$0xff] }
 0x1ab   : > { %2774 = vadd.xlane.f32.xlu1 %v2726_v4  ;;  %v1902_v31 = vmul.f32 %v5678_v49, %v6098_v29  ;;  %v1968_v6 = vmul.f32 %v5682_v63, %v6106_v62  ;;  %v2166_v15 = vmul.f32 %v7420_v55, %v6094_v56  ;;  %v2200_v50 = vmul.f32 %v7421_v44, %v6098_v29 }
 0x1ac   : > { %v908_v2 = vmul.f32 %v6174_v33, %v874_v21  ;;  %v1172_v48 = vmax.f32 %v1140_v22, 0.0  ;;  %v1438_v51 = vadd.f32 %v7423_v28, %v1404_v41  ;;  %v1702_v5 = vadd.f32 %v1670_v52, %v1636_v0  ;;  %v6213_v52 = vld [vmem:[#allocation6 + $0x4] ss:$0 sm:$0xff]  ;;  %v6217_v21 = vld [vmem:[#allocation6 + $0x5] ss:$0 sm:$0xff] }
 0x1ad   : > { %v1934_v49 = vadd.f32 %v1902_v31, %v1868_v57  ;;  %v2232_v30 = vadd.f32 %v2200_v50, %v2166_v15  ;;  %v2266_v63 = vmul.f32 %v5698_v43, %v6106_v62  ;;  %v2464_v55 = vmul.f32 %v5789_v35, %v6094_v56  ;;  %v6221_v22 = vld [vmem:[#allocation6 + $0x6] ss:$0 sm:$0xff] }
 0x1ae   : > { %v940_v44 = vadd.f32 %v908_v2, %v642_v27  ;;  %v1206_v14 = vmul.f32 %v6185_v7, %v1172_v48  ;;  %v1470_v23 = vmax.f32 %v1438_v51, 0.0  ;;  %v1736_v28 = vadd.f32 %v5708_v9, %v1702_v5  ;;  %v6228_v2 = vld [vmem:[#allocation6 + $0x7] ss:$0 sm:$0xff]  ;;  %v6232_v51 = vld [vmem:[#allocation6 + $0x8] ss:$0 sm:$0xff] }
 0x1af   : > { %v2000_v58 = vadd.f32 %v1968_v6, %v1934_v49  ;;  %v2298_v61 = vadd.f32 %v2266_v63, %v2232_v30  ;;  %v2498_v43 = vmul.f32 %v5801_v10, %v6098_v29  ;;  %v2564_v56 = vmul.f32 %v5805_v25, %v6106_v62  ;;  %v6236_v49 = vld [vmem:[#allocation6 + $0x9] ss:$0 sm:$0xff] }
 0x1b0   : > { %v1238_v54 = vadd.f32 %v1206_v14, %v940_v44  ;;  %v1504_v17 = vmul.f32 %v5719_v20, %v1470_v23  ;;  %v1768_v45 = vmax.f32 %v1736_v28, 0.0  ;;  %v418_v32 = vmul.f32 %v6109_v59, %v6183_v60  ;;  %v6245_v28 = vld [vmem:[#allocation6 + $0xb] ss:$0 sm:$0xff] }
 0x1b1   : > { %v2034_v9 = vadd.f32 %v5726_v18, %v2000_v58  ;;  %v2332_v3 = vadd.f32 %v5729_v24, %v2298_v61  ;;  %v2530_v36 = vadd.f32 %v2498_v43, %v2464_v55  ;;  %v452_v29 = vmul.f32 %v6114_v37, %v6190_v46  ;;  %v6241_v55 = vld [vmem:[#allocation6 + $0xa] ss:$0 sm:$0xff]  ;;  %v6249_v61 = vld [vmem:[#allocation6 + $0xc] ss:$0 sm:$0xff] }
 0x1b2   : > { %v1536_v19 = vadd.f32 %v1504_v17, %v1238_v54  ;;  %v1802_v62 = vmul.f32 %v5738_v13, %v1768_v45  ;;  %v518_v8 = vmul.f32 %v6119_v38, %v6197_v42  ;;  %v684_v20 = vmul.f32 %v6209_v34, %v6183_v60 }
 0x1b3   : > { %v2066_v12 = vmax.f32 %v2034_v9, 0.0  ;;  %v2364_v4 = vmax.f32 %v2332_v3, 0.0  ;;  %v2596_v18 = vadd.f32 %v2564_v56, %v2530_v36  ;;  %v484_v27 = vadd.f32 %v452_v29, %v418_v32  ;;  %v6255_v3 = vld [vmem:[#allocation6 + $0xd] ss:$0 sm:$0xff]  ;;  %v6259_v29 = vld [vmem:[#allocation6 + $0xe] ss:$0 sm:$0xff] }
 0x1b4   : > { %v1834_v24 = vadd.f32 %v1802_v62, %v1536_v19  ;;  %v718_v57 = vmul.f32 %v6213_v52, %v6190_v46  ;;  %v784_v13 = vmul.f32 %v6217_v21, %v6197_v42  ;;  %v982_v41 = vmul.f32 %v6221_v22, %v6183_v60 }
 0x1b5   : > { %v2100_v0 = vmul.f32 %v5745_v16, %v2066_v12  ;;  %v2398_v31 = vmul.f32 %v5751_v47, %v2364_v4  ;;  %v2630_v6 = vadd.f32 %v5831_v1, %v2596_v18  ;;  %v550_v15 = vadd.f32 %v518_v8, %v484_v27  ;;  %v6264_v12 = vld [vmem:[#allocation6 + $0xf] ss:$0 sm:$0xff] }
 0x1b6   : > { %v750_v50 = vadd.f32 %v718_v57, %v684_v20  ;;  %v1016_v48 = vmul.f32 %v6228_v2, %v6190_v46  ;;  %v1082_v5 = vmul.f32 %v6232_v51, %v6197_v42  ;;  %v1280_v16 = vmul.f32 %v6236_v49, %v6183_v60  ;;  %v6269_v57 = vld [vmem:[#allocation6 + $0x10] ss:$0 sm:$0xff] }
 0x1b7   : > { %v2132_v47 = vadd.f32 %v2100_v0, %v1834_v24  ;;  %v2662_v30 = vmax.f32 %v2630_v6, 0.0  ;;  %v584_v63 = vadd.f32 %v6139_v11, %v550_v15  ;;  %v1314_v44 = vmul.f32 %v6241_v55, %v6190_v46  ;;  %v6280_v15 = vld [vmem:[#allocation6 + $0x12] ss:$0 sm:$0xff] }
 0x1b8   : > { %v816_v14 = vadd.f32 %v784_v13, %v750_v50  ;;  %v1048_v23 = vadd.f32 %v1016_v48, %v982_v41  ;;  %v1380_v58 = vmul.f32 %v6245_v28, %v6197_v42  ;;  %v1578_v43 = vmul.f32 %v6249_v61, %v6183_v60  ;;  %v6273_v41 = vld [vmem:[#allocation8 + $0x3] ss:$0 sm:$0xff]  ;;  %7426 = vst [vmem:[#allocation16_spill] sm:$0xff] %v6280_v15  ;;  %v6284_v48 = vld [vmem:[#allocation6 + $0x13] ss:$0 sm:$0xff] }
 0x1b9   : > { %v2430_v56 = vadd.f32 %v2398_v31, %v2132_v47  ;;  %v2696_v54 = vmul.f32 %v5846_v53, %v2662_v30  ;;  %v616_v17 = vmax.f32 %v584_v63, 0.0  ;;  %v1346_v45 = vadd.f32 %v1314_v44, %v1280_v16  ;;  %7425 = vst [vmem:[#allocation19_spill] sm:$0xff] %v6273_v41  ;;  %v6276_v31 = vld [vmem:[#allocation6 + $0x11] ss:$0 sm:$0xff] }
 0x1ba   : > { %v850_v32 = vadd.f32 %v6151_v26, %v816_v14  ;;  %v1114_v9 = vadd.f32 %v1082_v5, %v1048_v23  ;;  %v1612_v36 = vmul.f32 %v6255_v3, %v6190_v46  ;;  %v1678_v19 = vmul.f32 %v6259_v29, %v6197_v42  ;;  %7427 = vst [vmem:[#allocation21_spill] sm:$0xff] %v6284_v48  ;;  %v6289_v23 = vld [vmem:[#allocation6 + $0x14] ss:$0 sm:$0xff] }
 0x1bb   : > { %v2728_v62 = vadd.f32 %v2696_v54, %v2430_v56  ;;  %v650_v8 = vmul.f32 %v6156_v40, %v616_v17  ;;  %v1412_v20 = vadd.f32 %v1380_v58, %v1346_v45  ;;  %v1876_v4 = vmul.f32 %v6264_v12, %v6183_v60  ;;  %v6296_v56 = vld [vmem:[%s4393_s24 + $0x1c8] sm:$0xff]  ;;  %v6299_v45 = vld [vmem:[#allocation8 + $0x4] ss:$0 sm:$0xff] }
 0x1bc   : > { %v882_v18 = vmax.f32 %v850_v32, 0.0  ;;  %v1148_v27 = vadd.f32 %v6163_v39, %v1114_v9  ;;  %v1644_v24 = vadd.f32 %v1612_v36, %v1578_v43  ;;  %v1910_v13 = vmul.f32 %v6269_v57, %v6190_v46  ;;  %v6303_v36 = vld [vmem:[%s4393_s24 + $0x1d0] sm:$0xff] }
 0x1bd   : > { %2778 = vadd.xlane.f32.xlu0 %v2728_v62  ;;  %v1446_v0 = vadd.f32 %v6273_v41, %v1412_v20  ;;  %v1976_v6 = vmul.f32 %v6276_v31, %v6197_v42  ;;  %v2174_v50 = vmul.f32 %v6280_v15, %v6183_v60  ;;  %v2208_v5 = vmul.f32 %v6284_v48, %v6190_v46  ;;  %v6308_v62 = vld [vmem:[#allocation9 + $0x3] ss:$0 sm:$0xff] }
 0x1be   : > { %v916_v16 = vmul.f32 %v6174_v33, %v882_v18  ;;  %v1180_v47 = vmax.f32 %v1148_v27, 0.0  ;;  %v1710_v30 = vadd.f32 %v1678_v19, %v1644_v24  ;;  %v1942_v63 = vadd.f32 %v1910_v13, %v1876_v4  ;;  %v6306_v19 = vld [vmem:[%s4393_s24 + $0x1d8] sm:$0xff] }
 0x1bf   : > { %v1478_v44 = vmax.f32 %v1446_v0, 0.0  ;;  %v2240_v14 = vadd.f32 %v2208_v5, %v2174_v50  ;;  %v2274_v58 = vmul.f32 %v6289_v23, %v6197_v42  ;;  %v2472_v43 = vmul.f32 %v5789_v35, %v6183_v60  ;;  %v6315_v27 = vld [vmem:[#allocation8 + $0x5] ss:$0 sm:$0xff]  ;;  %v6320_v0 = vld [vmem:[#allocation8 + $0x6] ss:$0 sm:$0xff] }
 0x1c0   : > { %v948_v54 = vadd.f32 %v916_v16, %v650_v8  ;;  %v1214_v17 = vmul.f32 %v6185_v7, %v1180_v47  ;;  %v1744_v32 = vadd.f32 %v6299_v45, %v1710_v30  ;;  %v2008_v9 = vadd.f32 %v1976_v6, %v1942_v63 }
 0x1c1   : > { %v1512_v20 = vmul.f32 %v6308_v62, %v1478_v44  ;;  %v2306_v4 = vadd.f32 %v2274_v58, %v2240_v14  ;;  %v2506_v35 = vmul.f32 %v5801_v10, %v6190_v46  ;;  %v2572_v60 = vmul.f32 %v5805_v25, %v6197_v42  ;;  %v6327_v42 = vld [vmem:[#allocation9 + $0x4] ss:$0 sm:$0xff] }
 0x1c2   : > { %v1246_v8 = vadd.f32 %v1214_v17, %v948_v54  ;;  %v1776_v18 = vmax.f32 %v1744_v32, 0.0  ;;  %v2042_v24 = vadd.f32 %v6315_v27, %v2008_v9  ;;  %v411_v13 = vmul.f32 %v6109_v59, %v6296_v56  ;;  %v6341_v9 = vld [vmem:[#allocation9 + $0x6] ss:$0 sm:$0xff] }
 0x1c3   : > { %v2340_v6 = vadd.f32 %v6320_v0, %v2306_v4  ;;  %v2538_v50 = vadd.f32 %v2506_v35, %v2472_v43  ;;  %v445_v10 = vmul.f32 %v6114_v37, %v6303_v36  ;;  %v511_v25 = vmul.f32 %v6119_v38, %v6306_v19  ;;  %v6334_v43 = vld [vmem:[#allocation9 + $0x5] ss:$0 sm:$0xff] }
 0x1c4   : > { %v1544_v46 = vadd.f32 %v1512_v20, %v1246_v8  ;;  %v1810_v5 = vmul.f32 %v6327_v42, %v1776_v18  ;;  %v2074_v16 = vmax.f32 %v2042_v24, 0.0  ;;  %v677_v47 = vmul.f32 %v6209_v34, %v6296_v56 }
 0x1c5   : > { %v2372_v30 = vmax.f32 %v2340_v6, 0.0  ;;  %v2604_v63 = vadd.f32 %v2572_v60, %v2538_v50  ;;  %v477_v44 = vadd.f32 %v445_v10, %v411_v13  ;;  %v711_v14 = vmul.f32 %v6213_v52, %v6303_v36 }
 0x1c6   : > { %v1842_v58 = vadd.f32 %v1810_v5, %v1544_v46  ;;  %v2108_v54 = vmul.f32 %v6334_v43, %v2074_v16  ;;  %v777_v17 = vmul.f32 %v6217_v21, %v6306_v19  ;;  %v975_v32 = vmul.f32 %v6221_v22, %v6296_v56 }
 0x1c7   : > { %v2406_v20 = vmul.f32 %v6341_v9, %v2372_v30  ;;  %v2638_v4 = vadd.f32 %v5831_v1, %v2604_v63  ;;  %v543_v35 = vadd.f32 %v511_v25, %v477_v44  ;;  %v743_v60 = vadd.f32 %v711_v14, %v677_v47 }
 0x1c8   : > { %v2140_v8 = vadd.f32 %v2108_v54, %v1842_v58  ;;  %v1009_v18 = vmul.f32 %v6228_v2, %v6303_v36  ;;  %v1075_v24 = vmul.f32 %v6232_v51, %v6306_v19  ;;  %v1273_v13 = vmul.f32 %v6236_v49, %v6296_v56 }
 0x1c9   : > { %v2670_v6 = vmax.f32 %v2638_v4, 0.0  ;;  %v577_v50 = vadd.f32 %v6139_v11, %v543_v35  ;;  %v809_v10 = vadd.f32 %v777_v17, %v743_v60  ;;  %v1307_v46 = vmul.f32 %v6241_v55, %v6303_v36 }
 0x1ca   : > { %v2438_v1 = vadd.f32 %v2406_v20, %v2140_v8  ;;  %v1041_v25 = vadd.f32 %v1009_v18, %v975_v32  ;;  %v1373_v5 = vmul.f32 %v6245_v28, %v6306_v19  ;;  %v1571_v16 = vmul.f32 %v6249_v61, %v6296_v56 }
 0x1cb   : > { %v2704_v47 = vmul.f32 %v5846_v53, %v2670_v6  ;;  %v609_v30 = vmax.f32 %v577_v50, 0.0  ;;  %v843_v63 = vadd.f32 %v6151_v26, %v809_v10  ;;  %v1339_v44 = vadd.f32 %v1307_v46, %v1273_v13 }
 0x1cc   : > { %v1107_v14 = vadd.f32 %v1075_v24, %v1041_v25  ;;  %v1605_v58 = vmul.f32 %v6255_v3, %v6303_v36  ;;  %v1671_v54 = vmul.f32 %v6259_v29, %v6306_v19  ;;  %v1869_v17 = vmul.f32 %v6264_v12, %v6296_v56 }
 0x1cd   : > { %v2736_v32 = vadd.f32 %v2704_v47, %v2438_v1  ;;  %v643_v20 = vmul.f32 %v6156_v40, %v609_v30  ;;  %v875_v4 = vmax.f32 %v843_v63, 0.0  ;;  %v1405_v53 = vadd.f32 %v1373_v5, %v1339_v44  ;;  %v6381_v5 = vld [vmem:[%s4393_s24 + $0x1f8] sm:$0xff]  ;;  %v6383_v63 = vld [vmem:[#allocation6 + $0x15] ss:$0 sm:$0xff] }
 0x1ce   : > { %v1141_v35 = vadd.f32 %v6163_v39, %v1107_v14  ;;  %v1637_v60 = vadd.f32 %v1605_v58, %v1571_v16  ;;  %v1903_v8 = vmul.f32 %v6269_v57, %v6303_v36  ;;  %v1969_v18 = vmul.f32 %v6276_v31, %v6306_v19 }
 0x1cf   : > { %2794 = vadd.xlane.f32.xlu2 %v2736_v32  ;;  %v909_v24 = vmul.f32 %v6174_v33, %v875_v4  ;;  %v1439_v13 = vadd.f32 %v6273_v41, %v1405_v53  ;;  %v2167_v6 = vmul.f32 %v6280_v15, %v6296_v56  ;;  %v2201_v50 = vmul.f32 %v6284_v48, %v6303_v36  ;;  %v6394_v4 = vld [vmem:[%s4393_s24 + $0x200] sm:$0xff] }
 0x1d0   : > { %v1173_v10 = vmax.f32 %v1141_v35, 0.0  ;;  %v1703_v46 = vadd.f32 %v1671_v54, %v1637_v60  ;;  %v1935_v1 = vadd.f32 %v1903_v8, %v1869_v17  ;;  %v2267_v25 = vmul.f32 %v6289_v23, %v6306_v19  ;;  %v6389_v54 = vld [vmem:[#allocation6 + $0x16] ss:$0 sm:$0xff]  ;;  %v6400_v60 = vld [vmem:[#allocation6 + $0x17] ss:$0 sm:$0xff] }
 0x1d1   : > { %v941_v16 = vadd.f32 %v909_v24, %v643_v20  ;;  %v1471_v47 = vmax.f32 %v1439_v13, 0.0  ;;  %v2233_v30 = vadd.f32 %v2201_v50, %v2167_v6  ;;  %v2465_v44 = vmul.f32 %v6383_v63, %v6296_v56  ;;  %v6397_v20 = vld [vmem:[%s4393_s24 + $0x208] sm:$0xff] }
 0x1d2   : > { %v1207_v14 = vmul.f32 %v6185_v7, %v1173_v10  ;;  %v1737_v58 = vadd.f32 %v6299_v45, %v1703_v46  ;;  %v2001_v32 = vadd.f32 %v1969_v18, %v1935_v1  ;;  %v2499_v17 = vmul.f32 %v6389_v54, %v6303_v36 }
 0x1d3   : > { %v1505_v53 = vmul.f32 %v6308_v62, %v1471_v47  ;;  %v2299_v35 = vadd.f32 %v2267_v25, %v2233_v30  ;;  %v2565_v56 = vmul.f32 %v6400_v60, %v6306_v19  ;;  %v413_v8 = vmul.f32 %v6109_v59, %v6381_v5 }
 0x1d4   : > { %v1239_v18 = vadd.f32 %v1207_v14, %v941_v16  ;;  %v1769_v24 = vmax.f32 %v1737_v58, 0.0  ;;  %v2035_v13 = vadd.f32 %v6315_v27, %v2001_v32  ;;  %v2531_v36 = vadd.f32 %v2499_v17, %v2465_v44  ;;  %v6420_v17 = vld [vmem:[#allocation8 + $0x7] ss:$0 sm:$0xff] }
 0x1d5   : > { %v2333_v6 = vadd.f32 %v6320_v0, %v2299_v35  ;;  %v447_v50 = vmul.f32 %v6114_v37, %v6394_v4  ;;  %v513_v10 = vmul.f32 %v6119_v38, %v6397_v20  ;;  %v679_v46 = vmul.f32 %v6209_v34, %v6381_v5 }
 0x1d6   : > { %v1537_v19 = vadd.f32 %v1505_v53, %v1239_v18  ;;  %v1803_v1 = vmul.f32 %v6327_v42, %v1769_v24  ;;  %v2067_v25 = vmax.f32 %v2035_v13, 0.0  ;;  %v2597_v16 = vadd.f32 %v2565_v56, %v2531_v36 }
 0x1d7   : > { %v2365_v47 = vmax.f32 %v2333_v6, 0.0  ;;  %v479_v30 = vadd.f32 %v447_v50, %v413_v8  ;;  %v713_v44 = vmul.f32 %v6213_v52, %v6394_v4  ;;  %v779_v14 = vmul.f32 %v6217_v21, %v6397_v20 }
 0x1d8   : > { %v1835_v58 = vadd.f32 %v1803_v1, %v1537_v19  ;;  %v2101_v32 = vmul.f32 %v6334_v43, %v2067_v25  ;;  %v2631_v35 = vadd.f32 %v6420_v17, %v2597_v16  ;;  %v977_v53 = vmul.f32 %v6221_v22, %v6381_v5 }
 0x1d9   : > { %v2399_v56 = vmul.f32 %v6341_v9, %v2365_v47  ;;  %v545_v18 = vadd.f32 %v513_v10, %v479_v30  ;;  %v745_v8 = vadd.f32 %v713_v44, %v679_v46  ;;  %v1011_v24 = vmul.f32 %v6228_v2, %v6394_v4  ;;  %v6435_v46 = vld [vmem:[#allocation9 + $0x7] ss:$0 sm:$0xff] }
 0x1da   : > { %v2133_v13 = vadd.f32 %v2101_v32, %v1835_v58  ;;  %v2663_v36 = vmax.f32 %v2631_v35, 0.0  ;;  %v1077_v6 = vmul.f32 %v6232_v51, %v6397_v20  ;;  %v1275_v50 = vmul.f32 %v6236_v49, %v6381_v5 }
 0x1db   : > { %v579_v19 = vadd.f32 %v6139_v11, %v545_v18  ;;  %v811_v1 = vadd.f32 %v779_v14, %v745_v8  ;;  %v1043_v25 = vadd.f32 %v1011_v24, %v977_v53  ;;  %v1309_v16 = vmul.f32 %v6241_v55, %v6394_v4 }
 0x1dc   : > { %v2431_v10 = vadd.f32 %v2399_v56, %v2133_v13  ;;  %v2697_v47 = vmul.f32 %v6435_v46, %v2663_v36  ;;  %v1375_v30 = vmul.f32 %v6245_v28, %v6397_v20  ;;  %v1573_v44 = vmul.f32 %v6249_v61, %v6381_v5 }
 0x1dd   : > { %v611_v58 = vmax.f32 %v579_v19, 0.0  ;;  %v845_v32 = vadd.f32 %v6151_v26, %v811_v1  ;;  %v1109_v35 = vadd.f32 %v1077_v6, %v1043_v25  ;;  %v1341_v14 = vadd.f32 %v1309_v16, %v1275_v50 }
 0x1de   : > { %v2729_v53 = vadd.f32 %v2697_v47, %v2431_v10  ;;  %v1607_v18 = vmul.f32 %v6255_v3, %v6394_v4  ;;  %v1673_v56 = vmul.f32 %v6259_v29, %v6397_v20  ;;  %v1871_v8 = vmul.f32 %v6264_v12, %v6381_v5 }
 0x1df   : > { %v645_v24 = vmul.f32 %v6156_v40, %v611_v58  ;;  %v877_v13 = vmax.f32 %v845_v32, 0.0  ;;  %v1143_v36 = vadd.f32 %v6163_v39, %v1109_v35  ;;  %v1407_v19 = vadd.f32 %v1375_v30, %v1341_v14  ;;  %v6466_v14 = vld [vmem:[%s4393_s24 + $0x2b8] sm:$0xff] }
 0x1e0   : > { %2780 = vadd.xlane.f32.xlu1 %v2729_v53  ;;  %v1639_v6 = vadd.f32 %v1607_v18, %v1573_v44  ;;  %v1905_v50 = vmul.f32 %v6269_v57, %v6394_v4  ;;  %v1971_v1 = vmul.f32 %v6276_v31, %v6397_v20  ;;  %v2169_v25 = vmul.f32 %v6280_v15, %v6381_v5 }
 0x1e1   : > { %v911_v16 = vmul.f32 %v6174_v33, %v877_v13  ;;  %v1175_v10 = vmax.f32 %v1143_v36, 0.0  ;;  %v1441_v47 = vadd.f32 %v6273_v41, %v1407_v19  ;;  %v2203_v30 = vmul.f32 %v6284_v48, %v6394_v4  ;;  %v6470_v19 = vld [vmem:[%s4393_s24 + $0x2c0] sm:$0xff] }
 0x1e2   : > { %v1705_v44 = vadd.f32 %v1673_v56, %v1639_v6  ;;  %v1937_v58 = vadd.f32 %v1905_v50, %v1871_v8  ;;  %v2269_v32 = vmul.f32 %v6289_v23, %v6397_v20  ;;  %v2467_v35 = vmul.f32 %v6383_v63, %v6381_v5  ;;  %v6478_v6 = vld [vmem:[%s4393_s24 + $0x2c8] sm:$0xff] }
 0x1e3   : > { %v943_v53 = vadd.f32 %v911_v16, %v645_v24  ;;  %v1209_v18 = vmul.f32 %v6185_v7, %v1175_v10  ;;  %v1473_v13 = vmax.f32 %v1441_v47, 0.0  ;;  %v2235_v36 = vadd.f32 %v2203_v30, %v2169_v25 }
 0x1e4   : > { %v1739_v41 = vadd.f32 %v6299_v45, %v1705_v44  ;;  %v2003_v33 = vadd.f32 %v1971_v1, %v1937_v58  ;;  %v2501_v56 = vmul.f32 %v6389_v54, %v6394_v4  ;;  %v2567_v8 = vmul.f32 %v6400_v60, %v6397_v20 }
 0x1e5   : > { %v1241_v5 = vadd.f32 %v1209_v18, %v943_v53  ;;  %v1507_v24 = vmul.f32 %v6308_v62, %v1473_v13  ;;  %v2301_v50 = vadd.f32 %v2269_v32, %v2235_v36  ;;  %v421_v25 = vmul.f32 %v6109_v59, %v6466_v14 }
 0x1e6   : > { %v1771_v16 = vmax.f32 %v1739_v41, 0.0  ;;  %v2037_v10 = vadd.f32 %v6315_v27, %v2003_v33  ;;  %v2533_v47 = vadd.f32 %v2501_v56, %v2467_v35  ;;  %v455_v1 = vmul.f32 %v6114_v37, %v6470_v19 }
 0x1e7   : > { %v1539_v4 = vadd.f32 %v1507_v24, %v1241_v5  ;;  %v2335_v30 = vadd.f32 %v6320_v0, %v2301_v50  ;;  %v521_v20 = vmul.f32 %v6119_v38, %v6478_v6  ;;  %v687_v44 = vmul.f32 %v6209_v34, %v6466_v14 }
 0x1e8   : > { %v1805_v58 = vmul.f32 %v6327_v42, %v1771_v16  ;;  %v2069_v32 = vmax.f32 %v2037_v10, 0.0  ;;  %v2599_v53 = vadd.f32 %v2567_v8, %v2533_v47  ;;  %v487_v41 = vadd.f32 %v455_v1, %v421_v25 }
 0x1e9   : > { %v2367_v18 = vmax.f32 %v2335_v30, 0.0  ;;  %v721_v33 = vmul.f32 %v6213_v52, %v6470_v19  ;;  %v787_v35 = vmul.f32 %v6217_v21, %v6478_v6  ;;  %v985_v13 = vmul.f32 %v6221_v22, %v6466_v14 }
 0x1ea   : > { %v1837_v36 = vadd.f32 %v1805_v58, %v1539_v4  ;;  %v2103_v56 = vmul.f32 %v6334_v43, %v2069_v32  ;;  %v2633_v5 = vadd.f32 %v6420_v17, %v2599_v53  ;;  %v553_v24 = vadd.f32 %v521_v20, %v487_v41 }
 0x1eb   : > { %v2401_v50 = vmul.f32 %v6341_v9, %v2367_v18  ;;  %v753_v8 = vadd.f32 %v721_v33, %v687_v44  ;;  %v1019_v25 = vmul.f32 %v6228_v2, %v6470_v19  ;;  %v1085_v16 = vmul.f32 %v6232_v51, %v6478_v6 }
 0x1ec   : > { %v2135_v10 = vadd.f32 %v2103_v56, %v1837_v36  ;;  %v2665_v47 = vmax.f32 %v2633_v5, 0.0  ;;  %v587_v1 = vadd.f32 %v6139_v11, %v553_v24  ;;  %v1283_v4 = vmul.f32 %v6236_v49, %v6466_v14 }
 0x1ed   : > { %v819_v30 = vadd.f32 %v787_v35, %v753_v8  ;;  %v1051_v58 = vadd.f32 %v1019_v25, %v985_v13  ;;  %v1317_v20 = vmul.f32 %v6241_v55, %v6470_v19  ;;  %v1383_v44 = vmul.f32 %v6245_v28, %v6478_v6 }
 0x1ee   : > { %v2433_v32 = vadd.f32 %v2401_v50, %v2135_v10  ;;  %v2699_v53 = vmul.f32 %v6435_v46, %v2665_v47  ;;  %v619_v41 = vmax.f32 %v587_v1, 0.0  ;;  %v1581_v18 = vmul.f32 %v6249_v61, %v6466_v14 }
 0x1ef   : > { %v853_v33 = vadd.f32 %v6151_v26, %v819_v30  ;;  %v1117_v36 = vadd.f32 %v1085_v16, %v1051_v58  ;;  %v1349_v56 = vadd.f32 %v1317_v20, %v1283_v4  ;;  %v1615_v35 = vmul.f32 %v6255_v3, %v6470_v19  ;;  %v7428_v58 = vld [vmem:[#allocation18_spill] sm:$0xff] }
 0x1f0   : > { %v2731_v13 = vadd.f32 %v2699_v53, %v2433_v32  ;;  %v653_v5 = vmul.f32 %v6156_v40, %v619_v41  ;;  %v1681_v24 = vmul.f32 %v6259_v29, %v6478_v6  ;;  %v1879_v50 = vmul.f32 %v6264_v12, %v6466_v14  ;;  %v7429_v53 = vld [vmem:[#allocation19_spill] sm:$0xff] }
 0x1f1   : > { %v885_v8 = vmax.f32 %v853_v33, 0.0  ;;  %v1151_v25 = vadd.f32 %v6163_v39, %v1117_v36  ;;  %v1415_v10 = vadd.f32 %v1383_v44, %v1349_v56  ;;  %v1647_v47 = vadd.f32 %v1615_v35, %v1581_v18  ;;  %v6539_v35 = vld [vmem:[%s4393_s24 + $0x210] sm:$0xff] }
 0x1f2   : > { %2784 = vadd.xlane.f32.xlu0 %v2731_v13  ;;  %v1913_v16 = vmul.f32 %v6269_v57, %v6470_v19  ;;  %v1979_v1 = vmul.f32 %v6276_v31, %v6478_v6  ;;  %v2177_v4 = vmul.f32 %v6280_v15, %v6466_v14  ;;  %v2211_v30 = vmul.f32 %v6284_v48, %v6470_v19 }
 0x1f3   : > { %v919_v20 = vmul.f32 %v7428_v58, %v885_v8  ;;  %v1183_v32 = vmax.f32 %v1151_v25, 0.0  ;;  %v1449_v44 = vadd.f32 %v7429_v53, %v1415_v10  ;;  %v1713_v41 = vadd.f32 %v1681_v24, %v1647_v47  ;;  %v6544_v25 = vld [vmem:[%s4393_s24 + $0x218] sm:$0xff] }
 0x1f4   : > { %v1945_v18 = vadd.f32 %v1913_v16, %v1879_v50  ;;  %v2243_v33 = vadd.f32 %v2211_v30, %v2177_v4  ;;  %v2277_v36 = vmul.f32 %v6289_v23, %v6478_v6  ;;  %v2475_v56 = vmul.f32 %v6383_v63, %v6466_v14  ;;  %v6551_v16 = vld [vmem:[%s4393_s24 + $0x220] sm:$0xff] }
 0x1f5   : > { %v951_v13 = vadd.f32 %v919_v20, %v653_v5  ;;  %v1217_v48 = vmul.f32 %v6185_v7, %v1183_v32  ;;  %v1481_v15 = vmax.f32 %v1449_v44, 0.0  ;;  %v1747_v8 = vadd.f32 %v6299_v45, %v1713_v41 }
 0x1f6   : > { %v2011_v10 = vadd.f32 %v1979_v1, %v1945_v18  ;;  %v2309_v24 = vadd.f32 %v2277_v36, %v2243_v33  ;;  %v2509_v50 = vmul.f32 %v6389_v54, %v6470_v19  ;;  %v2575_v47 = vmul.f32 %v6400_v60, %v6478_v6 }
 0x1f7   : > { %v1249_v14 = vadd.f32 %v1217_v48, %v951_v13  ;;  %v1515_v5 = vmul.f32 %v6308_v62, %v1481_v15  ;;  %v1779_v4 = vmax.f32 %v1747_v8, 0.0  ;;  %v414_v30 = vmul.f32 %v6109_v59, %v6539_v35 }
 0x1f8   : > { %v2045_v20 = vadd.f32 %v6315_v27, %v2011_v10  ;;  %v2343_v1 = vadd.f32 %v6320_v0, %v2309_v24  ;;  %v2541_v32 = vadd.f32 %v2509_v50, %v2475_v56  ;;  %v448_v19 = vmul.f32 %v6114_v37, %v6544_v25 }
 0x1f9   : > { %v1547_v44 = vadd.f32 %v1515_v5, %v1249_v14  ;;  %v1813_v6 = vmul.f32 %v6327_v42, %v1779_v4  ;;  %v514_v48 = vmul.f32 %v6119_v38, %v6551_v16  ;;  %v680_v15 = vmul.f32 %v6209_v34, %v6539_v35 }
 0x1fa   : > { %v2077_v41 = vmax.f32 %v2045_v20, 0.0  ;;  %v2375_v18 = vmax.f32 %v2343_v1, 0.0  ;;  %v2607_v33 = vadd.f32 %v2575_v47, %v2541_v32  ;;  %v480_v36 = vadd.f32 %v448_v19, %v414_v30 }
 0x1fb   : > { %v1845_v13 = vadd.f32 %v1813_v6, %v1547_v44  ;;  %v714_v56 = vmul.f32 %v6213_v52, %v6544_v25  ;;  %v780_v8 = vmul.f32 %v6217_v21, %v6551_v16  ;;  %v978_v10 = vmul.f32 %v6221_v22, %v6539_v35 }
 0x1fc   : > { %v2111_v24 = vmul.f32 %v6334_v43, %v2077_v41  ;;  %v2409_v50 = vmul.f32 %v6341_v9, %v2375_v18  ;;  %v2641_v14 = vadd.f32 %v6420_v17, %v2607_v33  ;;  %v546_v5 = vadd.f32 %v514_v48, %v480_v36 }
 0x1fd   : > { %v746_v4 = vadd.f32 %v714_v56, %v680_v15  ;;  %v1012_v47 = vmul.f32 %v6228_v2, %v6544_v25  ;;  %v1078_v30 = vmul.f32 %v6232_v51, %v6551_v16  ;;  %v1276_v20 = vmul.f32 %v6236_v49, %v6539_v35 }
 0x1fe   : > { %v2143_v1 = vadd.f32 %v2111_v24, %v1845_v13  ;;  %v2673_v32 = vmax.f32 %v2641_v14, 0.0  ;;  %v580_v19 = vadd.f32 %v6139_v11, %v546_v5  ;;  %v1310_v44 = vmul.f32 %v6241_v55, %v6544_v25 }
 0x1ff   : > { %v812_v6 = vadd.f32 %v780_v8, %v746_v4  ;;  %v1044_v41 = vadd.f32 %v1012_v47, %v978_v10  ;;  %v1376_v48 = vmul.f32 %v6245_v28, %v6551_v16  ;;  %v1574_v15 = vmul.f32 %v6249_v61, %v6539_v35 }
 0x200   : > { %v2441_v18 = vadd.f32 %v2409_v50, %v2143_v1  ;;  %v2707_v33 = vmul.f32 %v6435_v46, %v2673_v32  ;;  %v612_v36 = vmax.f32 %v580_v19, 0.0  ;;  %v1342_v56 = vadd.f32 %v1310_v44, %v1276_v20  ;;  %v7430_v44 = vld [vmem:[#allocation16_spill] sm:$0xff] }
 0x201   : > { %v846_v13 = vadd.f32 %v6151_v26, %v812_v6  ;;  %v1110_v24 = vadd.f32 %v1078_v30, %v1044_v41  ;;  %v1608_v14 = vmul.f32 %v6255_v3, %v6544_v25  ;;  %v1674_v8 = vmul.f32 %v6259_v29, %v6551_v16  ;;  %v7431_v41 = vld [vmem:[#allocation21_spill] sm:$0xff] }
 0x202   : > { %v2739_v10 = vadd.f32 %v2707_v33, %v2441_v18  ;;  %v646_v5 = vmul.f32 %v6156_v40, %v612_v36  ;;  %v1408_v4 = vadd.f32 %v1376_v48, %v1342_v56  ;;  %v1872_v50 = vmul.f32 %v6264_v12, %v6539_v35 }
 0x203   : > { %v878_v47 = vmax.f32 %v846_v13, 0.0  ;;  %v1144_v1 = vadd.f32 %v6163_v39, %v1110_v24  ;;  %v1640_v20 = vadd.f32 %v1608_v14, %v1574_v15  ;;  %v1906_v30 = vmul.f32 %v6269_v57, %v6544_v25 }
 0x204   : > { %2800 = vadd.xlane.f32.xlu2 %v2739_v10  ;;  %v1442_v32 = vadd.f32 %v7429_v53, %v1408_v4  ;;  %v1972_v19 = vmul.f32 %v6276_v31, %v6551_v16  ;;  %v2170_v6 = vmul.f32 %v7430_v44, %v6539_v35  ;;  %v2204_v48 = vmul.f32 %v7431_v41, %v6544_v25  ;;  %v6612_v10 = vld [vmem:[%s4393_s24 + $0x240] sm:$0xff] }
 0x205   : > { %v912_v18 = vmul.f32 %v7428_v58, %v878_v47  ;;  %v1176_v15 = vmax.f32 %v1144_v1, 0.0  ;;  %v1706_v33 = vadd.f32 %v1674_v8, %v1640_v20  ;;  %v1938_v36 = vadd.f32 %v1906_v30, %v1872_v50  ;;  %v6617_v47 = vld [vmem:[%s4393_s24 + $0x248] sm:$0xff]  ;;  %v6620_v8 = vld [vmem:[%s4393_s24 + $0x250] sm:$0xff] }
 0x206   : > { %v1474_v56 = vmax.f32 %v1442_v32, 0.0  ;;  %v2236_v13 = vadd.f32 %v2204_v48, %v2170_v6  ;;  %v2270_v24 = vmul.f32 %v6289_v23, %v6551_v16  ;;  %v2468_v14 = vmul.f32 %v6383_v63, %v6539_v35 }
 0x207   : > { %v944_v4 = vadd.f32 %v912_v18, %v646_v5  ;;  %v1210_v44 = vmul.f32 %v6185_v7, %v1176_v15  ;;  %v1740_v41 = vadd.f32 %v6299_v45, %v1706_v33  ;;  %v2004_v53 = vadd.f32 %v1972_v19, %v1938_v36 }
 0x208   : > { %v1508_v50 = vmul.f32 %v6308_v62, %v1474_v56  ;;  %v2302_v1 = vadd.f32 %v2270_v24, %v2236_v13  ;;  %v2502_v20 = vmul.f32 %v6389_v54, %v6544_v25  ;;  %v2568_v35 = vmul.f32 %v6400_v60, %v6551_v16 }
 0x209   : > { %v1242_v30 = vadd.f32 %v1210_v44, %v944_v4  ;;  %v1772_v5 = vmax.f32 %v1740_v41, 0.0  ;;  %v2038_v32 = vadd.f32 %v6315_v27, %v2004_v53  ;;  %v416_v19 = vmul.f32 %v6109_v59, %v6612_v10 }
 0x20a   : > { %v2336_v6 = vadd.f32 %v6320_v0, %v2302_v1  ;;  %v2534_v48 = vadd.f32 %v2502_v20, %v2468_v14  ;;  %v450_v18 = vmul.f32 %v6114_v37, %v6617_v47  ;;  %v516_v15 = vmul.f32 %v6119_v38, %v6620_v8 }
 0x20b   : > { %v1540_v25 = vadd.f32 %v1508_v50, %v1242_v30  ;;  %v1806_v33 = vmul.f32 %v6327_v42, %v1772_v5  ;;  %v2070_v16 = vmax.f32 %v2038_v32, 0.0  ;;  %v682_v44 = vmul.f32 %v6209_v34, %v6612_v10 }
 0x20c   : > { %v2368_v53 = vmax.f32 %v2336_v6, 0.0  ;;  %v2600_v41 = vadd.f32 %v2568_v35, %v2534_v48  ;;  %v482_v36 = vadd.f32 %v450_v18, %v416_v19  ;;  %v716_v59 = vmul.f32 %v6213_v52, %v6617_v47 }
 0x20d   : > { %v1838_v56 = vadd.f32 %v1806_v33, %v1540_v25  ;;  %v2104_v13 = vmul.f32 %v6334_v43, %v2070_v16  ;;  %v782_v37 = vmul.f32 %v6217_v21, %v6620_v8  ;;  %v980_v38 = vmul.f32 %v6221_v22, %v6612_v10 }
 0x20e   : > { %v2402_v24 = vmul.f32 %v6341_v9, %v2368_v53  ;;  %v2634_v14 = vadd.f32 %v6420_v17, %v2600_v41  ;;  %v548_v4 = vadd.f32 %v516_v15, %v482_v36  ;;  %v748_v50 = vadd.f32 %v716_v59, %v682_v44 }
 0x20f   : > { %v2136_v1 = vadd.f32 %v2104_v13, %v1838_v56  ;;  %v1014_v20 = vmul.f32 %v6228_v2, %v6617_v47  ;;  %v1080_v35 = vmul.f32 %v6232_v51, %v6620_v8  ;;  %v1278_v30 = vmul.f32 %v6236_v49, %v6612_v10 }
 0x210   : > { %v2666_v5 = vmax.f32 %v2634_v14, 0.0  ;;  %v582_v32 = vadd.f32 %v6139_v11, %v548_v4  ;;  %v814_v19 = vadd.f32 %v782_v37, %v748_v50  ;;  %v1312_v6 = vmul.f32 %v6241_v55, %v6617_v47 }
 0x211   : > { %v2434_v48 = vadd.f32 %v2402_v24, %v2136_v1  ;;  %v1046_v18 = vadd.f32 %v1014_v20, %v980_v38  ;;  %v1378_v15 = vmul.f32 %v6245_v28, %v6620_v8  ;;  %v1576_v25 = vmul.f32 %v6249_v61, %v6612_v10  ;;  %v7432_v1 = vld [vmem:[#allocation19_spill] sm:$0xff] }
 0x212   : > { %v2700_v33 = vmul.f32 %v6435_v46, %v2666_v5  ;;  %v614_v16 = vmax.f32 %v582_v32, 0.0  ;;  %v848_v44 = vadd.f32 %v6151_v26, %v814_v19  ;;  %v1344_v53 = vadd.f32 %v1312_v6, %v1278_v30  ;;  %v7434_v30 = vld [vmem:[#allocation21_spill] sm:$0xff] }
 0x213   : > { %v1112_v41 = vadd.f32 %v1080_v35, %v1046_v18  ;;  %v1610_v11 = vmul.f32 %v6255_v3, %v6617_v47  ;;  %v1676_v36 = vmul.f32 %v6259_v29, %v6620_v8  ;;  %v1874_v59 = vmul.f32 %v6264_v12, %v6612_v10  ;;  %v7433_v35 = vld [vmem:[#allocation16_spill] sm:$0xff] }
 0x214   : > { %v2732_v56 = vadd.f32 %v2700_v33, %v2434_v48  ;;  %v648_v13 = vmul.f32 %v6156_v40, %v614_v16  ;;  %v880_v37 = vmax.f32 %v848_v44, 0.0  ;;  %v1410_v38 = vadd.f32 %v1378_v15, %v1344_v53  ;;  %v6683_v48 = vld [vmem:[%s4393_s24 + $0x258] sm:$0xff] }
 0x215   : > { %v1146_v24 = vadd.f32 %v6163_v39, %v1112_v41  ;;  %v1642_v26 = vadd.f32 %v1610_v11, %v1576_v25  ;;  %v1908_v14 = vmul.f32 %v6269_v57, %v6617_v47  ;;  %v1974_v4 = vmul.f32 %v6276_v31, %v6620_v8  ;;  %v6692_v41 = vld [vmem:[%s4393_s24 + $0x260] sm:$0xff]  ;;  %v6695_v11 = vld [vmem:[%s4393_s24 + $0x268] sm:$0xff] }
 0x216   : > { %2786 = vadd.xlane.f32.xlu1 %v2732_v56  ;;  %v914_v50 = vmul.f32 %v7428_v58, %v880_v37  ;;  %v1444_v20 = vadd.f32 %v7432_v1, %v1410_v38  ;;  %v2172_v40 = vmul.f32 %v7433_v35, %v6612_v10  ;;  %v2206_v39 = vmul.f32 %v7434_v30, %v6617_v47 }
 0x217   : > { %v1178_v5 = vmax.f32 %v1146_v24, 0.0  ;;  %v1708_v32 = vadd.f32 %v1676_v36, %v1642_v26  ;;  %v1940_v19 = vadd.f32 %v1908_v14, %v1874_v59  ;;  %v2272_v6 = vmul.f32 %v6289_v23, %v6620_v8  ;;  %v6706_v26 = vld [vmem:[#allocation6 + $0x1] ss:$0 sm:$0xff] }
 0x218   : > { %v946_v18 = vadd.f32 %v914_v50, %v648_v13  ;;  %v1476_v58 = vmax.f32 %v1444_v20, 0.0  ;;  %v2238_v15 = vadd.f32 %v2206_v39, %v2172_v40  ;;  %v2470_v25 = vmul.f32 %v6383_v63, %v6612_v10  ;;  %v6700_v13 = vld [vmem:[#allocation6] ss:$0 sm:$0xff] }
 0x219   : > { %v1212_v33 = vmul.f32 %v6185_v7, %v1178_v5  ;;  %v1742_v16 = vadd.f32 %v6299_v45, %v1708_v32  ;;  %v2006_v44 = vadd.f32 %v1974_v4, %v1940_v19  ;;  %v2504_v53 = vmul.f32 %v6389_v54, %v6617_v47  ;;  %v6710_v4 = vld [vmem:[#allocation6 + $0x2] ss:$0 sm:$0xff] }
 0x21a   : > { %v1510_v36 = vmul.f32 %v6308_v62, %v1476_v58  ;;  %v2304_v59 = vadd.f32 %v2272_v6, %v2238_v15  ;;  %v2570_v56 = vmul.f32 %v6400_v60, %v6620_v8  ;;  %v417_v7 = vmul.f32 %v6700_v13, %v6683_v48 }
 0x21b   : > { %v1244_v10 = vadd.f32 %v1212_v33, %v946_v18  ;;  %v1774_v37 = vmax.f32 %v1742_v16, 0.0  ;;  %v2040_v38 = vadd.f32 %v6315_v27, %v2006_v44  ;;  %v2536_v47 = vadd.f32 %v2504_v53, %v2470_v25 }
 0x21c   : > { %v2338_v24 = vadd.f32 %v6320_v0, %v2304_v59  ;;  %v451_v14 = vmul.f32 %v6706_v26, %v6692_v41  ;;  %v517_v8 = vmul.f32 %v6710_v4, %v6695_v11  ;;  %v683_v50 = vmul.f32 %v6209_v34, %v6683_v48 }
 0x21d   : > { %v1542_v20 = vadd.f32 %v1510_v36, %v1244_v10  ;;  %v1808_v40 = vmul.f32 %v6327_v42, %v1774_v37  ;;  %v2072_v39 = vmax.f32 %v2040_v38, 0.0  ;;  %v2602_v5 = vadd.f32 %v2570_v56, %v2536_v47  ;;  %v6732_v56 = vld [vmem:[#allocation8] ss:$0 sm:$0xff] }
 0x21e   : > { %v2370_v32 = vmax.f32 %v2338_v24, 0.0  ;;  %v483_v19 = vadd.f32 %v451_v14, %v417_v7  ;;  %v717_v6 = vmul.f32 %v6213_v52, %v6692_v41  ;;  %v783_v18 = vmul.f32 %v6217_v21, %v6695_v11 }
 0x21f   : > { %v1840_v58 = vadd.f32 %v1808_v40, %v1542_v20  ;;  %v2106_v15 = vmul.f32 %v6334_v43, %v2072_v39  ;;  %v2636_v25 = vadd.f32 %v6420_v17, %v2602_v5  ;;  %v981_v34 = vmul.f32 %v6221_v22, %v6683_v48  ;;  %v6751_v39 = vld [vmem:[#allocation9] ss:$0 sm:$0xff] }
 0x220   : > { %v2404_v33 = vmul.f32 %v6341_v9, %v2370_v32  ;;  %v549_v16 = vadd.f32 %v517_v8, %v483_v19  ;;  %v749_v44 = vadd.f32 %v717_v6, %v683_v50  ;;  %v1015_v53 = vmul.f32 %v6228_v2, %v6692_v41  ;;  %v6754_v32 = vld [vmem:[#allocation8 + $0x2] ss:$0 sm:$0xff] }
 0x221   : > { %v2138_v36 = vadd.f32 %v2106_v15, %v1840_v58  ;;  %v2668_v52 = vmax.f32 %v2636_v25, 0.0  ;;  %v1081_v21 = vmul.f32 %v6232_v51, %v6695_v11  ;;  %v1279_v59 = vmul.f32 %v6236_v49, %v6683_v48  ;;  %v6742_v49 = vld [vmem:[#allocation8 + $0x1] ss:$0 sm:$0xff]  ;;  %v6763_v58 = vld [vmem:[#allocation9 + $0x1] ss:$0 sm:$0xff] }
 0x222   : > { %v583_v7 = vadd.f32 %v6732_v56, %v549_v16  ;;  %v815_v22 = vadd.f32 %v783_v18, %v749_v44  ;;  %v1047_v10 = vadd.f32 %v1015_v53, %v981_v34  ;;  %v1313_v37 = vmul.f32 %v6241_v55, %v6692_v41  ;;  %v6774_v44 = vld [vmem:[%s4393_s24 + $0x288] sm:$0xff] }
 0x223   : > { %v2436_v38 = vadd.f32 %v2404_v33, %v2138_v36  ;;  %v2702_v2 = vmul.f32 %v6435_v46, %v2668_v52  ;;  %v1379_v47 = vmul.f32 %v6245_v28, %v6695_v11  ;;  %v1577_v51 = vmul.f32 %v6249_v61, %v6683_v48  ;;  %v6776_v36 = vld [vmem:[#allocation9 + $0x2] ss:$0 sm:$0xff] }
 0x224   : > { %v615_v24 = vmax.f32 %v583_v7, 0.0  ;;  %v849_v14 = vadd.f32 %v6742_v49, %v815_v22  ;;  %v1113_v8 = vadd.f32 %v1081_v21, %v1047_v10  ;;  %v1345_v50 = vadd.f32 %v1313_v37, %v1279_v59  ;;  %v6780_v59 = vld [vmem:[%s4393_s24 + $0x290] sm:$0xff]  ;;  %v6788_v22 = vld [vmem:[%s4393_s24 + $0x298] sm:$0xff] }
 0x225   : > { %v2734_v20 = vadd.f32 %v2702_v2, %v2436_v38  ;;  %v1611_v55 = vmul.f32 %v6255_v3, %v6692_v41  ;;  %v1677_v40 = vmul.f32 %v6259_v29, %v6695_v11  ;;  %v1875_v28 = vmul.f32 %v6264_v12, %v6683_v48 }
 0x226   : > { %v649_v61 = vmul.f32 %v6751_v39, %v615_v24  ;;  %v881_v5 = vmax.f32 %v849_v14, 0.0  ;;  %v1147_v19 = vadd.f32 %v6754_v32, %v1113_v8  ;;  %v1411_v6 = vadd.f32 %v1379_v47, %v1345_v50  ;;  %v6799_v8 = vld [vmem:[#allocation6 + $0x3] ss:$0 sm:$0xff] }
 0x227   : > { %2790 = vadd.xlane.f32.xlu0 %v2734_v20  ;;  %v1643_v18 = vadd.f32 %v1611_v55, %v1577_v51  ;;  %v1909_v3 = vmul.f32 %v6269_v57, %v6692_v41  ;;  %v1975_v29 = vmul.f32 %v6276_v31, %v6695_v11  ;;  %v2173_v12 = vmul.f32 %v7433_v35, %v6683_v48 }
 0x228   : > { %v915_v15 = vmul.f32 %v6763_v58, %v881_v5  ;;  %v1179_v25 = vmax.f32 %v1147_v19, 0.0  ;;  %v1445_v34 = vadd.f32 %v7432_v1, %v1411_v6  ;;  %v2207_v33 = vmul.f32 %v7434_v30, %v6692_v41  ;;  %v6812_v19 = vld [vmem:[#allocation6 + $0x6] ss:$0 sm:$0xff] }
 0x229   : > { %v1709_v16 = vadd.f32 %v1677_v40, %v1643_v18  ;;  %v1941_v57 = vadd.f32 %v1909_v3, %v1875_v28  ;;  %v2273_v31 = vmul.f32 %v6289_v23, %v6695_v11  ;;  %v2471_v35 = vmul.f32 %v6383_v63, %v6683_v48  ;;  %v6804_v28 = vld [vmem:[#allocation6 + $0x4] ss:$0 sm:$0xff] }
 0x22a   : > { %v947_v53 = vadd.f32 %v915_v15, %v649_v61  ;;  %v1213_v52 = vmul.f32 %v6776_v36, %v1179_v25  ;;  %v1477_v1 = vmax.f32 %v1445_v34, 0.0  ;;  %v2239_v21 = vadd.f32 %v2207_v33, %v2173_v12  ;;  %v6819_v25 = vld [vmem:[#allocation6 + $0x7] ss:$0 sm:$0xff]  ;;  %v6823_v33 = vld [vmem:[#allocation6 + $0x8] ss:$0 sm:$0xff] }
 0x22b   : > { %v1743_v30 = vadd.f32 %v6299_v45, %v1709_v16  ;;  %v2007_v7 = vadd.f32 %v1975_v29, %v1941_v57  ;;  %v2505_v23 = vmul.f32 %v6389_v54, %v6692_v41  ;;  %v2571_v48 = vmul.f32 %v6400_v60, %v6695_v11 }
 0x22c   : > { %v1245_v10 = vadd.f32 %v1213_v52, %v947_v53  ;;  %v1511_v37 = vmul.f32 %v6308_v62, %v1477_v1  ;;  %v2305_v38 = vadd.f32 %v2273_v31, %v2239_v21  ;;  %v419_v2 = vmul.f32 %v6700_v13, %v6774_v44  ;;  %v6832_v1 = vld [vmem:[#allocation6 + $0xa] ss:$0 sm:$0xff] }
 0x22d   : > { %v1775_v47 = vmax.f32 %v1743_v30, 0.0  ;;  %v2041_v51 = vadd.f32 %v6315_v27, %v2007_v7  ;;  %v2537_v45 = vadd.f32 %v2505_v23, %v2471_v35  ;;  %v453_v24 = vmul.f32 %v6706_v26, %v6780_v59  ;;  %v6828_v35 = vld [vmem:[#allocation6 + $0x9] ss:$0 sm:$0xff]  ;;  %v6836_v30 = vld [vmem:[#allocation6 + $0xb] ss:$0 sm:$0xff] }
 0x22e   : > { %v1543_v41 = vadd.f32 %v1511_v37, %v1245_v10  ;;  %v2339_v14 = vadd.f32 %v6320_v0, %v2305_v38  ;;  %v519_v11 = vmul.f32 %v6710_v4, %v6788_v22  ;;  %v685_v62 = vmul.f32 %v6799_v8, %v6774_v44  ;;  %v6808_v0 = vld [vmem:[#allocation6 + $0x5] ss:$0 sm:$0xff]  ;;  %v6841_v37 = vld [vmem:[#allocation6 + $0xc] ss:$0 sm:$0xff] }
 0x22f   : > { %v1809_v50 = vmul.f32 %v6327_v42, %v1775_v47  ;;  %v2073_v20 = vmax.f32 %v2041_v51, 0.0  ;;  %v2603_v55 = vadd.f32 %v2571_v48, %v2537_v45  ;;  %v485_v27 = vadd.f32 %v453_v24, %v419_v2  ;;  %v6846_v45 = vld [vmem:[#allocation6 + $0xd] ss:$0 sm:$0xff] }
 0x230   : > { %v2371_v40 = vmax.f32 %v2339_v14, 0.0  ;;  %v719_v61 = vmul.f32 %v6804_v28, %v6780_v59  ;;  %v785_v5 = vmul.f32 %v6808_v0, %v6788_v22  ;;  %v983_v6 = vmul.f32 %v6812_v19, %v6774_v44 }
 0x231   : > { %v1841_v42 = vadd.f32 %v1809_v50, %v1543_v41  ;;  %v2107_v18 = vmul.f32 %v6334_v43, %v2073_v20  ;;  %v2637_v3 = vadd.f32 %v6420_v17, %v2603_v55  ;;  %v551_v29 = vadd.f32 %v519_v11, %v485_v27  ;;  %v6851_v11 = vld [vmem:[#allocation6 + $0xe] ss:$0 sm:$0xff]  ;;  %v6855_v50 = vld [vmem:[#allocation6 + $0xf] ss:$0 sm:$0xff] }
 0x232   : > { %v2405_v12 = vmul.f32 %v6341_v9, %v2371_v40  ;;  %v751_v15 = vadd.f32 %v719_v61, %v685_v62  ;;  %v1017_v34 = vmul.f32 %v6819_v25, %v6780_v59  ;;  %v1083_v16 = vmul.f32 %v6823_v33, %v6788_v22 }
 0x233   : > { %v2139_v57 = vadd.f32 %v2107_v18, %v1841_v42  ;;  %v2669_v31 = vmax.f32 %v2637_v3, 0.0  ;;  %v585_v43 = vadd.f32 %v6732_v56, %v551_v29  ;;  %v1281_v9 = vmul.f32 %v6828_v35, %v6774_v44  ;;  %v6864_v42 = vld [vmem:[#allocation6 + $0x11] ss:$0 sm:$0xff]  ;;  %v6868_v3 = vld [vmem:[#allocation6 + $0x12] ss:$0 sm:$0xff] }
 0x234   : > { %v817_v53 = vadd.f32 %v785_v5, %v751_v15  ;;  %v1049_v52 = vadd.f32 %v1017_v34, %v983_v6  ;;  %v1315_v21 = vmul.f32 %v6832_v1, %v6780_v59  ;;  %v1381_v7 = vmul.f32 %v6836_v30, %v6788_v22  ;;  %v6860_v5 = vld [vmem:[#allocation6 + $0x10] ss:$0 sm:$0xff] }
 0x235   : > { %v2437_v23 = vadd.f32 %v2405_v12, %v2139_v57  ;;  %v2703_v48 = vmul.f32 %v6435_v46, %v2669_v31  ;;  %v617_v10 = vmax.f32 %v585_v43, 0.0  ;;  %v1579_v38 = vmul.f32 %v6841_v37, %v6774_v44  ;;  %v6872_v12 = vld [vmem:[#allocation6 + $0x13] ss:$0 sm:$0xff]  ;;  %v6877_v57 = vld [vmem:[#allocation8 + $0x3] ss:$0 sm:$0xff] }
 0x236   : > { %v851_v2 = vadd.f32 %v6742_v49, %v817_v53  ;;  %v1115_v47 = vadd.f32 %v1083_v16, %v1049_v52  ;;  %v1347_v51 = vadd.f32 %v1315_v21, %v1281_v9  ;;  %v1613_v24 = vmul.f32 %v6846_v45, %v6780_v59  ;;  %v6880_v52 = vld [vmem:[#allocation6 + $0x14] ss:$0 sm:$0xff] }
 0x237   : > { %v2735_v41 = vadd.f32 %v2703_v48, %v2437_v23  ;;  %v651_v14 = vmul.f32 %v6751_v39, %v617_v10  ;;  %v1679_v62 = vmul.f32 %v6851_v11, %v6788_v22  ;;  %v1877_v20 = vmul.f32 %v6855_v50, %v6774_v44  ;;  %v6887_v23 = vld [vmem:[%s4393_s24 + $0x2a0] sm:$0xff] }
 0x238   : > { %v883_v55 = vmax.f32 %v851_v2, 0.0  ;;  %v1149_v27 = vadd.f32 %v6754_v32, %v1115_v47  ;;  %v1413_v40 = vadd.f32 %v1381_v7, %v1347_v51  ;;  %v1645_v61 = vadd.f32 %v1613_v24, %v1579_v38  ;;  %v6890_v2 = vld [vmem:[#allocation8 + $0x4] ss:$0 sm:$0xff]  ;;  %v6894_v51 = vld [vmem:[%s4393_s24 + $0x2a8] sm:$0xff] }
 0x239   : > { %2792 = vadd.xlane.f32.xlu1 %v2735_v41  ;;  %v1911_v6 = vmul.f32 %v6860_v5, %v6780_v59  ;;  %v1977_v18 = vmul.f32 %v6864_v42, %v6788_v22  ;;  %v2175_v29 = vmul.f32 %v6868_v3, %v6774_v44  ;;  %v2209_v15 = vmul.f32 %v6872_v12, %v6780_v59 }
 0x23a   : > { %v917_v34 = vmul.f32 %v6763_v58, %v883_v55  ;;  %v1181_v16 = vmax.f32 %v1149_v27, 0.0  ;;  %v1447_v31 = vadd.f32 %v6877_v57, %v1413_v40  ;;  %v1711_v43 = vadd.f32 %v1679_v62, %v1645_v61  ;;  %v6908_v61 = vld [vmem:[#allocation8 + $0x5] ss:$0 sm:$0xff] }
 0x23b   : > { %v1943_v9 = vadd.f32 %v1911_v6, %v1877_v20  ;;  %v2241_v53 = vadd.f32 %v2209_v15, %v2175_v29  ;;  %v2275_v21 = vmul.f32 %v6880_v52, %v6788_v22  ;;  %v2473_v7 = vmul.f32 %v6383_v63, %v6774_v44  ;;  %v6901_v44 = vld [vmem:[%s4393_s24 + $0x2b0] sm:$0xff]  ;;  %v6903_v20 = vld [vmem:[#allocation9 + $0x3] ss:$0 sm:$0xff]  ;;  %v6916_v29 = vld [vmem:[#allocation9 + $0x4] ss:$0 sm:$0xff] }
 0x23c   : > { %v949_v48 = vadd.f32 %v917_v34, %v651_v14  ;;  %v1215_v10 = vmul.f32 %v6776_v36, %v1181_v16  ;;  %v1479_v38 = vmax.f32 %v1447_v31, 0.0  ;;  %v1745_v47 = vadd.f32 %v6890_v2, %v1711_v43 }
 0x23d   : > { %v2009_v24 = vadd.f32 %v1977_v18, %v1943_v9  ;;  %v2307_v41 = vadd.f32 %v2275_v21, %v2241_v53  ;;  %v2507_v62 = vmul.f32 %v6389_v54, %v6780_v59  ;;  %v2573_v63 = vmul.f32 %v6400_v60, %v6788_v22  ;;  %v6911_v18 = vld [vmem:[#allocation8 + $0x6] ss:$0 sm:$0xff] }
 0x23e   : > { %v1247_v14 = vadd.f32 %v1215_v10, %v949_v48  ;;  %v1513_v55 = vmul.f32 %v6903_v20, %v1479_v38  ;;  %v1777_v27 = vmax.f32 %v1745_v47, 0.0  ;;  %v420_v40 = vmul.f32 %v6700_v13, %v6887_v23  ;;  %v6929_v38 = vld [vmem:[#allocation9 + $0x5] ss:$0 sm:$0xff] }
 0x23f   : > { %v2043_v6 = vadd.f32 %v6908_v61, %v2009_v24  ;;  %v2341_v54 = vadd.f32 %v6911_v18, %v2307_v41  ;;  %v2539_v60 = vadd.f32 %v2507_v62, %v2473_v7  ;;  %v454_v59 = vmul.f32 %v6706_v26, %v6894_v51  ;;  %v6932_v24 = vld [vmem:[#allocation9 + $0x6] ss:$0 sm:$0xff] }
 0x240   : > { %v1545_v22 = vadd.f32 %v1513_v55, %v1247_v14  ;;  %v1811_v15 = vmul.f32 %v6916_v29, %v1777_v27  ;;  %v520_v34 = vmul.f32 %v6710_v4, %v6901_v44  ;;  %v686_v16 = vmul.f32 %v6799_v8, %v6887_v23  ;;  %7435 = vst [vmem:[#allocation23_spill] sm:$0xff] %v6932_v24 }
 0x241   : > { %v2075_v31 = vmax.f32 %v2043_v6, 0.0  ;;  %v2373_v43 = vmax.f32 %v2341_v54, 0.0  ;;  %v2605_v9 = vadd.f32 %v2573_v63, %v2539_v60  ;;  %v486_v53 = vadd.f32 %v454_v59, %v420_v40 }
 0x242   : > { %v1843_v21 = vadd.f32 %v1811_v15, %v1545_v22  ;;  %v720_v7 = vmul.f32 %v6804_v28, %v6894_v51  ;;  %v786_v48 = vmul.f32 %v6808_v0, %v6901_v44  ;;  %v984_v10 = vmul.f32 %v6812_v19, %v6887_v23 }
 0x243   : > { %v2109_v47 = vmul.f32 %v6929_v38, %v2075_v31  ;;  %v2407_v41 = vmul.f32 %v6932_v24, %v2373_v43  ;;  %v2639_v62 = vadd.f32 %v6420_v17, %v2605_v9  ;;  %v552_v63 = vadd.f32 %v520_v34, %v486_v53 }
 0x244   : > { %v752_v14 = vadd.f32 %v720_v7, %v686_v16  ;;  %v1018_v55 = vmul.f32 %v6819_v25, %v6894_v51  ;;  %v1084_v27 = vmul.f32 %v6823_v33, %v6901_v44  ;;  %v1282_v40 = vmul.f32 %v6828_v35, %v6887_v23 }
 0x245   : > { %v2141_v6 = vadd.f32 %v2109_v47, %v1843_v21  ;;  %v2671_v54 = vmax.f32 %v2639_v62, 0.0  ;;  %v586_v60 = vadd.f32 %v6732_v56, %v552_v63  ;;  %v1316_v59 = vmul.f32 %v6832_v1, %v6894_v51 }
 0x246   : > { %v818_v22 = vadd.f32 %v786_v48, %v752_v14  ;;  %v1050_v17 = vadd.f32 %v1018_v55, %v984_v10  ;;  %v1382_v15 = vmul.f32 %v6836_v30, %v6901_v44  ;;  %v1580_v34 = vmul.f32 %v6841_v37, %v6887_v23 }
 0x247   : > { %v2439_v16 = vadd.f32 %v2407_v41, %v2141_v6  ;;  %v2705_v31 = vmul.f32 %v6435_v46, %v2671_v54  ;;  %v618_v43 = vmax.f32 %v586_v60, 0.0  ;;  %v1348_v9 = vadd.f32 %v1316_v59, %v1282_v40 }
 0x248   : > { %v852_v53 = vadd.f32 %v6742_v49, %v818_v22  ;;  %v1116_v21 = vadd.f32 %v1084_v27, %v1050_v17  ;;  %v1614_v7 = vmul.f32 %v6846_v45, %v6894_v51  ;;  %v1680_v48 = vmul.f32 %v6851_v11, %v6901_v44 }
 0x249   : > { %v2737_v10 = vadd.f32 %v2705_v31, %v2439_v16  ;;  %v652_v47 = vmul.f32 %v6751_v39, %v618_v43  ;;  %v1414_v62 = vadd.f32 %v1382_v15, %v1348_v9  ;;  %v1878_v46 = vmul.f32 %v6855_v50, %v6887_v23  ;;  %v6973_v31 = vld [vmem:[#allocation6 + $0x15] ss:$0 sm:$0xff] }
 0x24a   : > { %v884_v41 = vmax.f32 %v852_v53, 0.0  ;;  %v1150_v63 = vadd.f32 %v6754_v32, %v1116_v21  ;;  %v1646_v14 = vadd.f32 %v1614_v7, %v1580_v34  ;;  %v1912_v55 = vmul.f32 %v6860_v5, %v6894_v51 }
 0x24b   : > { %2796 = vadd.xlane.f32.xlu0 %v2737_v10  ;;  %v1448_v27 = vadd.f32 %v6877_v57, %v1414_v62  ;;  %v1978_v40 = vmul.f32 %v6864_v42, %v6901_v44  ;;  %v2176_v6 = vmul.f32 %v6868_v3, %v6887_v23  ;;  %v2210_v54 = vmul.f32 %v6872_v12, %v6894_v51  ;;  %v6980_v10 = vld [vmem:[%s4393_s24 + $0x2d0] sm:$0xff] }
 0x24c   : > { %v918_v60 = vmul.f32 %v6763_v58, %v884_v41  ;;  %v1182_v59 = vmax.f32 %v1150_v63, 0.0  ;;  %v1712_v22 = vadd.f32 %v1680_v48, %v1646_v14  ;;  %v1944_v17 = vadd.f32 %v1912_v55, %v1878_v46  ;;  %v2743_v48 = vpop.xlane.xlu0 %2742  ;;  %v6983_v41 = vld [vmem:[#allocation6 + $0x16] ss:$0 sm:$0xff]  ;;  %v6987_v14 = vld [vmem:[#allocation6 + $0x17] ss:$0 sm:$0xff] }
 0x24d   : > { %v1480_v15 = vmax.f32 %v1448_v27, 0.0  ;;  %v2242_v34 = vadd.f32 %v2210_v54, %v2176_v6  ;;  %v2276_v16 = vmul.f32 %v6880_v52, %v6901_v44  ;;  %v2474_v43 = vmul.f32 %v6973_v31, %v6887_v23 }
 0x24e   : > { %v950_v9 = vadd.f32 %v918_v60, %v652_v47  ;;  %v1216_v53 = vmul.f32 %v6776_v36, %v1182_v59  ;;  %v1746_v21 = vadd.f32 %v6890_v2, %v1712_v22  ;;  %v2010_v7 = vadd.f32 %v1978_v40, %v1944_v17  ;;  %v6992_v47 = vld [vmem:[%s4393_s24 + $0x2d8] sm:$0xff] }
 0x24f   : > { %v1514_v62 = vmul.f32 %v6903_v20, %v1480_v15  ;;  %v2308_v46 = vadd.f32 %v2276_v16, %v2242_v34  ;;  %v2508_v63 = vmul.f32 %v6983_v41, %v6894_v51  ;;  %v2574_v23 = vmul.f32 %v6987_v14, %v6901_v44 }
 0x250   : > { %v1248_v55 = vadd.f32 %v1216_v53, %v950_v9  ;;  %v1778_v27 = vmax.f32 %v1746_v21, 0.0  ;;  %v2044_v40 = vadd.f32 %v6908_v61, %v2010_v7  ;;  %v6996_v6 = vstv %s6955_s25 }
 0x251   : > { %7436 = vst [vmem:[#allocation17_spill] sm:$0xff] %v6996_v6  ;;  %v2342_v54 = vadd.f32 %v6911_v18, %v2308_v46  ;;  %v2540_v60 = vadd.f32 %v2508_v63, %v2474_v43  ;;  %v2808_v59 = vadd.f32 %v6996_v6, %v2743_v48  ;;  %v422_v51 = vmul.f32 %v6700_v13, %v6980_v10  ;;  %v7007_v48 = vld [vmem:[%s4393_s24 + $0x2e0] sm:$0xff] }
 0x252   : > { %v1546_v22 = vadd.f32 %v1514_v62, %v1248_v55  ;;  %v1812_v44 = vmul.f32 %v6916_v29, %v1778_v27  ;;  %v2076_v17 = vmax.f32 %v2044_v40, 0.0  ;;  %v456_v15 = vmul.f32 %v6706_v26, %v6992_v47  ;;  %v7010_v62 = vld [vmem:[#allocation8 + $0x7] ss:$0 sm:$0xff] }
 0x253   : > { %v2374_v34 = vmax.f32 %v2342_v54, 0.0  ;;  %v2606_v16 = vadd.f32 %v2574_v23, %v2540_v60  ;;  %v2872_v9 = vperm.slane %v2808_v59, 0  ;;  %v2873_v53 = vperm.slane %v2808_v59, 1 }
 0x254   : > { %v1844_v21 = vadd.f32 %v1812_v44, %v1546_v22  ;;  %v2110_v7 = vmul.f32 %v6929_v38, %v2076_v17  ;;  %v2874_v43 = vperm.slane %v2808_v59, 2  ;;  %v2875_v46 = vperm.slane %v2808_v59, 3 }
 0x255   : > { %v2408_v63 = vmul.f32 %v6932_v24, %v2374_v34  ;;  %v2640_v55 = vadd.f32 %v7010_v62, %v2606_v16  ;;  %v2876_v27 = vperm.slane %v2808_v59, 4  ;;  %v2877_v40 = vperm.slane %v2808_v59, 5  ;;  %3128 = vst [vmem:[#allocation1] ss:$9 sm:$0xff] %v2872_v9 }
 0x256   : > { %v2142_v54 = vadd.f32 %v2110_v7, %v1844_v21  ;;  %v2878_v23 = vperm.slane %v2808_v59, 6  ;;  %v2879_v60 = vperm.slane %v2808_v59, 7  ;;  %3130 = vst [vmem:[#allocation1 + $0x1] ss:$9 sm:$0xff] %v2873_v53  ;;  %v488_v22 = vadd.f32 %v456_v15, %v422_v51  ;;  %v7025_v15 = vld [vmem:[#allocation9 + $0x7] ss:$0 sm:$0xff] }
 0x257   : > { %v2672_v44 = vmax.f32 %v2640_v55, 0.0  ;;  %3132 = vst [vmem:[#allocation1 + $0x2] ss:$9 sm:$0xff] %v2874_v43  ;;  %v522_v17 = vmul.f32 %v6710_v4, %v7007_v48  ;;  %v688_v34 = vmul.f32 %v6799_v8, %v6980_v10  ;;  %v722_v6 = vmul.f32 %v6804_v28, %v6992_v47 }
 0x258   : > { %v2440_v16 = vadd.f32 %v2408_v63, %v2142_v54  ;;  %3134 = vst [vmem:[#allocation1 + $0x3] ss:$9 sm:$0xff] %v2875_v46  ;;  %v788_v9 = vmul.f32 %v6808_v0, %v7007_v48  ;;  %v986_v59 = vmul.f32 %v6812_v19, %v6980_v10  ;;  %v1020_v51 = vmul.f32 %v6819_v25, %v6992_v47 }
 0x259   : > { %v2706_v53 = vmul.f32 %v7025_v15, %v2672_v44  ;;  %3136 = vst [vmem:[#allocation1 + $0x4] ss:$9 sm:$0xff] %v2876_v27  ;;  %v554_v21 = vadd.f32 %v522_v17, %v488_v22  ;;  %v754_v7 = vadd.f32 %v722_v6, %v688_v34  ;;  %v1086_v43 = vmul.f32 %v6823_v33, %v7007_v48 }
 0x25a   : > { %3138 = vst [vmem:[#allocation1 + $0x5] ss:$9 sm:$0xff] %v2877_v40  ;;  %v1052_v46 = vadd.f32 %v1020_v51, %v986_v59  ;;  %v1284_v63 = vmul.f32 %v6828_v35, %v6980_v10  ;;  %v1318_v55 = vmul.f32 %v6832_v1, %v6992_v47  ;;  %v1384_v54 = vmul.f32 %v6836_v30, %v7007_v48 }
 0x25b   : > { %v2738_v24 = vadd.f32 %v2706_v53, %v2440_v16  ;;  %3140 = vst [vmem:[#allocation1 + $0x6] ss:$9 sm:$0xff] %v2878_v23  ;;  %v588_v27 = vadd.f32 %v6732_v56, %v554_v21  ;;  %v820_v22 = vadd.f32 %v788_v9, %v754_v7  ;;  %v1582_v6 = vmul.f32 %v6841_v37, %v6980_v10 }
 0x25c   : > { %3142 = vst [vmem:[#allocation1 + $0x7] ss:$9 sm:$0xff] %v2879_v60  ;;  %v1118_v40 = vadd.f32 %v1086_v43, %v1052_v46  ;;  %v1350_v44 = vadd.f32 %v1318_v55, %v1284_v63  ;;  %v1616_v17 = vmul.f32 %v6846_v45, %v6992_v47  ;;  %v1682_v34 = vmul.f32 %v6851_v11, %v7007_v48 }
 0x25d   : > { %2798 = vadd.xlane.f32.xlu1 %v2738_v24  ;;  %v620_v59 = vmax.f32 %v588_v27, 0.0  ;;  %v854_v16 = vadd.f32 %v6742_v49, %v820_v22  ;;  %v1880_v23 = vmul.f32 %v6855_v50, %v6980_v10  ;;  %v1914_v9 = vmul.f32 %v6860_v5, %v6992_v47 }
 0x25e   : > { %v1152_v60 = vadd.f32 %v6754_v32, %v1118_v40  ;;  %v1416_v51 = vadd.f32 %v1384_v54, %v1350_v44  ;;  %v1648_v53 = vadd.f32 %v1616_v17, %v1582_v6  ;;  %v1980_v21 = vmul.f32 %v6864_v42, %v7007_v48  ;;  %v7063_v17 = vld [vmem:[%s4393_s24 + $0x2e8] sm:$0xff] }
 0x25f   : > { %v654_v7 = vmul.f32 %v6751_v39, %v620_v59  ;;  %v886_v24 = vmax.f32 %v854_v16, 0.0  ;;  %v1946_v43 = vadd.f32 %v1914_v9, %v1880_v23  ;;  %v2178_v46 = vmul.f32 %v6868_v3, %v6980_v10  ;;  %v7068_v9 = vld [vmem:[%s4393_s24 + $0x2f0] sm:$0xff] }
 0x260   : > { %v1184_v63 = vmax.f32 %v1152_v60, 0.0  ;;  %v1450_v55 = vadd.f32 %v6877_v57, %v1416_v51  ;;  %v1714_v27 = vadd.f32 %v1682_v34, %v1648_v53  ;;  %v2212_v54 = vmul.f32 %v6872_v12, %v6992_v47 }
 0x261   : > { %v920_v22 = vmul.f32 %v6763_v58, %v886_v24  ;;  %v2012_v6 = vadd.f32 %v1980_v21, %v1946_v43  ;;  %v2278_v40 = vmul.f32 %v6880_v52, %v7007_v48  ;;  %v2476_v44 = vmul.f32 %v6973_v31, %v6980_v10  ;;  %v7076_v10 = vld [vmem:[%s4393_s24 + $0x2f8] sm:$0xff] }
 0x262   : > { %v1218_v59 = vmul.f32 %v6776_v36, %v1184_v63  ;;  %v1482_v16 = vmax.f32 %v1450_v55, 0.0  ;;  %v1748_v34 = vadd.f32 %v6890_v2, %v1714_v27  ;;  %v2244_v23 = vadd.f32 %v2212_v54, %v2178_v46 }
 0x263   : > { %v952_v60 = vadd.f32 %v920_v22, %v654_v7  ;;  %v2046_v51 = vadd.f32 %v6908_v61, %v2012_v6  ;;  %v2510_v53 = vmul.f32 %v6983_v41, %v6992_v47  ;;  %v2576_v21 = vmul.f32 %v6987_v14, %v7007_v48 }
 0x264   : > { %v1516_v24 = vmul.f32 %v6903_v20, %v1482_v16  ;;  %v1780_v43 = vmax.f32 %v1748_v34, 0.0  ;;  %v2310_v63 = vadd.f32 %v2278_v40, %v2244_v23  ;;  %v423_v46 = vmul.f32 %v6700_v13, %v7063_v17 }
 0x265   : > { %v1250_v55 = vadd.f32 %v1218_v59, %v952_v60  ;;  %v2078_v27 = vmax.f32 %v2046_v51, 0.0  ;;  %v2542_v7 = vadd.f32 %v2510_v53, %v2476_v44  ;;  %v457_v54 = vmul.f32 %v6706_v26, %v7068_v9  ;;  %v7437_v53 = vld [vmem:[#allocation23_spill] sm:$0xff] }
 0x266   : > { %v1814_v47 = vmul.f32 %v6916_v29, %v1780_v43  ;;  %v2344_v22 = vadd.f32 %v6911_v18, %v2310_v63  ;;  %v523_v48 = vmul.f32 %v6710_v4, %v7076_v10  ;;  %v689_v6 = vmul.f32 %v6799_v8, %v7063_v17 }
 0x267   : > { %v1548_v40 = vadd.f32 %v1516_v24, %v1250_v55  ;;  %v2112_v16 = vmul.f32 %v6929_v38, %v2078_v27  ;;  %v2608_v13 = vadd.f32 %v2576_v21, %v2542_v7  ;;  %v489_v59 = vadd.f32 %v457_v54, %v423_v46 }
 0x268   : > { %v2376_v34 = vmax.f32 %v2344_v22, 0.0  ;;  %v723_v44 = vmul.f32 %v6804_v28, %v7068_v9  ;;  %v789_v26 = vmul.f32 %v6808_v0, %v7076_v10  ;;  %v987_v23 = vmul.f32 %v6812_v19, %v7063_v17 }
 0x269   : > { %v1846_v60 = vadd.f32 %v1814_v47, %v1548_v40  ;;  %v2642_v4 = vadd.f32 %v7010_v62, %v2608_v13  ;;  %v555_v51 = vadd.f32 %v523_v48, %v489_v59  ;;  %v1021_v8 = vmul.f32 %v6819_v25, %v7068_v9 }
 0x26a   : > { %v2410_v21 = vmul.f32 %v7437_v53, %v2376_v34  ;;  %v755_v24 = vadd.f32 %v723_v44, %v689_v6  ;;  %v1087_v43 = vmul.f32 %v6823_v33, %v7076_v10  ;;  %v1285_v28 = vmul.f32 %v6828_v35, %v7063_v17 }
 0x26b   : > { %v2144_v0 = vadd.f32 %v2112_v16, %v1846_v60  ;;  %v2674_v63 = vmax.f32 %v2642_v4, 0.0  ;;  %v589_v19 = vadd.f32 %v6732_v56, %v555_v51  ;;  %v1053_v46 = vadd.f32 %v1021_v8, %v987_v23  ;;  %v2745_v23 = vpop.xlane.xlu0 %2744 }
 0x26c   : > { %v821_v55 = vadd.f32 %v789_v26, %v755_v24  ;;  %v1319_v27 = vmul.f32 %v6832_v1, %v7068_v9  ;;  %v1385_v25 = vmul.f32 %v6836_v30, %v7076_v10  ;;  %v1583_v7 = vmul.f32 %v6841_v37, %v7063_v17 }
 0x26d   : > { %v2442_v54 = vadd.f32 %v2410_v21, %v2144_v0  ;;  %v2708_v33 = vmul.f32 %v7025_v15, %v2674_v63  ;;  %v621_v47 = vmax.f32 %v589_v19, 0.0  ;;  %v1119_v35 = vadd.f32 %v1087_v43, %v1053_v46  ;;  %v3143_v43 = vld [vmem:[#allocation1] sm:$0xff] }
 0x26e   : > { %v855_v22 = vadd.f32 %v6742_v49, %v821_v55  ;;  %v1351_v48 = vadd.f32 %v1319_v27, %v1285_v28  ;;  %v1617_v56 = vmul.f32 %v6846_v45, %v7068_v9  ;;  %v1683_v1 = vmul.f32 %v6851_v11, %v7076_v10 }
 0x26f   : > { %v2740_v6 = vadd.f32 %v2708_v33, %v2442_v54  ;;  %v655_v30 = vmul.f32 %v6751_v39, %v621_v47  ;;  %v1153_v40 = vadd.f32 %v6754_v32, %v1119_v35  ;;  %v1881_v37 = vmul.f32 %v6855_v50, %v7063_v17 }
 0x270   : > { %v887_v16 = vmax.f32 %v855_v22, 0.0  ;;  %v1417_v13 = vadd.f32 %v1385_v25, %v1351_v48  ;;  %v1649_v59 = vadd.f32 %v1617_v56, %v1583_v7  ;;  %v1915_v49 = vmul.f32 %v6860_v5, %v7068_v9  ;;  %v2747_v48 = vpop.xlane.xlu1 %2746 }
 0x271   : > { %2802 = vadd.xlane.f32.xlu0 %v2740_v6  ;;  %v1185_v34 = vmax.f32 %v1153_v40, 0.0  ;;  %v1981_v45 = vmul.f32 %v6864_v42, %v7076_v10  ;;  %v2179_v11 = vmul.f32 %v6868_v3, %v7063_v17  ;;  %v2213_v39 = vmul.f32 %v6872_v12, %v7068_v9 }
 0x272   : > { %v921_v32 = vmul.f32 %v6763_v58, %v887_v16  ;;  %v1451_v50 = vadd.f32 %v6877_v57, %v1417_v13  ;;  %v1715_v44 = vadd.f32 %v1683_v1, %v1649_v59  ;;  %v1947_v26 = vadd.f32 %v1915_v49, %v1881_v37 }
 0x273   : > { %v1219_v5 = vmul.f32 %v6776_v36, %v1185_v34  ;;  %v2245_v60 = vadd.f32 %v2213_v39, %v2179_v11  ;;  %v2279_v4 = vmul.f32 %v6880_v52, %v7076_v10  ;;  %v2477_v42 = vmul.f32 %v6973_v31, %v7063_v17  ;;  %v7438_v36 = vld [vmem:[#allocation17_spill] sm:$0xff] }
 0x274   : > { %v953_v3 = vadd.f32 %v921_v32, %v655_v30  ;;  %v1483_v51 = vmax.f32 %v1451_v50, 0.0  ;;  %v1749_v12 = vadd.f32 %v6890_v2, %v1715_v44  ;;  %v2013_v8 = vadd.f32 %v1981_v45, %v1947_v26 }
 0x275   : > { %v2311_v58 = vadd.f32 %v2279_v4, %v2245_v60  ;;  %v2511_v57 = vmul.f32 %v6983_v41, %v7068_v9  ;;  %v2577_v21 = vmul.f32 %v6987_v14, %v7076_v10  ;;  %v2809_v24 = vadd.f32 %v7438_v36, %v2745_v23  ;;  %v2751_v60 = vpop.xlane.xlu2 %2750 }
 0x276   : > { %v1251_v28 = vadd.f32 %v1219_v5, %v953_v3  ;;  %v1517_v52 = vmul.f32 %v6903_v20, %v1483_v51  ;;  %v1781_v0 = vmax.f32 %v1749_v12, 0.0  ;;  %v2047_v31 = vadd.f32 %v6908_v61, %v2013_v8 }
 0x277   : > { %v2345_v17 = vadd.f32 %v6911_v18, %v2311_v58  ;;  %v2543_v2 = vadd.f32 %v2511_v57, %v2477_v42  ;;  %v2880_v63 = vperm.slane %v2809_v24, 0  ;;  %v2881_v19 = vperm.slane %v2809_v24, 1 }
 0x278   : > { %v1549_v46 = vadd.f32 %v1517_v52, %v1251_v28  ;;  %v1815_v41 = vmul.f32 %v6916_v29, %v1781_v0  ;;  %v2079_v9 = vmax.f32 %v2047_v31, 0.0  ;;  %v2882_v55 = vperm.slane %v2809_v24, 2 }
 0x279   : > { %v2377_v14 = vmax.f32 %v2345_v17, 0.0  ;;  %v2609_v10 = vadd.f32 %v2577_v21, %v2543_v2  ;;  %v2883_v27 = vperm.slane %v2809_v24, 3  ;;  %v2884_v25 = vperm.slane %v2809_v24, 4  ;;  %3144 = vst [vmem:[#allocation1] ss:$9 sm:$0xff] %v2880_v63 }
 0x27a   : > { %v1847_v7 = vadd.f32 %v1815_v41, %v1549_v46  ;;  %v2113_v20 = vmul.f32 %v6929_v38, %v2079_v9  ;;  %v2885_v54 = vperm.slane %v2809_v24, 5  ;;  %3145 = vst [vmem:[#allocation1 + $0x1] ss:$9 sm:$0xff] %v2881_v19  ;;  %v2886_v33 = vperm.slane %v2809_v24, 6  ;;  %v2755_v9 = vpop.xlane.xlu0 %2754 }
 0x27b   : > { %v2411_v61 = vmul.f32 %v7437_v53, %v2377_v14  ;;  %v2643_v18 = vadd.f32 %v7010_v62, %v2609_v10  ;;  %3146 = vst [vmem:[#allocation1 + $0x2] ss:$9 sm:$0xff] %v2882_v55  ;;  %v2887_v29 = vperm.slane %v2809_v24, 7  ;;  %v4246_v35 = vmov 0  }
 0x27c   : > { %v2145_v47 = vadd.f32 %v2113_v20, %v1847_v7  ;;  %3147 = vst [vmem:[#allocation1 + $0x3] ss:$9 sm:$0xff] %v2883_v27  ;;  %3840 = vset.pattern.permute.xlu2 %v4246_v35  ;;  %3841 = vset.pattern.permute.xlu0 %v4246_v35  ;;  %v2810_v62 = vadd.f32 %v7438_v36, %v2747_v48  ;;  %vm3532_vm2 = vcmask 261312   ;;  %vm3536_vm3 = vcmask 326912  }
 0x27d   : > { %v2675_v22 = vmax.f32 %v2643_v18, 0.0  ;;  %3148 = vst [vmem:[#allocation1 + $0x4] ss:$9 sm:$0xff] %v2884_v25  ;;  %3424 = vperm.xlu2 %3840, %v3143_v43   ;;  %3842 = vset.pattern.permute.xlu1 %v4246_v35  ;;  %v2812_v4 = vadd.f32 %v7438_v36, %v2751_v60  ;;  %v2753_v43 = vpop.xlane.xlu2 %2752  ;;  %v2814_v55 = vadd.f32 %v7438_v36, %v2755_v9  ;;  %vm3540_vm4 = vcmask 392512  }
 0x27e   : > { %v2443_v38 = vadd.f32 %v2411_v61, %v2145_v47  ;;  %3149 = vst [vmem:[#allocation1 + $0x5] ss:$9 sm:$0xff] %v2885_v54  ;;  %v2888_v1 = vperm.slane %v2810_v62, 0  ;;  %v2889_v6 = vperm.slane %v2810_v62, 1  ;;  %v2890_v30 = vperm.slane %v2810_v62, 2 }
 0x27f   : > { %v2709_v56 = vmul.f32 %v7025_v15, %v2675_v22  ;;  %3150 = vst [vmem:[#allocation1 + $0x6] ss:$9 sm:$0xff] %v2886_v33  ;;  %v2891_v37 = vperm.slane %v2810_v62, 3  ;;  %v2892_v16 = vperm.slane %v2810_v62, 4  ;;  %v2893_v13 = vperm.slane %v2810_v62, 5  ;;  %v2749_v15 = vpop.xlane.xlu1 %2748 }
 0x280   : > { %3151 = vst [vmem:[#allocation1 + $0x7] ss:$9 sm:$0xff] %v2887_v29  ;;  %v2894_v59 = vperm.slane %v2810_v62, 6  ;;  %v2895_v49 = vperm.slane %v2810_v62, 7  ;;  %v2811_v34 = vadd.f32 %v7438_v36, %v2749_v15  ;;  %v2904_v42 = vperm.slane %v2812_v4, 0 }
 0x281   : > { %v2741_v53 = vadd.f32 %v2709_v56, %v2443_v38  ;;  %v2905_v3 = vperm.slane %v2812_v4, 1  ;;  %v2906_v51 = vperm.slane %v2812_v4, 2  ;;  %v2907_v12 = vperm.slane %v2812_v4, 3 }
 0x282   : > { %v2896_v45 = vperm.slane %v2811_v34, 0  ;;  %v2897_v11 = vperm.slane %v2811_v34, 1  ;;  %v2898_v39 = vperm.slane %v2811_v34, 2  ;;  %v2899_v50 = vperm.slane %v2811_v34, 3 }
 0x283   : > { %2804 = vadd.xlane.f32.xlu1 %v2741_v53  ;;  %v2900_v44 = vperm.slane %v2811_v34, 4  ;;  %v2901_v26 = vperm.slane %v2811_v34, 5  ;;  %v2902_v23 = vperm.slane %v2811_v34, 6  ;;  %v2903_v5 = vperm.slane %v2811_v34, 7 }
 0x284   : > { %v2908_v58 = vperm.slane %v2812_v4, 4  ;;  %v2909_v57 = vperm.slane %v2812_v4, 5  ;;  %v2910_v21 = vperm.slane %v2812_v4, 6  ;;  %v2911_v24 = vperm.slane %v2812_v4, 7 }
 0x285   : > { %v2813_v28 = vadd.f32 %v7438_v36, %v2753_v43  ;;  %v2920_v14 = vperm.slane %v2814_v55, 0  ;;  %v2921_v10 = vperm.slane %v2814_v55, 1  ;;  %v2922_v27 = vperm.slane %v2814_v55, 2 }
 0x286   : > { %v2923_v7 = vperm.slane %v2814_v55, 3  ;;  %v2924_v20 = vperm.slane %v2814_v55, 4  ;;  %v2925_v54 = vperm.slane %v2814_v55, 5  ;;  %v2926_v61 = vperm.slane %v2814_v55, 6 }
 0x287   : > { %v3152_v40 = vld [vmem:[#allocation1] sm:$0xff]  ;;  %v2912_v52 = vperm.slane %v2813_v28, 0  ;;  %v2913_v0 = vperm.slane %v2813_v28, 1  ;;  %v2914_v31 = vperm.slane %v2813_v28, 2  ;;  %v2915_v2 = vperm.slane %v2813_v28, 3  ;;  %v2757_v33 = vpop.xlane.xlu1 %2756 }
 0x288   : > { %3153 = vst [vmem:[#allocation1] ss:$9 sm:$0xff] %v2888_v1  ;;  %3427 = vperm.xlu0 %3841, %v3152_v40   ;;  %v2916_v63 = vperm.slane %v2813_v28, 4  ;;  %v2917_v19 = vperm.slane %v2813_v28, 5  ;;  %v2918_v46 = vperm.slane %v2813_v28, 6  ;;  %v2919_v41 = vperm.slane %v2813_v28, 7 }
 0x289   : > { %3154 = vst [vmem:[#allocation1 + $0x1] ss:$9 sm:$0xff] %v2889_v6  ;;  %v2927_v18 = vperm.slane %v2814_v55, 7  ;;  %v2815_v47 = vadd.f32 %v7438_v36, %v2757_v33  ;;  %v2759_v6 = vpop.xlane.xlu2 %2758  ;;  %vm3544_vm5 = vcmask 458112   ;;  %vm3548_vm6 = vcmask 523712  }
 0x28a   : > { %3155 = vst [vmem:[#allocation1 + $0x2] ss:$9 sm:$0xff] %v2890_v30  ;;  %v2816_v30 = vadd.f32 %v7438_v36, %v2759_v6  ;;  %vm3552_vm7 = vcmask 589312   ;;  %vm3556_vm8 = vcmask 654912   ;;  %vm3560_vm9 = vcmask 720512  }
 0x28b   : > { %3156 = vst [vmem:[#allocation1 + $0x3] ss:$9 sm:$0xff] %v2891_v37  ;;  %v2928_v29 = vperm.slane %v2815_v47, 0  ;;  %v2929_v35 = vperm.slane %v2815_v47, 1  ;;  %v2930_v22 = vperm.slane %v2815_v47, 2  ;;  %v2931_v38 = vperm.slane %v2815_v47, 3 }
 0x28c   : > { %3157 = vst [vmem:[#allocation1 + $0x4] ss:$9 sm:$0xff] %v2892_v16  ;;  %v2932_v56 = vperm.slane %v2815_v47, 4  ;;  %v2933_v62 = vperm.slane %v2815_v47, 5  ;;  %v2934_v53 = vperm.slane %v2815_v47, 6  ;;  %v2935_v1 = vperm.slane %v2815_v47, 7 }
 0x28d   : > { %3158 = vst [vmem:[#allocation1 + $0x5] ss:$9 sm:$0xff] %v2893_v13  ;;  %v2936_v40 = vperm.slane %v2816_v30, 0  ;;  %v2937_v37 = vperm.slane %v2816_v30, 1  ;;  %v2938_v16 = vperm.slane %v2816_v30, 2  ;;  %v2939_v13 = vperm.slane %v2816_v30, 3 }
 0x28e   : > { %3159 = vst [vmem:[#allocation1 + $0x6] ss:$9 sm:$0xff] %v2894_v59  ;;  %v2941_v15 = vperm.slane %v2816_v30, 5  ;;  %v2942_v34 = vperm.slane %v2816_v30, 6  ;;  %vm3564_vm10 = vcmask 786112   ;;  %vm3568_vm11 = vcmask 851712  }
 0x28f   : > { %3160 = vst [vmem:[#allocation1 + $0x7] ss:$9 sm:$0xff] %v2895_v49  ;;  %v2940_v49 = vperm.slane %v2816_v30, 4  ;;  %vm3572_vm12 = vcmask 917312   ;;  %vm3576_vm13 = vcmask 982912   ;;  %vm3580_vm14 = vcmask 1048512  }
 0x290   : > { %vm3614_vm15 = vcmask 1040384  }
 0x296   : > { %v3161_v32 = vld [vmem:[#allocation1] sm:$0xff] }
 0x297   : > { %3162 = vst [vmem:[#allocation1] ss:$9 sm:$0xff] %v2896_v45  ;;  %v2943_v45 = vperm.slane %v2816_v30, 7 }
 0x298   : > { %3163 = vst [vmem:[#allocation1 + $0x1] ss:$9 sm:$0xff] %v2897_v11  ;;  %v2761_v11 = vpop.xlane.xlu0 %2760 }
 0x299   : > { %3164 = vst [vmem:[#allocation1 + $0x2] ss:$9 sm:$0xff] %v2898_v39  ;;  %v2817_v39 = vadd.f32 %v7438_v36, %v2761_v11 }
 0x29a   : > { %3165 = vst [vmem:[#allocation1 + $0x3] ss:$9 sm:$0xff] %v2899_v50 }
 0x29b   : > { %3166 = vst [vmem:[#allocation1 + $0x4] ss:$9 sm:$0xff] %v2900_v44  ;;  %v2945_v50 = vperm.slane %v2817_v39, 1  ;;  %v2946_v44 = vperm.slane %v2817_v39, 2  ;;  %v2949_v60 = vperm.slane %v2817_v39, 5  ;;  %v2950_v4 = vperm.slane %v2817_v39, 6 }
 0x29c   : > { %3167 = vst [vmem:[#allocation1 + $0x5] ss:$9 sm:$0xff] %v2901_v26  ;;  %3430 = vperm.xlu1 %3842, %v3161_v32   ;;  %v2944_v32 = vperm.slane %v2817_v39, 0 }
 0x29d   : > { %3168 = vst [vmem:[#allocation1 + $0x6] ss:$9 sm:$0xff] %v2902_v23  ;;  %v2947_v23 = vperm.slane %v2817_v39, 3 }
 0x29e   : > { %3169 = vst [vmem:[#allocation1 + $0x7] ss:$9 sm:$0xff] %v2903_v5  ;;  %v2948_v5 = vperm.slane %v2817_v39, 4 }
 0x2a5   : > { %v3170_v8 = vld [vmem:[#allocation1] sm:$0xff] }
 0x2a6   : > { %3171 = vst [vmem:[#allocation1] ss:$9 sm:$0xff] %v2904_v42  ;;  %3433 = vperm.xlu2 %3840, %v3170_v8   ;;  %v2951_v42 = vperm.slane %v2817_v39, 7 }
 0x2a7   : > { %3172 = vst [vmem:[#allocation1 + $0x1] ss:$9 sm:$0xff] %v2905_v3  ;;  %v2763_v3 = vpop.xlane.xlu1 %2762 }
 0x2a8   : > { %3173 = vst [vmem:[#allocation1 + $0x2] ss:$9 sm:$0xff] %v2906_v51  ;;  %v2818_v51 = vadd.f32 %v7438_v36, %v2763_v3 }
 0x2a9   : > { %3174 = vst [vmem:[#allocation1 + $0x3] ss:$9 sm:$0xff] %v2907_v12 }
 0x2aa   : > { %3175 = vst [vmem:[#allocation1 + $0x4] ss:$9 sm:$0xff] %v2908_v58  ;;  %v2952_v12 = vperm.slane %v2818_v51, 0  ;;  %v2953_v8 = vperm.slane %v2818_v51, 1  ;;  %v2954_v58 = vperm.slane %v2818_v51, 2  ;;  %v2957_v43 = vperm.slane %v2818_v51, 5 }
 0x2ab   : > { %3176 = vst [vmem:[#allocation1 + $0x5] ss:$9 sm:$0xff] %v2909_v57  ;;  %v2958_v28 = vperm.slane %v2818_v51, 6 }
 0x2ac   : > { %3177 = vst [vmem:[#allocation1 + $0x6] ss:$9 sm:$0xff] %v2910_v21  ;;  %v2955_v21 = vperm.slane %v2818_v51, 3 }
 0x2ad   : > { %3178 = vst [vmem:[#allocation1 + $0x7] ss:$9 sm:$0xff] %v2911_v24  ;;  %v2956_v24 = vperm.slane %v2818_v51, 4 }
 0x2b4   : > { %v3179_v17 = vld [vmem:[#allocation1] sm:$0xff] }
 0x2b5   : > { %3180 = vst [vmem:[#allocation1] ss:$9 sm:$0xff] %v2912_v52  ;;  %3436 = vperm.xlu2 %3840, %v3179_v17   ;;  %v2959_v52 = vperm.slane %v2818_v51, 7 }
 0x2b6   : > { %3181 = vst [vmem:[#allocation1 + $0x1] ss:$9 sm:$0xff] %v2913_v0  ;;  %v2765_v0 = vpop.xlane.xlu2 %2764 }
 0x2b7   : > { %3182 = vst [vmem:[#allocation1 + $0x2] ss:$9 sm:$0xff] %v2914_v31  ;;  %v2819_v31 = vadd.f32 %v7438_v36, %v2765_v0 }
 0x2b8   : > { %3183 = vst [vmem:[#allocation1 + $0x3] ss:$9 sm:$0xff] %v2915_v2 }
 0x2b9   : > { %3184 = vst [vmem:[#allocation1 + $0x4] ss:$9 sm:$0xff] %v2916_v63  ;;  %v2960_v17 = vperm.slane %v2819_v31, 0  ;;  %v2961_v2 = vperm.slane %v2819_v31, 1  ;;  %v2962_v63 = vperm.slane %v2819_v31, 2  ;;  %v2965_v9 = vperm.slane %v2819_v31, 5 }
 0x2ba   : > { %3185 = vst [vmem:[#allocation1 + $0x5] ss:$9 sm:$0xff] %v2917_v19  ;;  %v2963_v19 = vperm.slane %v2819_v31, 3  ;;  %v2966_v55 = vperm.slane %v2819_v31, 6 }
 0x2bb   : > { %3186 = vst [vmem:[#allocation1 + $0x6] ss:$9 sm:$0xff] %v2918_v46 }
 0x2bc   : > { %3187 = vst [vmem:[#allocation1 + $0x7] ss:$9 sm:$0xff] %v2919_v41  ;;  %v2964_v41 = vperm.slane %v2819_v31, 4 }
 0x2c3   : > { %v3188_v25 = vld [vmem:[#allocation1] sm:$0xff] }
 0x2c4   : > { %3189 = vst [vmem:[#allocation1] ss:$9 sm:$0xff] %v2920_v14  ;;  %3439 = vperm.xlu1 %3842, %v3188_v25   ;;  %v2967_v14 = vperm.slane %v2819_v31, 7 }
 0x2c5   : > { %3190 = vst [vmem:[#allocation1 + $0x1] ss:$9 sm:$0xff] %v2921_v10  ;;  %v2767_v10 = vpop.xlane.xlu0 %2766 }
 0x2c6   : > { %3191 = vst [vmem:[#allocation1 + $0x2] ss:$9 sm:$0xff] %v2922_v27  ;;  %v2820_v27 = vadd.f32 %v7438_v36, %v2767_v10 }
 0x2c7   : > { %3192 = vst [vmem:[#allocation1 + $0x3] ss:$9 sm:$0xff] %v2923_v7 }
 0x2c8   : > { %3193 = vst [vmem:[#allocation1 + $0x4] ss:$9 sm:$0xff] %v2924_v20  ;;  %v2968_v25 = vperm.slane %v2820_v27, 0  ;;  %v2969_v7 = vperm.slane %v2820_v27, 1  ;;  %v2970_v20 = vperm.slane %v2820_v27, 2  ;;  %v2973_v33 = vperm.slane %v2820_v27, 5 }
 0x2c9   : > { %3194 = vst [vmem:[#allocation1 + $0x5] ss:$9 sm:$0xff] %v2925_v54  ;;  %v2974_v47 = vperm.slane %v2820_v27, 6 }
 0x2ca   : > { %3195 = vst [vmem:[#allocation1 + $0x6] ss:$9 sm:$0xff] %v2926_v61  ;;  %v2971_v61 = vperm.slane %v2820_v27, 3 }
 0x2cb   : > { %3196 = vst [vmem:[#allocation1 + $0x7] ss:$9 sm:$0xff] %v2927_v18  ;;  %v2972_v18 = vperm.slane %v2820_v27, 4 }
 0x2d2   : > { %v3197_v48 = vld [vmem:[#allocation1] sm:$0xff] }
 0x2d3   : > { %3198 = vst [vmem:[#allocation1] ss:$9 sm:$0xff] %v2928_v29  ;;  %3442 = vperm.xlu2 %3840, %v3197_v48   ;;  %v2975_v29 = vperm.slane %v2820_v27, 7 }
 0x2d4   : > { %3199 = vst [vmem:[#allocation1 + $0x1] ss:$9 sm:$0xff] %v2929_v35  ;;  %v2769_v35 = vpop.xlane.xlu1 %2768 }
 0x2d5   : > { %3200 = vst [vmem:[#allocation1 + $0x2] ss:$9 sm:$0xff] %v2930_v22  ;;  %v2821_v22 = vadd.f32 %v7438_v36, %v2769_v35 }
 0x2d6   : > { %3201 = vst [vmem:[#allocation1 + $0x3] ss:$9 sm:$0xff] %v2931_v38 }
 0x2d7   : > { %3202 = vst [vmem:[#allocation1 + $0x4] ss:$9 sm:$0xff] %v2932_v56  ;;  %v2976_v48 = vperm.slane %v2821_v22, 0  ;;  %v2977_v38 = vperm.slane %v2821_v22, 1  ;;  %v2978_v56 = vperm.slane %v2821_v22, 2  ;;  %v2981_v6 = vperm.slane %v2821_v22, 5 }
 0x2d8   : > { %3203 = vst [vmem:[#allocation1 + $0x5] ss:$9 sm:$0xff] %v2933_v62  ;;  %v2982_v30 = vperm.slane %v2821_v22, 6 }
 0x2d9   : > { %3204 = vst [vmem:[#allocation1 + $0x6] ss:$9 sm:$0xff] %v2934_v53  ;;  %v2979_v53 = vperm.slane %v2821_v22, 3 }
 0x2da   : > { %3205 = vst [vmem:[#allocation1 + $0x7] ss:$9 sm:$0xff] %v2935_v1  ;;  %v2980_v1 = vperm.slane %v2821_v22, 4 }
 0x2e1   : > { %v3206_v59 = vld [vmem:[#allocation1] sm:$0xff] }
 0x2e2   : > { %3207 = vst [vmem:[#allocation1] ss:$9 sm:$0xff] %v2936_v40  ;;  %3445 = vperm.xlu1 %3842, %v3206_v59   ;;  %v2983_v40 = vperm.slane %v2821_v22, 7 }
 0x2e3   : > { %3208 = vst [vmem:[#allocation1 + $0x1] ss:$9 sm:$0xff] %v2937_v37  ;;  %v2771_v37 = vpop.xlane.xlu2 %2770 }
 0x2e4   : > { %3209 = vst [vmem:[#allocation1 + $0x2] ss:$9 sm:$0xff] %v2938_v16  ;;  %v2822_v16 = vadd.f32 %v7438_v36, %v2771_v37 }
 0x2e5   : > { %3210 = vst [vmem:[#allocation1 + $0x3] ss:$9 sm:$0xff] %v2939_v13 }
 0x2e6   : > { %3211 = vst [vmem:[#allocation1 + $0x4] ss:$9 sm:$0xff] %v2940_v49  ;;  %v2984_v13 = vperm.slane %v2822_v16, 0  ;;  %v2985_v59 = vperm.slane %v2822_v16, 1  ;;  %v2986_v49 = vperm.slane %v2822_v16, 2  ;;  %v2989_v11 = vperm.slane %v2822_v16, 5 }
 0x2e7   : > { %3212 = vst [vmem:[#allocation1 + $0x5] ss:$9 sm:$0xff] %v2941_v15  ;;  %v2987_v15 = vperm.slane %v2822_v16, 3  ;;  %v2990_v39 = vperm.slane %v2822_v16, 6 }
 0x2e8   : > { %3213 = vst [vmem:[#allocation1 + $0x6] ss:$9 sm:$0xff] %v2942_v34 }
 0x2e9   : > { %3214 = vst [vmem:[#allocation1 + $0x7] ss:$9 sm:$0xff] %v2943_v45  ;;  %v2988_v45 = vperm.slane %v2822_v16, 4 }
 0x2f0   : > { %v3215_v26 = vld [vmem:[#allocation1] sm:$0xff] }
 0x2f1   : > { %3216 = vst [vmem:[#allocation1] ss:$9 sm:$0xff] %v2944_v32  ;;  %3448 = vperm.xlu0 %3841, %v3215_v26   ;;  %v2991_v32 = vperm.slane %v2822_v16, 7 }
 0x2f2   : > { %3217 = vst [vmem:[#allocation1 + $0x1] ss:$9 sm:$0xff] %v2945_v50  ;;  %v2773_v50 = vpop.xlane.xlu0 %2772 }
 0x2f3   : > { %3218 = vst [vmem:[#allocation1 + $0x2] ss:$9 sm:$0xff] %v2946_v44  ;;  %v2823_v44 = vadd.f32 %v7438_v36, %v2773_v50 }
 0x2f4   : > { %3219 = vst [vmem:[#allocation1 + $0x3] ss:$9 sm:$0xff] %v2947_v23 }
 0x2f5   : > { %3220 = vst [vmem:[#allocation1 + $0x4] ss:$9 sm:$0xff] %v2948_v5  ;;  %v2992_v26 = vperm.slane %v2823_v44, 0  ;;  %v2993_v23 = vperm.slane %v2823_v44, 1  ;;  %v2994_v5 = vperm.slane %v2823_v44, 2  ;;  %v2997_v3 = vperm.slane %v2823_v44, 5 }
 0x2f6   : > { %3221 = vst [vmem:[#allocation1 + $0x5] ss:$9 sm:$0xff] %v2949_v60  ;;  %v2998_v51 = vperm.slane %v2823_v44, 6 }
 0x2f7   : > { %3222 = vst [vmem:[#allocation1 + $0x6] ss:$9 sm:$0xff] %v2950_v4  ;;  %v2995_v4 = vperm.slane %v2823_v44, 3 }
 0x2f8   : > { %3223 = vst [vmem:[#allocation1 + $0x7] ss:$9 sm:$0xff] %v2951_v42  ;;  %v2996_v42 = vperm.slane %v2823_v44, 4 }
 0x2ff   : > { %v3224_v57 = vld [vmem:[#allocation1] sm:$0xff] }
 0x300   : > { %3225 = vst [vmem:[#allocation1] ss:$9 sm:$0xff] %v2952_v12  ;;  %3451 = vperm.xlu2 %3840, %v3224_v57   ;;  %v2999_v12 = vperm.slane %v2823_v44, 7  ;;  %v3519_v44 = vlaneseq }
 0x301   : > { %3226 = vst [vmem:[#allocation1 + $0x1] ss:$9 sm:$0xff] %v2953_v8  ;;  %v2777_v8 = vpop.xlane.xlu2 %2776 }
 0x302   : > { %3227 = vst [vmem:[#allocation1 + $0x2] ss:$9 sm:$0xff] %v2954_v58  ;;  %v2775_v58 = vpop.xlane.xlu1 %2774 }
 0x303   : > { %3228 = vst [vmem:[#allocation1 + $0x3] ss:$9 sm:$0xff] %v2955_v21  ;;  %v2824_v57 = vadd.f32 %v7438_v36, %v2775_v58 }
 0x304   : > { %3229 = vst [vmem:[#allocation1 + $0x4] ss:$9 sm:$0xff] %v2956_v24 }
 0x305   : > { %3230 = vst [vmem:[#allocation1 + $0x5] ss:$9 sm:$0xff] %v2957_v43  ;;  %v3000_v21 = vperm.slane %v2824_v57, 0  ;;  %v3001_v24 = vperm.slane %v2824_v57, 1  ;;  %v3002_v43 = vperm.slane %v2824_v57, 2  ;;  %v3003_v0 = vperm.slane %v2824_v57, 3 }
 0x306   : > { %3231 = vst [vmem:[#allocation1 + $0x6] ss:$9 sm:$0xff] %v2958_v28  ;;  %v3004_v31 = vperm.slane %v2824_v57, 4 }
 0x307   : > { %3232 = vst [vmem:[#allocation1 + $0x7] ss:$9 sm:$0xff] %v2959_v52 }
 0x309   : > { %v7165_v28 = vpop.xlane.xlu2 %2782 }
 0x30e   : > { %v3233_v46 = vld [vmem:[#allocation1] sm:$0xff] }
 0x30f   : > { %3234 = vst [vmem:[#allocation1] ss:$9 sm:$0xff] %v2960_v17  ;;  %3454 = vperm.xlu1 %3842, %v3233_v46   ;;  %v3005_v17 = vperm.slane %v2824_v57, 5  ;;  %v2825_v46 = vadd.f32 %v7438_v36, %v2777_v8 }
 0x310   : > { %3235 = vst [vmem:[#allocation1 + $0x1] ss:$9 sm:$0xff] %v2961_v2  ;;  %v3006_v2 = vperm.slane %v2824_v57, 6 }
 0x311   : > { %3236 = vst [vmem:[#allocation1 + $0x2] ss:$9 sm:$0xff] %v2962_v63  ;;  %v2779_v63 = vpop.xlane.xlu0 %2778  ;;  %v3010_v27 = vperm.slane %v2825_v46, 2 }
 0x312   : > { %3237 = vst [vmem:[#allocation1 + $0x3] ss:$9 sm:$0xff] %v2963_v19  ;;  %v3007_v19 = vperm.slane %v2824_v57, 7 }
 0x313   : > { %3238 = vst [vmem:[#allocation1 + $0x4] ss:$9 sm:$0xff] %v2964_v41  ;;  %v7168_v41 = vpop.xlane.xlu2 %2788 }
 0x314   : > { %3239 = vst [vmem:[#allocation1 + $0x5] ss:$9 sm:$0xff] %v2965_v9  ;;  %v2781_v9 = vpop.xlane.xlu1 %2780 }
 0x315   : > { %3240 = vst [vmem:[#allocation1 + $0x6] ss:$9 sm:$0xff] %v2966_v55  ;;  %v3008_v55 = vperm.slane %v2825_v46, 0 }
 0x316   : > { %3241 = vst [vmem:[#allocation1 + $0x7] ss:$9 sm:$0xff] %v2967_v14  ;;  %v3009_v14 = vperm.slane %v2825_v46, 1 }
 0x319   : > { %v7170_v10 = vpop.xlane.xlu0 %2784 }
 0x31d   : > { %v3242_v54 = vld [vmem:[#allocation1] sm:$0xff] }
 0x31e   : > { %3243 = vst [vmem:[#allocation1] ss:$9 sm:$0xff] %v2968_v25  ;;  %3457 = vperm.xlu0 %3841, %v3242_v54   ;;  %v3011_v25 = vperm.slane %v2825_v46, 3  ;;  %v3013_v54 = vperm.slane %v2825_v46, 5 }
 0x31f   : > { %3244 = vst [vmem:[#allocation1 + $0x1] ss:$9 sm:$0xff] %v2969_v7 }
 0x320   : > { %3245 = vst [vmem:[#allocation1 + $0x2] ss:$9 sm:$0xff] %v2970_v20  ;;  %v3012_v20 = vperm.slane %v2825_v46, 4 }
 0x321   : > { %3246 = vst [vmem:[#allocation1 + $0x3] ss:$9 sm:$0xff] %v2971_v61  ;;  %v3014_v61 = vperm.slane %v2825_v46, 6  ;;  %v7177_v35 = vpop.xlane.xlu0 %2790 }
 0x322   : > { %3247 = vst [vmem:[#allocation1 + $0x4] ss:$9 sm:$0xff] %v2972_v18  ;;  %v3015_v18 = vperm.slane %v2825_v46, 7 }
 0x323   : > { %3248 = vst [vmem:[#allocation1 + $0x5] ss:$9 sm:$0xff] %v2973_v33  ;;  %v7172_v33 = vpop.xlane.xlu2 %2794 }
 0x324   : > { %3249 = vst [vmem:[#allocation1 + $0x6] ss:$9 sm:$0xff] %v2974_v47  ;;  %v7174_v47 = vpop.xlane.xlu1 %2786 }
 0x325   : > { %3250 = vst [vmem:[#allocation1 + $0x7] ss:$9 sm:$0xff] %v2975_v29  ;;  %v2826_v29 = vadd.f32 %v7438_v36, %v2779_v63 }
 0x327   : > { %v3016_v22 = vperm.slane %v2826_v29, 0  ;;  %v3023_v16 = vperm.slane %v2826_v29, 7 }
 0x329   : > { %v7183_v37 = vpop.xlane.xlu0 %2796 }
 0x32c   : > { %v3251_v62 = vld [vmem:[#allocation1] sm:$0xff] }
 0x32d   : > { %3252 = vst [vmem:[#allocation1] ss:$9 sm:$0xff] %v2976_v48  ;;  %3460 = vperm.xlu2 %3840, %v3251_v62   ;;  %v3017_v48 = vperm.slane %v2826_v29, 1 }
 0x32e   : > { %3253 = vst [vmem:[#allocation1 + $0x1] ss:$9 sm:$0xff] %v2977_v38  ;;  %v3018_v38 = vperm.slane %v2826_v29, 2 }
 0x32f   : > { %3254 = vst [vmem:[#allocation1 + $0x2] ss:$9 sm:$0xff] %v2978_v56  ;;  %v7179_v56 = vpop.xlane.xlu2 %2800 }
 0x330   : > { %3255 = vst [vmem:[#allocation1 + $0x3] ss:$9 sm:$0xff] %v2979_v53  ;;  %v3019_v53 = vperm.slane %v2826_v29, 3 }
 0x331   : > { %3256 = vst [vmem:[#allocation1 + $0x4] ss:$9 sm:$0xff] %v2980_v1  ;;  %v7181_v1 = vpop.xlane.xlu1 %2792 }
 0x332   : > { %3257 = vst [vmem:[#allocation1 + $0x5] ss:$9 sm:$0xff] %v2981_v6  ;;  %v3020_v6 = vperm.slane %v2826_v29, 4 }
 0x333   : > { %3258 = vst [vmem:[#allocation1 + $0x6] ss:$9 sm:$0xff] %v2982_v30  ;;  %v3021_v30 = vperm.slane %v2826_v29, 5 }
 0x334   : > { %3259 = vst [vmem:[#allocation1 + $0x7] ss:$9 sm:$0xff] %v2983_v40  ;;  %v3022_v40 = vperm.slane %v2826_v29, 6 }
 0x33b   : > { %v3260_v34 = vld [vmem:[#allocation1] sm:$0xff] }
 0x33c   : > { %3261 = vst [vmem:[#allocation1] ss:$9 sm:$0xff] %v2984_v13  ;;  %3463 = vperm.xlu1 %3842, %v3260_v34   ;;  %v2827_v13 = vadd.f32 %v7438_v36, %v2781_v9 }
 0x33d   : > { %3262 = vst [vmem:[#allocation1 + $0x1] ss:$9 sm:$0xff] %v2985_v59  ;;  %v3425_v59 = vpop.permute.xlu2 %3424 }
 0x33e   : > { %3263 = vst [vmem:[#allocation1 + $0x2] ss:$9 sm:$0xff] %v2986_v49  ;;  %v7186_v49 = vpop.xlane.xlu1 %2798  ;;  %v3025_v34 = vperm.slane %v2827_v13, 1  ;;  %v3028_v50 = vperm.slane %v2827_v13, 4 }
 0x33f   : > { %3264 = vst [vmem:[#allocation1 + $0x3] ss:$9 sm:$0xff] %v2987_v15  ;;  %v3024_v15 = vperm.slane %v2827_v13, 0 }
 0x340   : > { %3265 = vst [vmem:[#allocation1 + $0x4] ss:$9 sm:$0xff] %v2988_v45  ;;  %v7188_v45 = vpop.xlane.xlu0 %2802 }
 0x341   : > { %3266 = vst [vmem:[#allocation1 + $0x5] ss:$9 sm:$0xff] %v2989_v11  ;;  %v3026_v11 = vperm.slane %v2827_v13, 2 }
 0x342   : > { %3267 = vst [vmem:[#allocation1 + $0x6] ss:$9 sm:$0xff] %v2990_v39 }
 0x343   : > { %3268 = vst [vmem:[#allocation1 + $0x7] ss:$9 sm:$0xff] %v2991_v32  ;;  %v3027_v32 = vperm.slane %v2827_v13, 3 }
 0x34a   : > { %v3269_v60 = vld [vmem:[#allocation1] sm:$0xff] }
 0x34b   : > { %3270 = vst [vmem:[#allocation1] ss:$9 sm:$0xff] %v2992_v26  ;;  %3466 = vperm.xlu0 %3841, %v3269_v60   ;;  %v3029_v26 = vperm.slane %v2827_v13, 5  ;;  %v7190_v60 = vpop.xlane.xlu1 %2804 }
 0x34c   : > { %3271 = vst [vmem:[#allocation1 + $0x1] ss:$9 sm:$0xff] %v2993_v23  ;;  %v3030_v23 = vperm.slane %v2827_v13, 6 }
 0x34d   : > { %3272 = vst [vmem:[#allocation1 + $0x2] ss:$9 sm:$0xff] %v2994_v5  ;;  %v3434_v5 = vpop.permute.xlu2 %3433 }
 0x34e   : > { %3273 = vst [vmem:[#allocation1 + $0x3] ss:$9 sm:$0xff] %v2995_v4  ;;  %v3031_v4 = vperm.slane %v2827_v13, 7  ;;  %v2830_v13 = vadd.f32 %v7438_v36, %v7174_v47  ;;  %v2831_v47 = vadd.f32 %v7438_v36, %v7168_v41  ;;  %v2832_v41 = vadd.f32 %v7438_v36, %v7177_v35 }
 0x34f   : > { %3274 = vst [vmem:[#allocation1 + $0x4] ss:$9 sm:$0xff] %v2996_v42  ;;  %v7193_v42 = vand.u32 127, %v3519_v44  ;;  %v2833_v35 = vadd.f32 %v7438_v36, %v7181_v1  ;;  %v2834_v1 = vadd.f32 %v7438_v36, %v7172_v33  ;;  %v2835_v33 = vadd.f32 %v7438_v36, %v7183_v37 }
 0x350   : > { %3275 = vst [vmem:[#allocation1 + $0x5] ss:$9 sm:$0xff] %v2997_v3  ;;  %v2836_v37 = vadd.f32 %v7438_v36, %v7186_v49  ;;  %v2837_v49 = vadd.f32 %v7438_v36, %v7179_v56  ;;  %v2838_v56 = vadd.f32 %v7438_v36, %v7188_v45  ;;  %v2839_v45 = vadd.f32 %v7438_v36, %v7190_v60 }
 0x351   : > { %3276 = vst [vmem:[#allocation1 + $0x6] ss:$9 sm:$0xff] %v2998_v51  ;;  %v7196_v3 = vadd.s32 4294967288, %v7193_v42  ;;  %v2828_v51 = vadd.f32 %v7438_v36, %v7165_v28  ;;  %v7201_v8 = vadd.s32 4294967280, %v7193_v42  ;;  %v7204_v58 = vadd.s32 4294967272, %v7193_v42 }
 0x352   : > { %3277 = vst [vmem:[#allocation1 + $0x7] ss:$9 sm:$0xff] %v2999_v12  ;;  %v3428_v12 = vpop.permute.xlu0 %3427 }
 0x353   : > { %v3523_v57 = vperm.slane %v3428_v12, %v7196_v3  ;;  %v3036_v9 = vperm.slane %v2828_v51, 4  ;;  %v3058_v12 = vperm.slane %v2831_v47, 2 }
 0x355   : > { %v3437_v28 = vpop.permute.xlu2 %3436 }
 0x359   : > { %v3278_v52 = vld [vmem:[#allocation1] sm:$0xff] }
 0x35a   : > { %3279 = vst [vmem:[#allocation1] ss:$9 sm:$0xff] %v3000_v21  ;;  %3469 = vperm.xlu2 %3840, %v3278_v52   ;;  %v3431_v21 = vpop.permute.xlu1 %3430  ;;  %v3033_v52 = vperm.slane %v2828_v51, 1 }
 0x35b   : > { %3280 = vst [vmem:[#allocation1 + $0x1] ss:$9 sm:$0xff] %v3001_v24  ;;  %v3032_v24 = vperm.slane %v2828_v51, 0 }
 0x35c   : > { %3281 = vst [vmem:[#allocation1 + $0x2] ss:$9 sm:$0xff] %v3002_v43  ;;  %v7208_v43 = vadd.s32 4294967264, %v7193_v42 }
 0x35d   : > { %3282 = vst [vmem:[#allocation1 + $0x3] ss:$9 sm:$0xff] %v3003_v0  ;;  %v3521_v0 = vperm.slane %v3425_v59, %v7193_v42  ;;  %v3443_v60 = vpop.permute.xlu2 %3442 }
 0x35e   : > { %3283 = vst [vmem:[#allocation1 + $0x4] ss:$9 sm:$0xff] %v3004_v31  ;;  %v3034_v31 = vperm.slane %v2828_v51, 2 }
 0x35f   : > { %3284 = vst [vmem:[#allocation1 + $0x5] ss:$9 sm:$0xff] %v3005_v17  ;;  %v3527_v17 = vperm.slane %v3431_v21, %v7201_v8  ;;  %v3525_v46 = vsel %vm3524_vm0, %v3523_v57, %v3521_v0  ;;  %v3059_v57 = vperm.slane %v2831_v47, 3  ;;  %v3062_v0 = vperm.slane %v2831_v47, 6 }
 0x360   : > { %3285 = vst [vmem:[#allocation1 + $0x6] ss:$9 sm:$0xff] %v3006_v2  ;;  %v3035_v2 = vperm.slane %v2828_v51, 3 }
 0x361   : > { %3286 = vst [vmem:[#allocation1 + $0x7] ss:$9 sm:$0xff] %v3007_v19  ;;  %v3531_v19 = vperm.slane %v3434_v5, %v7204_v58  ;;  %v3055_v5 = vperm.slane %v2830_v13, 7 }
 0x368   : > { %v3287_v7 = vld [vmem:[#allocation1] sm:$0xff] }
 0x369   : > { %3288 = vst [vmem:[#allocation1] ss:$9 sm:$0xff] %v3008_v55  ;;  %3472 = vperm.xlu1 %3842, %v3287_v7   ;;  %v3535_v55 = vperm.slane %v3437_v28, %v7208_v43  ;;  %v3038_v7 = vperm.slane %v2828_v51, 6  ;;  %v3063_v28 = vperm.slane %v2831_v47, 7 }
 0x36a   : > { %3289 = vst [vmem:[#allocation1 + $0x1] ss:$9 sm:$0xff] %v3009_v14  ;;  %v3529_v14 = vsel %vm3528_vm1, %v3527_v17, %v3525_v46  ;;  %v3065_v17 = vperm.slane %v2832_v41, 1  ;;  %v3068_v46 = vperm.slane %v2832_v41, 4 }
 0x36b   : > { %3290 = vst [vmem:[#allocation1 + $0x2] ss:$9 sm:$0xff] %v3010_v27  ;;  %v3037_v27 = vperm.slane %v2828_v51, 5 }
 0x36c   : > { %3291 = vst [vmem:[#allocation1 + $0x3] ss:$9 sm:$0xff] %v3011_v25  ;;  %v3533_v25 = vsel %vm3532_vm2, %v3531_v19, %v3529_v14  ;;  %v3067_v19 = vperm.slane %v2832_v41, 3  ;;  %v3071_v14 = vperm.slane %v2832_v41, 7 }
 0x36d   : > { %3292 = vst [vmem:[#allocation1 + $0x4] ss:$9 sm:$0xff] %v3012_v20  ;;  %v3537_v20 = vsel %vm3536_vm3, %v3535_v55, %v3533_v25  ;;  %v3070_v55 = vperm.slane %v2832_v41, 6  ;;  %v3073_v25 = vperm.slane %v2833_v35, 1 }
 0x36e   : > { %3293 = vst [vmem:[#allocation1 + $0x5] ss:$9 sm:$0xff] %v3013_v54  ;;  %v3039_v54 = vperm.slane %v2828_v51, 7  ;;  %v3057_v51 = vperm.slane %v2831_v47, 1 }
 0x36f   : > { %3294 = vst [vmem:[#allocation1 + $0x6] ss:$9 sm:$0xff] %v3014_v61  ;;  %v2829_v61 = vadd.f32 %v7438_v36, %v7170_v10 }
 0x370   : > { %3295 = vst [vmem:[#allocation1 + $0x7] ss:$9 sm:$0xff] %v3015_v18 }
 0x371   : > { %v3040_v18 = vperm.slane %v2829_v61, 0  ;;  %v3041_v29 = vperm.slane %v2829_v61, 1 }
 0x377   : > { %v3296_v62 = vld [vmem:[#allocation1] sm:$0xff] }
 0x378   : > { %3297 = vst [vmem:[#allocation1] ss:$9 sm:$0xff] %v3016_v22  ;;  %3475 = vperm.xlu0 %3841, %v3296_v62   ;;  %v3042_v22 = vperm.slane %v2829_v61, 2  ;;  %v3044_v62 = vperm.slane %v2829_v61, 4 }
 0x379   : > { %3298 = vst [vmem:[#allocation1 + $0x1] ss:$9 sm:$0xff] %v3017_v48 }
 0x37a   : > { %3299 = vst [vmem:[#allocation1 + $0x2] ss:$9 sm:$0xff] %v3018_v38  ;;  %v3043_v38 = vperm.slane %v2829_v61, 3 }
 0x37b   : > { %3300 = vst [vmem:[#allocation1 + $0x3] ss:$9 sm:$0xff] %v3019_v53  ;;  %v3045_v53 = vperm.slane %v2829_v61, 5 }
 0x37c   : > { %3301 = vst [vmem:[#allocation1 + $0x4] ss:$9 sm:$0xff] %v3020_v6  ;;  %v3046_v6 = vperm.slane %v2829_v61, 6 }
 0x37d   : > { %3302 = vst [vmem:[#allocation1 + $0x5] ss:$9 sm:$0xff] %v3021_v30  ;;  %v3047_v30 = vperm.slane %v2829_v61, 7  ;;  %v3076_v61 = vperm.slane %v2833_v35, 4 }
 0x37e   : > { %3303 = vst [vmem:[#allocation1 + $0x6] ss:$9 sm:$0xff] %v3022_v40  ;;  %v7221_v40 = vadd.s32 4294967256, %v7193_v42 }
 0x37f   : > { %3304 = vst [vmem:[#allocation1 + $0x7] ss:$9 sm:$0xff] %v3023_v16  ;;  %v3440_v16 = vpop.permute.xlu1 %3439 }
 0x380   : > { %v3539_v10 = vperm.slane %v3440_v16, %v7221_v40  ;;  %v3085_v16 = vperm.slane %v2834_v1, 5 }
 0x382   : > { %v7227_v59 = vsel %vm3540_vm4, %v3539_v10, %v3537_v20  ;;  %v3086_v10 = vperm.slane %v2834_v1, 6 }
 0x386   : > { %v3305_v39 = vld [vmem:[#allocation1] sm:$0xff] }
 0x387   : > { %3306 = vst [vmem:[#allocation1] ss:$9 sm:$0xff] %v3024_v15  ;;  %3478 = vperm.xlu2 %3840, %v3305_v39   ;;  %v3048_v15 = vperm.slane %v2830_v13, 0 }
 0x388   : > { %3307 = vst [vmem:[#allocation1 + $0x1] ss:$9 sm:$0xff] %v3025_v34  ;;  %v3049_v34 = vperm.slane %v2830_v13, 1 }
 0x389   : > { %3308 = vst [vmem:[#allocation1 + $0x2] ss:$9 sm:$0xff] %v3026_v11  ;;  %v3050_v11 = vperm.slane %v2830_v13, 2 }
 0x38a   : > { %3309 = vst [vmem:[#allocation1 + $0x3] ss:$9 sm:$0xff] %v3027_v32  ;;  %v3051_v32 = vperm.slane %v2830_v13, 3 }
 0x38b   : > { %3310 = vst [vmem:[#allocation1 + $0x4] ss:$9 sm:$0xff] %v3028_v50  ;;  %v3052_v50 = vperm.slane %v2830_v13, 4 }
 0x38c   : > { %3311 = vst [vmem:[#allocation1 + $0x5] ss:$9 sm:$0xff] %v3029_v26  ;;  %v3053_v26 = vperm.slane %v2830_v13, 5 }
 0x38d   : > { %3312 = vst [vmem:[#allocation1 + $0x6] ss:$9 sm:$0xff] %v3030_v23  ;;  %v3054_v23 = vperm.slane %v2830_v13, 6  ;;  %v3087_v13 = vperm.slane %v2834_v1, 7 }
 0x38e   : > { %3313 = vst [vmem:[#allocation1 + $0x7] ss:$9 sm:$0xff] %v3031_v4  ;;  %v3056_v4 = vperm.slane %v2831_v47, 0 }
 0x395   : > { %v3314_v63 = vld [vmem:[#allocation1] sm:$0xff] }
 0x396   : > { %3315 = vst [vmem:[#allocation1] ss:$9 sm:$0xff] %v3032_v24  ;;  %3481 = vperm.xlu1 %3842, %v3314_v63   ;;  %v3060_v24 = vperm.slane %v2831_v47, 4 }
 0x397   : > { %3316 = vst [vmem:[#allocation1 + $0x1] ss:$9 sm:$0xff] %v3033_v52  ;;  %v3061_v52 = vperm.slane %v2831_v47, 5  ;;  %v3096_v47 = vperm.slane %v2836_v37, 0 }
 0x398   : > { %3317 = vst [vmem:[#allocation1 + $0x2] ss:$9 sm:$0xff] %v3034_v31  ;;  %v3064_v31 = vperm.slane %v2832_v41, 0 }
 0x399   : > { %3318 = vst [vmem:[#allocation1 + $0x3] ss:$9 sm:$0xff] %v3035_v2  ;;  %v3066_v2 = vperm.slane %v2832_v41, 2 }
 0x39a   : > { %3319 = vst [vmem:[#allocation1 + $0x4] ss:$9 sm:$0xff] %v3036_v9  ;;  %v3069_v9 = vperm.slane %v2832_v41, 5  ;;  %v3105_v41 = vperm.slane %v2837_v49, 1 }
 0x39b   : > { %3320 = vst [vmem:[#allocation1 + $0x5] ss:$9 sm:$0xff] %v3037_v27  ;;  %v3072_v27 = vperm.slane %v2833_v35, 0 }
 0x39c   : > { %3321 = vst [vmem:[#allocation1 + $0x6] ss:$9 sm:$0xff] %v3038_v7  ;;  %v3074_v7 = vperm.slane %v2833_v35, 2 }
 0x39d   : > { %3322 = vst [vmem:[#allocation1 + $0x7] ss:$9 sm:$0xff] %v3039_v54  ;;  %v3075_v54 = vperm.slane %v2833_v35, 3 }
 0x3a4   : > { %v3323_v48 = vld [vmem:[#allocation1] sm:$0xff] }
 0x3a5   : > { %3324 = vst [vmem:[#allocation1] ss:$9 sm:$0xff] %v3040_v18  ;;  %3484 = vperm.xlu0 %3841, %v3323_v48   ;;  %v3077_v18 = vperm.slane %v2833_v35, 5  ;;  %v3080_v48 = vperm.slane %v2834_v1, 0 }
 0x3a6   : > { %3325 = vst [vmem:[#allocation1 + $0x1] ss:$9 sm:$0xff] %v3041_v29  ;;  %v3078_v29 = vperm.slane %v2833_v35, 6 }
 0x3a7   : > { %3326 = vst [vmem:[#allocation1 + $0x2] ss:$9 sm:$0xff] %v3042_v22  ;;  %v3079_v22 = vperm.slane %v2833_v35, 7  ;;  %v3114_v35 = vperm.slane %v2838_v56, 2 }
 0x3a8   : > { %3327 = vst [vmem:[#allocation1 + $0x3] ss:$9 sm:$0xff] %v3043_v38  ;;  %v3081_v38 = vperm.slane %v2834_v1, 1 }
 0x3a9   : > { %3328 = vst [vmem:[#allocation1 + $0x4] ss:$9 sm:$0xff] %v3044_v62  ;;  %v3082_v62 = vperm.slane %v2834_v1, 2 }
 0x3aa   : > { %3329 = vst [vmem:[#allocation1 + $0x5] ss:$9 sm:$0xff] %v3045_v53  ;;  %v3083_v53 = vperm.slane %v2834_v1, 3 }
 0x3ab   : > { %3330 = vst [vmem:[#allocation1 + $0x6] ss:$9 sm:$0xff] %v3046_v6 }
 0x3ac   : > { %3331 = vst [vmem:[#allocation1 + $0x7] ss:$9 sm:$0xff] %v3047_v30  ;;  %v3084_v30 = vperm.slane %v2834_v1, 4  ;;  %v3123_v1 = vperm.slane %v2839_v45, 3 }
 0x3b3   : > { %v3332_v39 = vld [vmem:[#allocation1] sm:$0xff] }
 0x3b4   : > { %3333 = vst [vmem:[#allocation1] ss:$9 sm:$0xff] %v3048_v15  ;;  %3487 = vperm.xlu2 %3840, %v3332_v39   ;;  %v3088_v15 = vperm.slane %v2835_v33, 0  ;;  %v3091_v39 = vperm.slane %v2835_v33, 3 }
 0x3b5   : > { %3334 = vst [vmem:[#allocation1 + $0x1] ss:$9 sm:$0xff] %v3049_v34  ;;  %v3089_v34 = vperm.slane %v2835_v33, 1 }
 0x3b6   : > { %3335 = vst [vmem:[#allocation1 + $0x2] ss:$9 sm:$0xff] %v3050_v11  ;;  %v3090_v11 = vperm.slane %v2835_v33, 2 }
 0x3b7   : > { %3336 = vst [vmem:[#allocation1 + $0x3] ss:$9 sm:$0xff] %v3051_v32 }
 0x3b8   : > { %3337 = vst [vmem:[#allocation1 + $0x4] ss:$9 sm:$0xff] %v3052_v50  ;;  %v3092_v50 = vperm.slane %v2835_v33, 4 }
 0x3b9   : > { %3338 = vst [vmem:[#allocation1 + $0x5] ss:$9 sm:$0xff] %v3053_v26  ;;  %v3093_v26 = vperm.slane %v2835_v33, 5 }
 0x3ba   : > { %3339 = vst [vmem:[#allocation1 + $0x6] ss:$9 sm:$0xff] %v3054_v23  ;;  %v3094_v23 = vperm.slane %v2835_v33, 6 }
 0x3bb   : > { %3340 = vst [vmem:[#allocation1 + $0x7] ss:$9 sm:$0xff] %v3055_v5  ;;  %v3095_v5 = vperm.slane %v2835_v33, 7 }
 0x3c2   : > { %v3341_v21 = vld [vmem:[#allocation1] sm:$0xff] }
 0x3c3   : > { %3342 = vst [vmem:[#allocation1] ss:$9 sm:$0xff] %v3056_v4  ;;  %3490 = vperm.xlu1 %3842, %v3341_v21   ;;  %v3097_v4 = vperm.slane %v2836_v37, 1  ;;  %v3100_v21 = vperm.slane %v2836_v37, 4 }
 0x3c4   : > { %3343 = vst [vmem:[#allocation1 + $0x1] ss:$9 sm:$0xff] %v3057_v51  ;;  %v3098_v51 = vperm.slane %v2836_v37, 2 }
 0x3c5   : > { %3344 = vst [vmem:[#allocation1 + $0x2] ss:$9 sm:$0xff] %v3058_v12  ;;  %v3099_v12 = vperm.slane %v2836_v37, 3 }
 0x3c6   : > { %3345 = vst [vmem:[#allocation1 + $0x3] ss:$9 sm:$0xff] %v3059_v57 }
 0x3c7   : > { %3346 = vst [vmem:[#allocation1 + $0x4] ss:$9 sm:$0xff] %v3060_v24  ;;  %v3101_v24 = vperm.slane %v2836_v37, 5 }
 0x3c8   : > { %3347 = vst [vmem:[#allocation1 + $0x5] ss:$9 sm:$0xff] %v3061_v52  ;;  %v3102_v52 = vperm.slane %v2836_v37, 6 }
 0x3c9   : > { %3348 = vst [vmem:[#allocation1 + $0x6] ss:$9 sm:$0xff] %v3062_v0  ;;  %v3103_v0 = vperm.slane %v2836_v37, 7 }
 0x3ca   : > { %3349 = vst [vmem:[#allocation1 + $0x7] ss:$9 sm:$0xff] %v3063_v28  ;;  %v3104_v28 = vperm.slane %v2837_v49, 0 }
 0x3d1   : > { %v3350_v63 = vld [vmem:[#allocation1] sm:$0xff] }
 0x3d2   : > { %3351 = vst [vmem:[#allocation1] ss:$9 sm:$0xff] %v3064_v31  ;;  %3493 = vperm.xlu0 %3841, %v3350_v63   ;;  %v3106_v31 = vperm.slane %v2837_v49, 2  ;;  %v3108_v63 = vperm.slane %v2837_v49, 4 }
 0x3d3   : > { %3352 = vst [vmem:[#allocation1 + $0x1] ss:$9 sm:$0xff] %v3065_v17  ;;  %v3107_v17 = vperm.slane %v2837_v49, 3 }
 0x3d4   : > { %3353 = vst [vmem:[#allocation1 + $0x2] ss:$9 sm:$0xff] %v3066_v2 }
 0x3d5   : > { %3354 = vst [vmem:[#allocation1 + $0x3] ss:$9 sm:$0xff] %v3067_v19  ;;  %v3109_v19 = vperm.slane %v2837_v49, 5 }
 0x3d6   : > { %3355 = vst [vmem:[#allocation1 + $0x4] ss:$9 sm:$0xff] %v3068_v46  ;;  %v3110_v46 = vperm.slane %v2837_v49, 6 }
 0x3d7   : > { %3356 = vst [vmem:[#allocation1 + $0x5] ss:$9 sm:$0xff] %v3069_v9  ;;  %v3111_v9 = vperm.slane %v2837_v49, 7  ;;  %v3542_v49 = vadd.s32 4294967248, %v7193_v42 }
 0x3d8   : > { %3357 = vst [vmem:[#allocation1 + $0x6] ss:$9 sm:$0xff] %v3070_v55  ;;  %v3112_v55 = vperm.slane %v2838_v56, 0 }
 0x3d9   : > { %3358 = vst [vmem:[#allocation1 + $0x7] ss:$9 sm:$0xff] %v3071_v14  ;;  %v3113_v14 = vperm.slane %v2838_v56, 1 }
 0x3e0   : > { %v3359_v20 = vld [vmem:[#allocation1] sm:$0xff] }
 0x3e1   : > { %3360 = vst [vmem:[#allocation1] ss:$9 sm:$0xff] %v3072_v27  ;;  %3496 = vperm.xlu2 %3840, %v3359_v20   ;;  %v3115_v27 = vperm.slane %v2838_v56, 3  ;;  %v3117_v20 = vperm.slane %v2838_v56, 5 }
 0x3e2   : > { %3361 = vst [vmem:[#allocation1 + $0x1] ss:$9 sm:$0xff] %v3073_v25 }
 0x3e3   : > { %3362 = vst [vmem:[#allocation1 + $0x2] ss:$9 sm:$0xff] %v3074_v7  ;;  %v3116_v7 = vperm.slane %v2838_v56, 4 }
 0x3e4   : > { %3363 = vst [vmem:[#allocation1 + $0x3] ss:$9 sm:$0xff] %v3075_v54  ;;  %v3118_v54 = vperm.slane %v2838_v56, 6 }
 0x3e5   : > { %3364 = vst [vmem:[#allocation1 + $0x4] ss:$9 sm:$0xff] %v3076_v61  ;;  %v3119_v61 = vperm.slane %v2838_v56, 7 }
 0x3e6   : > { %3365 = vst [vmem:[#allocation1 + $0x5] ss:$9 sm:$0xff] %v3077_v18  ;;  %v3120_v18 = vperm.slane %v2839_v45, 0 }
 0x3e7   : > { %3366 = vst [vmem:[#allocation1 + $0x6] ss:$9 sm:$0xff] %v3078_v29  ;;  %v3121_v29 = vperm.slane %v2839_v45, 1 }
 0x3e8   : > { %3367 = vst [vmem:[#allocation1 + $0x7] ss:$9 sm:$0xff] %v3079_v22  ;;  %v3122_v22 = vperm.slane %v2839_v45, 2 }
 0x3ef   : > { %v3368_v6 = vld [vmem:[#allocation1] sm:$0xff] }
 0x3f0   : > { %3369 = vst [vmem:[#allocation1] ss:$9 sm:$0xff] %v3080_v48  ;;  %3499 = vperm.xlu1 %3842, %v3368_v6   ;;  %v3127_v6 = vperm.slane %v2839_v45, 7 }
 0x3f1   : > { %3370 = vst [vmem:[#allocation1 + $0x1] ss:$9 sm:$0xff] %v3081_v38  ;;  %v3124_v38 = vperm.slane %v2839_v45, 4 }
 0x3f2   : > { %3371 = vst [vmem:[#allocation1 + $0x2] ss:$9 sm:$0xff] %v3082_v62  ;;  %v3125_v62 = vperm.slane %v2839_v45, 5 }
 0x3f3   : > { %3372 = vst [vmem:[#allocation1 + $0x3] ss:$9 sm:$0xff] %v3083_v53  ;;  %v3126_v53 = vperm.slane %v2839_v45, 6 }
 0x3f4   : > { %3373 = vst [vmem:[#allocation1 + $0x4] ss:$9 sm:$0xff] %v3084_v30  ;;  %v3446_v30 = vpop.permute.xlu1 %3445 }
 0x3f5   : > { %3374 = vst [vmem:[#allocation1 + $0x5] ss:$9 sm:$0xff] %v3085_v16  ;;  %v3449_v16 = vpop.permute.xlu0 %3448 }
 0x3f6   : > { %3375 = vst [vmem:[#allocation1 + $0x6] ss:$9 sm:$0xff] %v3086_v10  ;;  %v7247_v10 = vpop.permute.xlu2 %3451 }
 0x3f7   : > { %3376 = vst [vmem:[#allocation1 + $0x7] ss:$9 sm:$0xff] %v3087_v13 }
 0x3fc   : > { %v7249_v13 = vpop.permute.xlu1 %3454 }
 0x3fd   : > { %v7251_v33 = vpop.permute.xlu0 %3457 }
 0x3fe   : > { %v3377_v32 = vld [vmem:[#allocation1] sm:$0xff] }
 0x3ff   : > { %3502 = vperm.xlu0 %3841, %v3377_v32   ;;  %3378 = vst [vmem:[#allocation1] ss:$9 sm:$0xff] %v3088_v15  ;;  %v7253_v15 = vpop.permute.xlu2 %3460 }
 0x400   : > { %3379 = vst [vmem:[#allocation1 + $0x1] ss:$9 sm:$0xff] %v3089_v34 }
 0x401   : > { %3380 = vst [vmem:[#allocation1 + $0x2] ss:$9 sm:$0xff] %v3090_v11 }
 0x402   : > { %3381 = vst [vmem:[#allocation1 + $0x3] ss:$9 sm:$0xff] %v3091_v39 }
 0x403   : > { %3382 = vst [vmem:[#allocation1 + $0x4] ss:$9 sm:$0xff] %v3092_v50 }
 0x404   : > { %3383 = vst [vmem:[#allocation1 + $0x5] ss:$9 sm:$0xff] %v3093_v26  ;;  %v7255_v34 = vpop.permute.xlu1 %3463 }
 0x405   : > { %3384 = vst [vmem:[#allocation1 + $0x6] ss:$9 sm:$0xff] %v3094_v23  ;;  %v7257_v11 = vpop.permute.xlu0 %3466 }
 0x406   : > { %3385 = vst [vmem:[#allocation1 + $0x7] ss:$9 sm:$0xff] %v3095_v5 }
 0x407   : > { %v7259_v39 = vpop.permute.xlu2 %3469 }
 0x40c   : > { %v3473_v32 = vpop.permute.xlu1 %3472 }
 0x40d   : > { %v3386_v57 = vld [vmem:[#allocation1] sm:$0xff]  ;;  %v3476_v50 = vpop.permute.xlu0 %3475 }
 0x40e   : > { %3505 = vperm.xlu2 %3840, %v3386_v57   ;;  %3387 = vst [vmem:[#allocation1] ss:$9 sm:$0xff] %v3096_v47  ;;  %v3583_v47 = vperm.slane %v3476_v50, %v7196_v3 }
 0x40f   : > { %3388 = vst [vmem:[#allocation1 + $0x1] ss:$9 sm:$0xff] %v3097_v4  ;;  %v3479_v26 = vpop.permute.xlu2 %3478 }
 0x410   : > { %3389 = vst [vmem:[#allocation1 + $0x2] ss:$9 sm:$0xff] %v3098_v51 }
 0x411   : > { %3390 = vst [vmem:[#allocation1 + $0x3] ss:$9 sm:$0xff] %v3099_v12  ;;  %v3582_v12 = vperm.slane %v3473_v32, %v7193_v42 }
 0x412   : > { %3391 = vst [vmem:[#allocation1 + $0x4] ss:$9 sm:$0xff] %v3100_v21 }
 0x413   : > { %3392 = vst [vmem:[#allocation1 + $0x5] ss:$9 sm:$0xff] %v3101_v24  ;;  %v3584_v57 = vsel %vm3524_vm0, %v3583_v47, %v3582_v12  ;;  %v3585_v24 = vperm.slane %v3479_v26, %v7201_v8  ;;  %vm3619_vm0 = vcmp.lt.s32.totalorder %v3519_v44, 256 }
 0x414   : > { %3393 = vst [vmem:[#allocation1 + $0x6] ss:$9 sm:$0xff] %v3102_v52  ;;  %v3482_v23 = vpop.permute.xlu1 %3481 }
 0x415   : > { %3394 = vst [vmem:[#allocation1 + $0x7] ss:$9 sm:$0xff] %v3103_v0  ;;  %v3587_v21 = vperm.slane %v3482_v23, %v7204_v58 }
 0x417   : > { %v3485_v5 = vpop.permute.xlu0 %3484  ;;  %v3488_v37 = vpop.permute.xlu2 %3487 }
 0x418   : > { %v3589_v52 = vperm.slane %v3485_v5, %v7208_v43  ;;  %v3591_v8 = vperm.slane %v3488_v37, %v7221_v40  ;;  %v3543_v43 = vperm.slane %v3443_v60, %v3542_v49 }
 0x41a   : > { %v3545_v40 = vsel %vm3544_vm5, %v3543_v43, %v7227_v59  ;;  %v3570_v59 = vadd.s32 4294967192, %v7193_v42 }
 0x41c   : > { %v3395_v2 = vld [vmem:[#allocation1] sm:$0xff]  ;;  %v3571_v26 = vperm.slane %v7255_v34, %v3570_v59 }
 0x41d   : > { %3508 = vperm.xlu1 %3842, %v3395_v2   ;;  %3396 = vst [vmem:[#allocation1] ss:$9 sm:$0xff] %v3104_v28  ;;  %v3586_v28 = vsel %vm3528_vm1, %v3585_v24, %v3584_v57 }
 0x41e   : > { %3397 = vst [vmem:[#allocation1 + $0x1] ss:$9 sm:$0xff] %v3105_v41  ;;  %v3546_v41 = vadd.s32 4294967240, %v7193_v42  ;;  %v3588_v3 = vsel %vm3532_vm2, %v3587_v21, %v3586_v28 }
 0x41f   : > { %3398 = vst [vmem:[#allocation1 + $0x2] ss:$9 sm:$0xff] %v3106_v31  ;;  %v3590_v2 = vsel %vm3536_vm3, %v3589_v52, %v3588_v3 }
 0x420   : > { %3399 = vst [vmem:[#allocation1 + $0x3] ss:$9 sm:$0xff] %v3107_v17  ;;  %v3550_v17 = vadd.s32 4294967232, %v7193_v42  ;;  %v3592_v56 = vsel %vm3540_vm4, %v3591_v8, %v3590_v2 }
 0x421   : > { %3400 = vst [vmem:[#allocation1 + $0x4] ss:$9 sm:$0xff] %v3108_v63 }
 0x422   : > { %3401 = vst [vmem:[#allocation1 + $0x5] ss:$9 sm:$0xff] %v3109_v19 }
 0x423   : > { %3402 = vst [vmem:[#allocation1 + $0x6] ss:$9 sm:$0xff] %v3110_v46  ;;  %v3554_v46 = vadd.s32 4294967224, %v7193_v42 }
 0x424   : > { %3403 = vst [vmem:[#allocation1 + $0x7] ss:$9 sm:$0xff] %v3111_v9  ;;  %v3547_v9 = vperm.slane %v3446_v30, %v3546_v41 }
 0x425   : > { %v3555_v45 = vperm.slane %v7247_v10, %v3554_v46 }
 0x42b   : > { %v3404_v25 = vld [vmem:[#allocation1] sm:$0xff] }
 0x42c   : > { %3511 = vperm.xlu0 %3841, %v3404_v25   ;;  %3405 = vst [vmem:[#allocation1] ss:$9 sm:$0xff] %v3112_v55  ;;  %v3551_v55 = vperm.slane %v3449_v16, %v3550_v17 }
 0x42d   : > { %3406 = vst [vmem:[#allocation1 + $0x1] ss:$9 sm:$0xff] %v3113_v14  ;;  %v3558_v14 = vadd.s32 4294967216, %v7193_v42 }
 0x42e   : > { %3407 = vst [vmem:[#allocation1 + $0x2] ss:$9 sm:$0xff] %v3114_v35 }
 0x42f   : > { %3408 = vst [vmem:[#allocation1 + $0x3] ss:$9 sm:$0xff] %v3115_v27  ;;  %v3562_v27 = vadd.s32 4294967208, %v7193_v42 }
 0x430   : > { %3409 = vst [vmem:[#allocation1 + $0x4] ss:$9 sm:$0xff] %v3116_v7 }
 0x431   : > { %3410 = vst [vmem:[#allocation1 + $0x5] ss:$9 sm:$0xff] %v3117_v20 }
 0x432   : > { %3411 = vst [vmem:[#allocation1 + $0x6] ss:$9 sm:$0xff] %v3118_v54 }
 0x433   : > { %3412 = vst [vmem:[#allocation1 + $0x7] ss:$9 sm:$0xff] %v3119_v61 }
 0x435   : > { %v3491_v4 = vpop.permute.xlu1 %3490 }
 0x436   : > { %v3593_v63 = vperm.slane %v3491_v4, %v3542_v49  ;;  %v3578_v4 = vadd.s32 4294967176, %v7193_v42 }
 0x438   : > { %v3594_v35 = vsel %vm3544_vm5, %v3593_v63, %v3592_v56 }
 0x43a   : > { %v3413_v48 = vld [vmem:[#allocation1] sm:$0xff] }
 0x43b   : > { %3514 = vperm.xlu2 %3840, %v3413_v48   ;;  %3414 = vst [vmem:[#allocation1] ss:$9 sm:$0xff] %v3120_v18  ;;  %v3497_v0 = vpop.permute.xlu2 %3496  ;;  %v3549_v18 = vsel %vm3548_vm6, %v3547_v9, %v3545_v40  ;;  %v3559_v48 = vperm.slane %v7249_v13, %v3558_v14 }
 0x43c   : > { %3415 = vst [vmem:[#allocation1 + $0x1] ss:$9 sm:$0xff] %v3121_v29  ;;  %v3597_v54 = vperm.slane %v3497_v0, %v3550_v17 }
 0x43d   : > { %3416 = vst [vmem:[#allocation1 + $0x2] ss:$9 sm:$0xff] %v3122_v22  ;;  %v3553_v22 = vsel %vm3552_vm7, %v3551_v55, %v3549_v18 }
 0x43e   : > { %3417 = vst [vmem:[#allocation1 + $0x3] ss:$9 sm:$0xff] %v3123_v1  ;;  %v3566_v1 = vadd.s32 4294967200, %v7193_v42  ;;  %v3557_v16 = vsel %vm3556_vm8, %v3555_v45, %v3553_v22 }
 0x43f   : > { %3418 = vst [vmem:[#allocation1 + $0x4] ss:$9 sm:$0xff] %v3124_v38  ;;  %v3561_v50 = vsel %vm3560_vm9, %v3559_v48, %v3557_v16 }
 0x440   : > { %3419 = vst [vmem:[#allocation1 + $0x5] ss:$9 sm:$0xff] %v3125_v62  ;;  %v3567_v5 = vperm.slane %v7253_v15, %v3566_v1 }
 0x441   : > { %3420 = vst [vmem:[#allocation1 + $0x6] ss:$9 sm:$0xff] %v3126_v53  ;;  %v3563_v53 = vperm.slane %v7251_v33, %v3562_v27 }
 0x442   : > { %3421 = vst [vmem:[#allocation1 + $0x7] ss:$9 sm:$0xff] %v3127_v6 }
 0x443   : > { %v3565_v13 = vsel %vm3564_vm10, %v3563_v53, %v3561_v50 }
 0x444   : > { %v3494_v51 = vpop.permute.xlu0 %3493  ;;  %v3569_v12 = vsel %vm3568_vm11, %v3567_v5, %v3565_v13 }
 0x445   : > { %v3595_v19 = vperm.slane %v3494_v51, %v3546_v41  ;;  %v3573_v34 = vsel %vm3572_vm12, %v3571_v26, %v3569_v12 }
 0x447   : > { %v3596_v25 = vsel %vm3548_vm6, %v3595_v19, %v3594_v35 }
 0x448   : > { %v3598_v38 = vsel %vm3552_vm7, %v3597_v54, %v3596_v25 }
 0x449   : > { %v3422_v36 = vld [vmem:[#allocation1] sm:$0xff] }
 0x44a   : > { %3517 = vperm.xlu1 %3842, %v3422_v36   ;;  %v3574_v36 = vadd.s32 4294967184, %v7193_v42  ;;  %v3579_v42 = vperm.slane %v7259_v39, %v3578_v4 }
 0x44c   : > { %v3575_v37 = vperm.slane %v7257_v11, %v3574_v36 }
 0x44e   : > { %v3577_v15 = vsel %vm3576_vm13, %v3575_v37, %v3573_v34 }
 0x44f   : > { %v3581_v49 = vsel %vm3580_vm14, %v3579_v42, %v3577_v15 }
 0x462   : > { %v3500_v31 = vpop.permute.xlu1 %3499 }
 0x463   : > { %v3599_v20 = vperm.slane %v3500_v31, %v3554_v46 }
 0x465   : > { %v3600_v6 = vsel %vm3556_vm8, %v3599_v20, %v3598_v38 }
 0x468   : > { %v3506_v7 = vpop.permute.xlu2 %3505 }
 0x469   : > { %v3603_v10 = vperm.slane %v3506_v7, %v3562_v27 }
 0x471   : > { %v3503_v58 = vpop.permute.xlu0 %3502 }
 0x472   : > { %v3601_v61 = vperm.slane %v3503_v58, %v3558_v14 }
 0x474   : > { %v3602_v60 = vsel %vm3560_vm9, %v3601_v61, %v3600_v6 }
 0x475   : > { %v3604_v33 = vsel %vm3564_vm10, %v3603_v10, %v3602_v60 }
 0x48f   : > { %v3509_v29 = vpop.permute.xlu1 %3508 }
 0x490   : > { %v3605_v30 = vperm.slane %v3509_v29, %v3566_v1 }
 0x492   : > { %v3606_v47 = vsel %vm3568_vm11, %v3605_v30, %v3604_v33 }
 0x495   : > { %v3515_v23 = vpop.permute.xlu2 %3514 }
 0x496   : > { %v3609_v57 = vperm.slane %v3515_v23, %v3574_v36 }
 0x49e   : > { %v3512_v62 = vpop.permute.xlu0 %3511 }
 0x49f   : > { %v3607_v32 = vperm.slane %v3512_v62, %v3570_v59 }
 0x4a1   : > { %v3608_v51 = vsel %vm3572_vm12, %v3607_v32, %v3606_v47 }
 0x4a2   : > { %v3610_v52 = vsel %vm3576_vm13, %v3609_v57, %v3608_v51 }
 0x4bc   : > { %v3518_v21 = vpop.permute.xlu1 %3517 }
 0x4bd   : > { %v3611_v24 = vperm.slane %v3518_v21, %v3578_v4 }
 0x4bf   : > { %v3612_v11 = vsel %vm3580_vm14, %v3611_v24, %v3610_v52 }
 0x4c0   : > { %v3613_v0 = vrot.slane %v3612_v11, 7 }
 0x4c2   : > { %v3615_v28 = vsel %vm3614_vm15, %v3581_v49, %v3613_v0 }
 0x4c3   : > { %3621 = vst.msk [vmem:[%s292_s18] sm:$0x3] %vm3619_vm0, %v3615_v28 }
 0x4c4   : > { %4190 = shalt.err (!%p4187_p10)
}
 0x4c5   : > { %3772 = dma.vmem_to_hbm [thread:$0]  (%p4363_p7), %s3636_s28, 32, %s3638_s29, %s3623_s10  }
 0x4c6 PF: > { %s3649_s13 = sand.u32 1, %s4225_s20   ;;  %p7439_p12 = scmp.ge.s32.totalorder %s4237_s23, 2 }
 0x4c7   : > { %s3650_s25 = scalar_lea.sflag [#allocation5], %s3649_s13 }
 0x4c8   : > { %p3789_p13 = pnand %p7439_p12, %p4315_p6 }
 0x4ca   : > { %p3790_p0 = pneg %p3789_p13 }
 0x4cc   : > { %4220 = dma.done.wait (%p3790_p0), %s3650_s25, 32  }
 0x4cd   : > { %4222 = vsyncadd (%p3790_p0), %s3650_s25, 4294967264  ;;  %p21_p3 = scmp.ge.s32.totalorder %s4347_s27, 4   ;;  %s7440_s20 = smov %s4229_s21 }
 0x4ce   : > { %s7441_s21 = smov %s4233_s22  ;;  %s7442_s22 = smov %s4359_s6 }
 0x4cf   : > { %s7443_s23 = smov %s4347_s27  ;;  %23 = sbr.rel (!%p21_p3) target bundleno = 9 (0x9), region = 104 }
 0x4d4   :  { %3656 = vsyncpa [#allocation4], 1 }
 0x4d5   :  { %3658 = vsyncpa [#allocation4 + $0x1], 1 }
 0x4d6   :  { %3659 = vsyncpa [#allocation7], 1 }
 0x4d7   :  { %3660 = vsyncpa [#allocation10], 1 }
 0x4d8   :  { %3661 = vsyncpa [#allocation5], 1 }
 0x4d9   :  { %3663 = vsyncpa [#allocation5 + $0x1], 1 }

</bundles_post_ra>
